<compile_context>
chip_gen: v6e
topology: v6e:2x2x1
jax: 0.10.0
libtpu: 0.0.40
codegen_flags: <defaults>
</compile_context>

<pallas_src>
import functools
import math

import jax
import jax.numpy as jnp
from jax import lax
from jax.experimental import pallas as pl
from jax.experimental.pallas import tpu as pltpu


# ---------------------------------------------------------------------------
# In-kernel exact GELU
# ---------------------------------------------------------------------------
_INV_SQRT2 = 0.7071067811865476


def _erf_approx(z):
    """Abramowitz & Stegun 7.1.26 rational approximation of erf, |err| <= 1.5e-7."""
    a1, a2, a3, a4, a5 = (0.254829592, -0.284496736, 1.421413741,
                          -1.453152027, 1.061405429)
    p = 0.3275911
    az = jnp.abs(z)
    t = 1.0 / (1.0 + p * az)
    poly = ((((a5 * t + a4) * t + a3) * t + a2) * t + a1) * t
    e = 1.0 - poly * jnp.exp(-az * az)        # exp -> EUP slot (free here)
    return jnp.where(z < 0, -e, e)


def _gelu_exact(x):
    # TODO(synk): native erf lowering inside Mosaic is not guaranteed across jax
    # versions, so exact GELU uses the A&S erf approximation (|err| <= 1.5e-7).
    return 0.5 * x * (1.0 + _erf_approx(x * _INV_SQRT2))


# ---------------------------------------------------------------------------
# Fused Pallas kernel: one batch element per grid step
# ---------------------------------------------------------------------------
def _ffn_kernel(x_ref, w1_ref, wdw_ref, w2_ref, out_ref, pad_ref,
                *, H, W, c, hidden):
    # ---- 1x1 conv (dim -> hidden) + GELU, as an (H*W, c) @ (c, hidden) matmul
    x2d = x_ref[...].reshape(H * W, c)
    y1 = jnp.dot(x2d.astype(jnp.bfloat16),
                 w1_ref[...].astype(jnp.bfloat16),
                 preferred_element_type=jnp.float32)
    y1 = _gelu_exact(y1)

    # ---- zero-pad the (H, W, hidden) hidden image into VMEM scratch (padding=1)
    pad_ref[...] = jnp.zeros_like(pad_ref)
    pad_ref[1:H + 1, 1:W + 1, :] = y1.reshape(H, W, hidden)

    # ---- depthwise 3x3 conv (groups == hidden) + GELU
    xp = pad_ref[...]                         # (H+2, W+2, hidden)
    w_dw = wdw_ref[...]                       # (3, 3, hidden)
    acc = jnp.zeros((H, W, hidden), jnp.float32)
    for dy in range(3):                       # static 3x3 taps
        for dx in range(3):
            acc = acc + xp[dy:dy + H, dx:dx + W, :] * w_dw[dy, dx, :]
    y2 = _gelu_exact(acc)

    # ---- 1x1 conv (hidden -> dim), as an (H*W, hidden) @ (hidden, c) matmul
    out = jnp.dot(y2.reshape(H * W, hidden).astype(jnp.bfloat16),
                  w2_ref[...].astype(jnp.bfloat16),
                  preferred_element_type=jnp.float32)
    out_ref[...] = out.reshape(H, W, c)


# ---------------------------------------------------------------------------
# Wrapper
# ---------------------------------------------------------------------------
def feed_forward_forward(x, params):
    """x: (b, H, W, c) channels-last; params: w1 (c,hidden), w_dw (3,3,hidden), w2 (hidden,c)."""
    b, H, W, c = x.shape
    hidden = params["w1"].shape[1]
    assert params["w_dw"].shape == (3, 3, hidden)
    assert params["w2"].shape == (hidden, c)

    kernel = functools.partial(_ffn_kernel, H=H, W=W, c=c, hidden=hidden)
    call = pl.pallas_call(
        kernel,
        out_shape=jax.ShapeDtypeStruct((b, H, W, c), jnp.float32),
        grid=(b,),
        in_specs=[
            pl.BlockSpec((None, H, W, c), lambda i: (i, 0, 0, 0)),   # x
            pl.BlockSpec((c, hidden), lambda i: (0, 0)),             # W1 (1x1 conv)
            pl.BlockSpec((3, 3, hidden), lambda i: (0, 0, 0)),       # depthwise 3x3
            pl.BlockSpec((hidden, c), lambda i: (0, 0)),             # W2 (1x1 conv)
        ],
        out_specs=pl.BlockSpec((None, H, W, c), lambda i: (i, 0, 0, 0)),
        scratch_shapes=[pltpu.VMEM((H + 2, W + 2, hidden), jnp.float32)],
        compiler_params=pltpu.CompilerParams(
            dimension_semantics=("parallel",)),
    )
    return call(x.astype(jnp.float32), params["w1"], params["w_dw"], params["w2"])


# ---------------------------------------------------------------------------
# Pure-JAX reference (mirrors the PyTorch forward exactly)
# ---------------------------------------------------------------------------
def feed_forward_reference(x, params):
    b, H, W, c = x.shape
    hidden = params["w1"].shape[1]
    hp = lax.Precision.HIGHEST

    y = jnp.einsum("bhwc,cf->bhwf", x, params["w1"], precision=hp)
    y = 0.5 * y * (1.0 + lax.erf(y / math.sqrt(2.0)))                 # exact GELU
    y = lax.conv_general_dilated(
        y, params["w_dw"].reshape(3, 3, 1, hidden), (1, 1), "SAME",
        dimension_numbers=("NHWC", "HWIO", "NHWC"),
        feature_group_count=hidden, precision=hp)
    y = 0.5 * y * (1.0 + lax.erf(y / math.sqrt(2.0)))                 # exact GELU
    return jnp.einsum("bhwf,fc->bhwc", y, params["w2"], precision=hp)


# ---------------------------------------------------------------------------
if __name__ == "__main__":
    dim, mult = 16, 4
    hidden = dim * mult
    b, H, W = 2, 16, 16

    key = jax.random.PRNGKey(0)
    ks = jax.random.split(key, 4)
    s = 0.1
    params = dict(
        w1=s * jax.random.normal(ks[0], (dim, hidden), jnp.float32),
        w_dw=s * jax.random.normal(ks[1], (3, 3, hidden), jnp.float32),
        w2=s * jax.random.normal(ks[2], (hidden, dim), jnp.float32),
    )
    x = jax.random.normal(ks[3], (b, H, W, dim), jnp.float32)

    out = feed_forward_forward(x, params)
    out = jax.block_until_ready(out)

    ref = feed_forward_reference(x, params)
    if not bool(jnp.allclose(out, ref, rtol=2e-2, atol=2e-3)):
        err = float(jnp.max(jnp.abs(out - ref)))
        raise AssertionError(
            f"Pallas FeedForward output mismatch vs JAX reference (max abs err {err})")
    print("KERNEL_OK")
</pallas_src>

<mosaic_0001>
module attributes {stable_mosaic.version = 11 : i64} {
  func.func @_ffn_kernel(%arg0: i32, %arg1: memref<1x16x16x16xf32, #tpu.memory_space<vmem>>, %arg2: memref<16x64xf32, #tpu.memory_space<vmem>>, %arg3: memref<3x3x64xf32, #tpu.memory_space<vmem>>, %arg4: memref<64x16xf32, #tpu.memory_space<vmem>>, %arg5: memref<1x16x16x16xf32, #tpu.memory_space<vmem>>, %arg6: memref<18x18x64xf32, #tpu.memory_space<vmem>>) attributes {dimension_semantics = [#tpu.dimension_semantics<parallel>], iteration_bounds = array<i64: 2>, scalar_prefetch = 0 : i64, scratch_operands = 1 : i64, tpu.core_type = #tpu.core_type<tc>, window_params = [{transform_indices = @transform_0, window_bounds = array<i64: 1, 16, 16, 16>}, {pipeline_mode = #tpu.pipeline_mode<synchronous>, transform_indices = @transform_1, window_bounds = array<i64: 16, 64>}, {pipeline_mode = #tpu.pipeline_mode<synchronous>, transform_indices = @transform_2, window_bounds = array<i64: 3, 3, 64>}, {pipeline_mode = #tpu.pipeline_mode<synchronous>, transform_indices = @transform_3, window_bounds = array<i64: 64, 16>}, {transform_indices = @transform_4, window_bounds = array<i64: 1, 16, 16, 16>}]} {
    %c0 = arith.constant 0 : index
    %c0_0 = arith.constant 0 : index
    %c0_1 = arith.constant 0 : index
    %c0_2 = arith.constant 0 : index
    %0 = vector.load %arg1[%c0, %c0_0, %c0_1, %c0_2] : memref<1x16x16x16xf32, #tpu.memory_space<vmem>>, vector<1x16x16x16xf32>
    %1 = vector.shape_cast %0 : vector<1x16x16x16xf32> to vector<16x16x16xf32>
    %2 = vector.shape_cast %1 : vector<16x16x16xf32> to vector<256x16xf32>
    %3 = arith.truncf %2 : vector<256x16xf32> to vector<256x16xbf16>
    %c0_3 = arith.constant 0 : index
    %c0_4 = arith.constant 0 : index
    %4 = vector.load %arg2[%c0_3, %c0_4] : memref<16x64xf32, #tpu.memory_space<vmem>>, vector<16x64xf32>
    %5 = arith.truncf %4 : vector<16x64xf32> to vector<16x64xbf16>
    %cst = arith.constant dense<0.000000e+00> : vector<256x64xf32>
    %6 = tpu.matmul %3, %5, %cst {dimension_numbers = #tpu.dot_dimension_numbers<[1], [0], [0], [1], [0, 0, 1, 1], [], []>} : vector<256x16xbf16>, vector<16x64xbf16>, vector<256x64xf32> -> vector<256x64xf32>
    %cst_5 = arith.constant 5.000000e-01 : f32
    %7 = vector.broadcast %cst_5 : f32 to vector<256x64xf32>
    %8 = arith.mulf %7, %6 : vector<256x64xf32>
    %cst_6 = arith.constant 0.707106769 : f32
    %9 = vector.broadcast %cst_6 : f32 to vector<256x64xf32>
    %10 = arith.mulf %6, %9 : vector<256x64xf32>
    %11 = math.absf %10 : vector<256x64xf32>
    %cst_7 = arith.constant 0.327591091 : f32
    %12 = vector.broadcast %cst_7 : f32 to vector<256x64xf32>
    %13 = arith.mulf %12, %11 : vector<256x64xf32>
    %cst_8 = arith.constant 1.000000e+00 : f32
    %14 = vector.broadcast %cst_8 : f32 to vector<256x64xf32>
    %15 = arith.addf %14, %13 : vector<256x64xf32>
    %cst_9 = arith.constant 1.000000e+00 : f32
    %16 = vector.broadcast %cst_9 : f32 to vector<256x64xf32>
    %17 = arith.divf %16, %15 : vector<256x64xf32>
    %cst_10 = arith.constant 1.06140542 : f32
    %18 = vector.broadcast %cst_10 : f32 to vector<256x64xf32>
    %19 = arith.mulf %18, %17 : vector<256x64xf32>
    %cst_11 = arith.constant -1.45315206 : f32
    %20 = vector.broadcast %cst_11 : f32 to vector<256x64xf32>
    %21 = arith.addf %19, %20 : vector<256x64xf32>
    %22 = arith.mulf %21, %17 : vector<256x64xf32>
    %cst_12 = arith.constant 1.42141378 : f32
    %23 = vector.broadcast %cst_12 : f32 to vector<256x64xf32>
    %24 = arith.addf %22, %23 : vector<256x64xf32>
    %25 = arith.mulf %24, %17 : vector<256x64xf32>
    %cst_13 = arith.constant -0.284496725 : f32
    %26 = vector.broadcast %cst_13 : f32 to vector<256x64xf32>
    %27 = arith.addf %25, %26 : vector<256x64xf32>
    %28 = arith.mulf %27, %17 : vector<256x64xf32>
    %cst_14 = arith.constant 0.254829586 : f32
    %29 = vector.broadcast %cst_14 : f32 to vector<256x64xf32>
    %30 = arith.addf %28, %29 : vector<256x64xf32>
    %31 = arith.mulf %30, %17 : vector<256x64xf32>
    %cst_15 = arith.constant 0.000000e+00 : f32
    %32 = vector.broadcast %cst_15 : f32 to vector<256x64xf32>
    %33 = arith.subf %32, %11 : vector<256x64xf32>
    %34 = arith.mulf %33, %11 : vector<256x64xf32>
    %35 = math.exp %34 : vector<256x64xf32>
    %36 = arith.mulf %31, %35 : vector<256x64xf32>
    %cst_16 = arith.constant 1.000000e+00 : f32
    %37 = vector.broadcast %cst_16 : f32 to vector<256x64xf32>
    %38 = arith.subf %37, %36 : vector<256x64xf32>
    %cst_17 = arith.constant 0.000000e+00 : f32
    %39 = vector.broadcast %cst_17 : f32 to vector<256x64xf32>
    %40 = arith.cmpf olt, %10, %39 : vector<256x64xf32>
    %cst_18 = arith.constant 0.000000e+00 : f32
    %41 = vector.broadcast %cst_18 : f32 to vector<256x64xf32>
    %42 = arith.subf %41, %38 : vector<256x64xf32>
    %43 = arith.select %40, %42, %38 : vector<256x64xi1>, vector<256x64xf32>
    %cst_19 = arith.constant 1.000000e+00 : f32
    %44 = vector.broadcast %cst_19 : f32 to vector<256x64xf32>
    %45 = arith.addf %44, %43 : vector<256x64xf32>
    %46 = arith.mulf %8, %45 : vector<256x64xf32>
    %cst_20 = arith.constant 0.000000e+00 : f32
    %47 = vector.broadcast %cst_20 : f32 to vector<18x18x64xf32>
    %c0_21 = arith.constant 0 : index
    %c0_22 = arith.constant 0 : index
    %c0_23 = arith.constant 0 : index
    %48 = vector.load %arg6[%c0_21, %c0_22, %c0_23] : memref<18x18x64xf32, #tpu.memory_space<vmem>>, vector<18x18x64xf32>
    tpu.vector_store %arg6[%c0_21, %c0_22, %c0_23], %47 {strides = array<i32>} : memref<18x18x64xf32, #tpu.memory_space<vmem>>, vector<18x18x64xf32>,
    %49 = vector.shape_cast %46 : vector<256x64xf32> to vector<16x16x64xf32>
    %c1 = arith.constant 1 : index
    %c1_24 = arith.constant 1 : index
    %c0_25 = arith.constant 0 : index
    %50 = vector.load %arg6[%c1, %c1_24, %c0_25] : memref<18x18x64xf32, #tpu.memory_space<vmem>>, vector<16x16x64xf32>
    tpu.vector_store %arg6[%c1, %c1_24, %c0_25], %49 {strides = array<i32>} : memref<18x18x64xf32, #tpu.memory_space<vmem>>, vector<16x16x64xf32>,
    %c0_26 = arith.constant 0 : index
    %c0_27 = arith.constant 0 : index
    %c0_28 = arith.constant 0 : index
    %51 = vector.load %arg6[%c0_26, %c0_27, %c0_28] : memref<18x18x64xf32, #tpu.memory_space<vmem>>, vector<18x18x64xf32>
    %c0_29 = arith.constant 0 : index
    %c0_30 = arith.constant 0 : index
    %c0_31 = arith.constant 0 : index
    %52 = vector.load %arg3[%c0_29, %c0_30, %c0_31] : memref<3x3x64xf32, #tpu.memory_space<vmem>>, vector<3x3x64xf32>
    %cst_32 = arith.constant 0.000000e+00 : f32
    %53 = vector.broadcast %cst_32 : f32 to vector<16x16x64xf32>
    %54 = vector.extract_strided_slice %51 {offsets = [0, 0, 0], sizes = [16, 16, 64], strides = [1, 1, 1]} : vector<18x18x64xf32> to vector<16x16x64xf32>
    %55 = vector.extract_strided_slice %52 {offsets = [0, 0, 0], sizes = [1, 1, 64], strides = [1, 1, 1]} : vector<3x3x64xf32> to vector<1x1x64xf32>
    %56 = vector.shape_cast %55 : vector<1x1x64xf32> to vector<64xf32>
    %57 = vector.shape_cast %56 : vector<64xf32> to vector<1x1x64xf32>
    %58 = vector.broadcast %57 : vector<1x1x64xf32> to vector<16x16x64xf32>
    %59 = arith.mulf %54, %58 : vector<16x16x64xf32>
    %60 = arith.addf %53, %59 : vector<16x16x64xf32>
    %61 = vector.extract_strided_slice %51 {offsets = [0, 1, 0], sizes = [16, 16, 64], strides = [1, 1, 1]} : vector<18x18x64xf32> to vector<16x16x64xf32>
    %62 = vector.extract_strided_slice %52 {offsets = [0, 1, 0], sizes = [1, 1, 64], strides = [1, 1, 1]} : vector<3x3x64xf32> to vector<1x1x64xf32>
    %63 = vector.shape_cast %62 : vector<1x1x64xf32> to vector<64xf32>
    %64 = vector.shape_cast %63 : vector<64xf32> to vector<1x1x64xf32>
    %65 = vector.broadcast %64 : vector<1x1x64xf32> to vector<16x16x64xf32>
    %66 = arith.mulf %61, %65 : vector<16x16x64xf32>
    %67 = arith.addf %60, %66 : vector<16x16x64xf32>
    %68 = vector.extract_strided_slice %51 {offsets = [0, 2, 0], sizes = [16, 16, 64], strides = [1, 1, 1]} : vector<18x18x64xf32> to vector<16x16x64xf32>
    %69 = vector.extract_strided_slice %52 {offsets = [0, 2, 0], sizes = [1, 1, 64], strides = [1, 1, 1]} : vector<3x3x64xf32> to vector<1x1x64xf32>
    %70 = vector.shape_cast %69 : vector<1x1x64xf32> to vector<64xf32>
    %71 = vector.shape_cast %70 : vector<64xf32> to vector<1x1x64xf32>
    %72 = vector.broadcast %71 : vector<1x1x64xf32> to vector<16x16x64xf32>
    %73 = arith.mulf %68, %72 : vector<16x16x64xf32>
    %74 = arith.addf %67, %73 : vector<16x16x64xf32>
    %75 = vector.extract_strided_slice %51 {offsets = [1, 0, 0], sizes = [16, 16, 64], strides = [1, 1, 1]} : vector<18x18x64xf32> to vector<16x16x64xf32>
    %76 = vector.extract_strided_slice %52 {offsets = [1, 0, 0], sizes = [1, 1, 64], strides = [1, 1, 1]} : vector<3x3x64xf32> to vector<1x1x64xf32>
    %77 = vector.shape_cast %76 : vector<1x1x64xf32> to vector<64xf32>
    %78 = vector.shape_cast %77 : vector<64xf32> to vector<1x1x64xf32>
    %79 = vector.broadcast %78 : vector<1x1x64xf32> to vector<16x16x64xf32>
    %80 = arith.mulf %75, %79 : vector<16x16x64xf32>
    %81 = arith.addf %74, %80 : vector<16x16x64xf32>
    %82 = vector.extract_strided_slice %51 {offsets = [1, 1, 0], sizes = [16, 16, 64], strides = [1, 1, 1]} : vector<18x18x64xf32> to vector<16x16x64xf32>
    %83 = vector.extract_strided_slice %52 {offsets = [1, 1, 0], sizes = [1, 1, 64], strides = [1, 1, 1]} : vector<3x3x64xf32> to vector<1x1x64xf32>
    %84 = vector.shape_cast %83 : vector<1x1x64xf32> to vector<64xf32>
    %85 = vector.shape_cast %84 : vector<64xf32> to vector<1x1x64xf32>
    %86 = vector.broadcast %85 : vector<1x1x64xf32> to vector<16x16x64xf32>
    %87 = arith.mulf %82, %86 : vector<16x16x64xf32>
    %88 = arith.addf %81, %87 : vector<16x16x64xf32>
    %89 = vector.extract_strided_slice %51 {offsets = [1, 2, 0], sizes = [16, 16, 64], strides = [1, 1, 1]} : vector<18x18x64xf32> to vector<16x16x64xf32>
    %90 = vector.extract_strided_slice %52 {offsets = [1, 2, 0], sizes = [1, 1, 64], strides = [1, 1, 1]} : vector<3x3x64xf32> to vector<1x1x64xf32>
    %91 = vector.shape_cast %90 : vector<1x1x64xf32> to vector<64xf32>
    %92 = vector.shape_cast %91 : vector<64xf32> to vector<1x1x64xf32>
    %93 = vector.broadcast %92 : vector<1x1x64xf32> to vector<16x16x64xf32>
    %94 = arith.mulf %89, %93 : vector<16x16x64xf32>
    %95 = arith.addf %88, %94 : vector<16x16x64xf32>
    %96 = vector.extract_strided_slice %51 {offsets = [2, 0, 0], sizes = [16, 16, 64], strides = [1, 1, 1]} : vector<18x18x64xf32> to vector<16x16x64xf32>
    %97 = vector.extract_strided_slice %52 {offsets = [2, 0, 0], sizes = [1, 1, 64], strides = [1, 1, 1]} : vector<3x3x64xf32> to vector<1x1x64xf32>
    %98 = vector.shape_cast %97 : vector<1x1x64xf32> to vector<64xf32>
    %99 = vector.shape_cast %98 : vector<64xf32> to vector<1x1x64xf32>
    %100 = vector.broadcast %99 : vector<1x1x64xf32> to vector<16x16x64xf32>
    %101 = arith.mulf %96, %100 : vector<16x16x64xf32>
    %102 = arith.addf %95, %101 : vector<16x16x64xf32>
    %103 = vector.extract_strided_slice %51 {offsets = [2, 1, 0], sizes = [16, 16, 64], strides = [1, 1, 1]} : vector<18x18x64xf32> to vector<16x16x64xf32>
    %104 = vector.extract_strided_slice %52 {offsets = [2, 1, 0], sizes = [1, 1, 64], strides = [1, 1, 1]} : vector<3x3x64xf32> to vector<1x1x64xf32>
    %105 = vector.shape_cast %104 : vector<1x1x64xf32> to vector<64xf32>
    %106 = vector.shape_cast %105 : vector<64xf32> to vector<1x1x64xf32>
    %107 = vector.broadcast %106 : vector<1x1x64xf32> to vector<16x16x64xf32>
    %108 = arith.mulf %103, %107 : vector<16x16x64xf32>
    %109 = arith.addf %102, %108 : vector<16x16x64xf32>
    %110 = vector.extract_strided_slice %51 {offsets = [2, 2, 0], sizes = [16, 16, 64], strides = [1, 1, 1]} : vector<18x18x64xf32> to vector<16x16x64xf32>
    %111 = vector.extract_strided_slice %52 {offsets = [2, 2, 0], sizes = [1, 1, 64], strides = [1, 1, 1]} : vector<3x3x64xf32> to vector<1x1x64xf32>
    %112 = vector.shape_cast %111 : vector<1x1x64xf32> to vector<64xf32>
    %113 = vector.shape_cast %112 : vector<64xf32> to vector<1x1x64xf32>
    %114 = vector.broadcast %113 : vector<1x1x64xf32> to vector<16x16x64xf32>
    %115 = arith.mulf %110, %114 : vector<16x16x64xf32>
    %116 = arith.addf %109, %115 : vector<16x16x64xf32>
    %cst_33 = arith.constant 5.000000e-01 : f32
    %117 = vector.broadcast %cst_33 : f32 to vector<16x16x64xf32>
    %118 = arith.mulf %117, %116 : vector<16x16x64xf32>
    %cst_34 = arith.constant 0.707106769 : f32
    %119 = vector.broadcast %cst_34 : f32 to vector<16x16x64xf32>
    %120 = arith.mulf %116, %119 : vector<16x16x64xf32>
    %121 = math.absf %120 : vector<16x16x64xf32>
    %cst_35 = arith.constant 0.327591091 : f32
    %122 = vector.broadcast %cst_35 : f32 to vector<16x16x64xf32>
    %123 = arith.mulf %122, %121 : vector<16x16x64xf32>
    %cst_36 = arith.constant 1.000000e+00 : f32
    %124 = vector.broadcast %cst_36 : f32 to vector<16x16x64xf32>
    %125 = arith.addf %124, %123 : vector<16x16x64xf32>
    %cst_37 = arith.constant 1.000000e+00 : f32
    %126 = vector.broadcast %cst_37 : f32 to vector<16x16x64xf32>
    %127 = arith.divf %126, %125 : vector<16x16x64xf32>
    %cst_38 = arith.constant 1.06140542 : f32
    %128 = vector.broadcast %cst_38 : f32 to vector<16x16x64xf32>
    %129 = arith.mulf %128, %127 : vector<16x16x64xf32>
    %cst_39 = arith.constant -1.45315206 : f32
    %130 = vector.broadcast %cst_39 : f32 to vector<16x16x64xf32>
    %131 = arith.addf %129, %130 : vector<16x16x64xf32>
    %132 = arith.mulf %131, %127 : vector<16x16x64xf32>
    %cst_40 = arith.constant 1.42141378 : f32
    %133 = vector.broadcast %cst_40 : f32 to vector<16x16x64xf32>
    %134 = arith.addf %132, %133 : vector<16x16x64xf32>
    %135 = arith.mulf %134, %127 : vector<16x16x64xf32>
    %cst_41 = arith.constant -0.284496725 : f32
    %136 = vector.broadcast %cst_41 : f32 to vector<16x16x64xf32>
    %137 = arith.addf %135, %136 : vector<16x16x64xf32>
    %138 = arith.mulf %137, %127 : vector<16x16x64xf32>
    %cst_42 = arith.constant 0.254829586 : f32
    %139 = vector.broadcast %cst_42 : f32 to vector<16x16x64xf32>
    %140 = arith.addf %138, %139 : vector<16x16x64xf32>
    %141 = arith.mulf %140, %127 : vector<16x16x64xf32>
    %cst_43 = arith.constant 0.000000e+00 : f32
    %142 = vector.broadcast %cst_43 : f32 to vector<16x16x64xf32>
    %143 = arith.subf %142, %121 : vector<16x16x64xf32>
    %144 = arith.mulf %143, %121 : vector<16x16x64xf32>
    %145 = math.exp %144 : vector<16x16x64xf32>
    %146 = arith.mulf %141, %145 : vector<16x16x64xf32>
    %cst_44 = arith.constant 1.000000e+00 : f32
    %147 = vector.broadcast %cst_44 : f32 to vector<16x16x64xf32>
    %148 = arith.subf %147, %146 : vector<16x16x64xf32>
    %cst_45 = arith.constant 0.000000e+00 : f32
    %149 = vector.broadcast %cst_45 : f32 to vector<16x16x64xf32>
    %150 = arith.cmpf olt, %120, %149 : vector<16x16x64xf32>
    %cst_46 = arith.constant 0.000000e+00 : f32
    %151 = vector.broadcast %cst_46 : f32 to vector<16x16x64xf32>
    %152 = arith.subf %151, %148 : vector<16x16x64xf32>
    %153 = arith.select %150, %152, %148 : vector<16x16x64xi1>, vector<16x16x64xf32>
    %cst_47 = arith.constant 1.000000e+00 : f32
    %154 = vector.broadcast %cst_47 : f32 to vector<16x16x64xf32>
    %155 = arith.addf %154, %153 : vector<16x16x64xf32>
    %156 = arith.mulf %118, %155 : vector<16x16x64xf32>
    %157 = vector.shape_cast %156 : vector<16x16x64xf32> to vector<256x64xf32>
    %158 = arith.truncf %157 : vector<256x64xf32> to vector<256x64xbf16>
    %c0_48 = arith.constant 0 : index
    %c0_49 = arith.constant 0 : index
    %159 = vector.load %arg4[%c0_48, %c0_49] : memref<64x16xf32, #tpu.memory_space<vmem>>, vector<64x16xf32>
    %160 = arith.truncf %159 : vector<64x16xf32> to vector<64x16xbf16>
    %cst_50 = arith.constant dense<0.000000e+00> : vector<256x16xf32>
    %161 = tpu.matmul %158, %160, %cst_50 {dimension_numbers = #tpu.dot_dimension_numbers<[1], [0], [0], [1], [0, 0, 1, 1], [], []>} : vector<256x64xbf16>, vector<64x16xbf16>, vector<256x16xf32> -> vector<256x16xf32>
    %162 = vector.shape_cast %161 : vector<256x16xf32> to vector<16x16x16xf32>
    %c0_51 = arith.constant 0 : index
    %c0_52 = arith.constant 0 : index
    %c0_53 = arith.constant 0 : index
    %c0_54 = arith.constant 0 : index
    %163 = vector.load %arg5[%c0_51, %c0_52, %c0_53, %c0_54] : memref<1x16x16x16xf32, #tpu.memory_space<vmem>>, vector<1x16x16x16xf32>
    %164 = vector.shape_cast %163 : vector<1x16x16x16xf32> to vector<16x16x16xf32>
    %165 = vector.shape_cast %162 : vector<16x16x16xf32> to vector<1x16x16x16xf32>
    tpu.vector_store %arg5[%c0_51, %c0_52, %c0_53, %c0_54], %165 {strides = array<i32>} : memref<1x16x16x16xf32, #tpu.memory_space<vmem>>, vector<1x16x16x16xf32>,
    return
  }
  func.func @transform_0(%arg0: i32) -> (i32, i32, i32, i32) {
    %c0_i32 = arith.constant 0 : i32
    %c0_i32_0 = arith.constant 0 : i32
    %c0_i32_1 = arith.constant 0 : i32
    %c0_i32_2 = arith.constant 0 : i32
    return %arg0, %c0_i32, %c0_i32_0, %c0_i32_1 : i32, i32, i32, i32
  }
  func.func @transform_1(%arg0: i32) -> (i32, i32) {
    %c0_i32 = arith.constant 0 : i32
    %c0_i32_0 = arith.constant 0 : i32
    %c0_i32_1 = arith.constant 0 : i32
    return %c0_i32, %c0_i32_0 : i32, i32
  }
  func.func @transform_2(%arg0: i32) -> (i32, i32, i32) {
    %c0_i32 = arith.constant 0 : i32
    %c0_i32_0 = arith.constant 0 : i32
    %c0_i32_1 = arith.constant 0 : i32
    %c0_i32_2 = arith.constant 0 : i32
    return %c0_i32, %c0_i32_0, %c0_i32_1 : i32, i32, i32
  }
  func.func @transform_3(%arg0: i32) -> (i32, i32) {
    %c0_i32 = arith.constant 0 : i32
    %c0_i32_0 = arith.constant 0 : i32
    %c0_i32_1 = arith.constant 0 : i32
    return %c0_i32, %c0_i32_0 : i32, i32
  }
  func.func @transform_4(%arg0: i32) -> (i32, i32, i32, i32) {
    %c0_i32 = arith.constant 0 : i32
    %c0_i32_0 = arith.constant 0 : i32
    %c0_i32_1 = arith.constant 0 : i32
    %c0_i32_2 = arith.constant 0 : i32
    return %arg0, %c0_i32, %c0_i32_0, %c0_i32_1 : i32, i32, i32, i32
  }
}

</mosaic_0001>

<bundles_post_ra>
// kernel: tpu_custom_call.1
= control target key start
LH: loop header
LB: loop body
LE: loop exit
PB: predicated region body
PF: predicated region fallthrough
CT: control target
= control target key end

     0   :  { %9 = vsyncpa [#allocation4], 0  ;;  %s7775_s0 = inlined_call_operand.hbm [shape: f32[2,16,16,16], index: 0, kind: input, shape index: {}]   ;;  %s7776_s1 = inlined_call_operand.vmem [shape: f32[16,64], index: 1, kind: input, shape index: {}]   ;;  %s7777_s2 = inlined_call_operand.vmem [shape: f32[3,3,64], index: 2, kind: input, shape index: {}]   ;;  %s7778_s3 = inlined_call_operand.vmem [shape: f32[64,16], index: 3, kind: input, shape index: {}]   ;;  %s7779_s4 = inlined_call_operand.hbm [shape: f32[2,16,16,16], index: 4, kind: output, shape index: {}]  }
   0x1   :  { %11 = vsyncpa [#allocation4 + $0x1], 0 }
   0x2   :  { %12 = vsyncpa [#allocation5], 0 }
   0x3   :  { %14 = vsyncpa [#allocation5 + $0x1], 0  ;;  %s4970_s15 = smov 0   ;;  %s4972_s16 = smov 0  }
   0x4   :  { %s4974_s17 = smov 0   ;;  %s4976_s18 = smov 0  }
   0x5 LB: > { %s4991_s19 = sadd.s32 4294967295, %s4936_s18   ;;  %s4378_s20 = sadd.s32 4294967294, %s4936_s18   ;;  %s4936_s18 = sphi %s4976_s18, %s7794_s18   ;;  %s4932_s17 = sphi %s4974_s17, %s7793_s17   ;;  %s4928_s16 = sphi %s4972_s16, %s7792_s16   ;;  %s4924_s15 = sphi %s4970_s15, %s7791_s15  }
   0x6   : > { %s4995_s21 = sadd.s32 1, %s4936_s18   ;;  %s27_s22 = sadd.s32 1, %s4932_s17 }
   0x7   : > { %s24_s23 = ssub.s32 %s4936_s18, %s4995_s21  ;;  %p34_p0 = scmp.ne.s32.totalorder %s4932_s17, %s4928_s16 }
   0x8   : > { %p25_p1 = scmp.eq.s32.totalorder %s24_s23, 0  ;;  %p35_p2 = scmp.eq.s32.totalorder %s4936_s18, 0 }
   0x9   : > { %p40_p3 = scmp.ne.s32.totalorder %s4928_s16, %s4924_s15  ;;  %p41_p4 = scmp.eq.s32.totalorder %s4991_s19, 0 }
   0xa   : > { %s5007_s24 = scalar_select %p25_p1, %s4932_s17, %s27_s22  }
   0xb   : > { %p5009_p5 = por %p35_p2, %p34_p0  ;;  %p5013_p6 = por %p41_p4, %p40_p3 }
   0xc   : > { %p127_p7 = scmp.eq.s32.totalorder %s4991_s19, 1  ;;  %p133_p8 = scmp.eq.s32.totalorder %s4378_s20, 1 }
   0xd   : > { %s7783_s26 = scalar_select %p5013_p6, 1, 0 }
   0xe   : > { %p4549_p10 = scmp.lt.s32.totalorder %s4936_s18, 2  ;;  %p5020_p11 = por %p127_p7, %p34_p0 }
   0xf   : > { %p5024_p12 = por %p133_p8, %p40_p3  ;;  %s162_s29 = sand.u32 1, %s4932_s17  }
  0x10   : > { %s7784_s27 = scalar_select %p5020_p11, 1, 0 }
  0x11   : > { %s7785_s28 = scalar_select %p5024_p12, 1, 0 }
  0x12   : > { %s4424_s30 = sshll.u32 %s4936_s18, 12  ;;  %s4381_s5 = sshll.u32 %s162_s29, 8 }
  0x13   : > { %s5033_s8 = scalar_lea.hbm %s7775_s0, %s4424_s30  ;;  %s166_s9 = scalar_lea.vmem [#allocation3], %s4381_s5 }
  0x14   : > { %s173_s10 = sshll.u32 %s166_s9, 4  ;;  %p5037_p13 = pnand %p4549_p10, %p5009_p5  ;;  %s5041_s10 = int_to_ptr.vmem [resolvable:$true] %s173_s10 }
  0x15   : > { %s5043_s12 = scalar_lea.sflag [#allocation4], %s162_s29  ;;  %s4844_s13 = scalar_lea.hbm %s5033_s8, 4096 }
  0x16   : > { %p4845_p0 = scmp.ne.s32.totalorder %s5033_s8, %s4844_s13  ;;  %p4846_p1 = pneg %p5037_p13 }
  0x17   : > { %s4849_s22 = scalar_lea.hbm %s7775_s0, 8192  ;;  %p4850_p4 = scmp.lt.s32.totalorder %s5033_s8, %s7775_s0 }
  0x18   : > { %p4847_p2 = pnand %p4846_p1, %p4845_p0  ;;  %p4851_p5 = scmp.lt.s32.totalorder %s4849_s22, %s4844_s13 }
  0x1a   : > { %p4848_p3 = pneg %p4847_p2  ;;  %p4852_p7 = por %p4851_p5, %p4850_p4 }
  0x1c   : > { %p4853_p8 = pnand %p4852_p7, %p4848_p3 }
  0x1e   : > { %4856 = shalt.err (!%p4853_p8)
}
  0x1f   : > { %s4857_s29 = scalar_lea.vmem %s5041_s10, 4096  ;;  %s4938_s30 = smov [#allocation3]  }
  0x20   : > { %p4858_p10 = scmp.ne.s32.totalorder %s5041_s10, %s4857_s29  ;;  %s4862_s5 = sshll.u32 %s4938_s30, 4  ;;  %s4863_s5 = int_to_ptr.vmem [resolvable:$false] %s4862_s5 }
  0x21   : > { %s4864_s6 = scalar_lea.vmem %s4863_s5, 8192  ;;  %p4865_p2 = scmp.lt.s32.totalorder %s5041_s10, %s4863_s5 }
  0x22   : > { %p4860_p9 = pnand %p4858_p10, %p4846_p1  ;;  %p4866_p12 = scmp.lt.s32.totalorder %s4864_s6, %s4857_s29 }
  0x24   : > { %p4861_p0 = pneg %p4860_p9  ;;  %p4867_p11 = por %p4866_p12, %p4865_p2 }
  0x26   : > { %p4868_p6 = pnand %p4867_p11, %p4861_p0 }
  0x28   : > { %4871 = shalt.err (!%p4868_p6)
}
  0x29   : > { %s4939_s7 = smov 128   ;;  %s4940_s9 = smov 8  }
  0x2a   : > { %4544 = dma.hbm_to_vmem [thread:$0]  (!%p5037_p13), %s5033_s8, 4096, %s5041_s10, %s5043_s12, %s4939_s7, %s4939_s7, %s4940_s9  }
  0x2b   : > { %p4384_p9 = scmp.ge.s32.totalorder %s4936_s18, 1  ;;  %p181_p1 = scmp.lt.s32.totalorder %s4936_s18, 3 }
  0x2d   : > { %p182_p3 = pnand %p4384_p9, %p181_p1 }
  0x2e   : > { %s5067_s13 = sand.u32 (!%p182_p3), 1, %s4928_s16   ;;  %p7787_p6 = scmp.ne.s32.totalorder (!%p182_p3), %s7783_s26, 0 }
  0x2f   : > { %185 = sbr.rel (%p182_p3) target bundleno = 1210 (0x4ba), region = 36  ;;  %s4385_s14 = sshll.u32 (!%p182_p3), %s5067_s13, 8 }
  0x30   : > { %s188_s20 = scalar_lea.sflag (!%p182_p3), [#allocation4], %s5067_s13  ;;  %s5073_s22 = scalar_lea.vmem (!%p182_p3), [#allocation3], %s4385_s14 }
  0x34   : > { %4915 = dma.done.wait (%p7787_p6), %s188_s20, 4096  }
  0x35   : > { %4917 = vsyncadd (%p7787_p6), %s188_s20, 4294963200  ;;  %v265_v0 = vld [vmem:[%s7776_s1] sm:$0xff]  ;;  %v266_v1 = vld [vmem:[%s7776_s1 + $0x8] sm:$0xff]  ;;  %vm268_vm0 = vcmask 130048   ;;  %vm1342_vm1 = vcmask 523264   ;;  %v4941_v51 = vmov 0.0  }
  0x36   : > { %v217_v2 = vld [vmem:[%s5073_s22] sm:$0xff]  ;;  %v267_v3 = vpack.c.bf16 %v266_v1, %v265_v0  ;;  %v218_v4 = vld [vmem:[%s5073_s22 + $0x8] sm:$0xff]  ;;  %v219_v5 = vld [vmem:[%s5073_s22 + $0x10] sm:$0xff]  ;;  %1350 = vst.msk [vmem:[#allocation2 + $0x30] sm:$0xff] %vm1342_vm1, %v4941_v51  ;;  %vm1345_vm2 = vcmask 517120   ;;  %s7405_s7 = scalar_lea.vmem [#allocation6], %s4385_s14 }
  0x37   : > { %v220_v6 = vld [vmem:[%s5073_s22 + $0x18] sm:$0xff]  ;;  %v249_v7 = vpack.c.bf16 %v218_v4, %v217_v2  ;;  %v221_v8 = vld [vmem:[%s5073_s22 + $0x20] sm:$0xff]  ;;  %v222_v9 = vld [vmem:[%s5073_s22 + $0x28] sm:$0xff]  ;;  %1351 = vst.msk [vmem:[#allocation2 + $0x38] sm:$0xff] %vm1342_vm1, %v4941_v51  ;;  %s4425_s14 = sshll.u32 %s4991_s19, 12  ;;  %s4305_s9 = sshll.u32 %s7405_s7, 4  ;;  %s7728_s9 = int_to_ptr.vmem [resolvable:$true] %s4305_s9 }
  0x38   : > { %4463 = vmatprep.subr.bf16.mxu0 %v267_v3  ;;  %v250_v10 = vpack.c.bf16 %v220_v6, %v219_v5  ;;  %v251_v11 = vpack.c.bf16 %v222_v9, %v221_v8  ;;  %v223_v12 = vld [vmem:[%s5073_s22 + $0x30] sm:$0xff]  ;;  %v224_v13 = vld [vmem:[%s5073_s22 + $0x38] sm:$0xff]  ;;  %v225_v14 = vld [vmem:[%s5073_s22 + $0x40] sm:$0xff]  ;;  %1343 = vst.msk [vmem:[#allocation2] sm:$0xff] %vm1342_vm1, %v4941_v51  ;;  %s7726_s8 = scalar_lea.hbm %s7779_s4, %s4425_s14  ;;  %s4292_s19 = scalar_lea.sflag [#allocation5], %s5067_s13 }
  0x39   : > { %4464 = vmatpush3.bf16.msra.mxu0 %v267_v3  ;;  %4465 = vmatprep.mubr.msk.bf16.mxu0 %vm268_vm0, %v249_v7  ;;  %v226_v15 = vld [vmem:[%s5073_s22 + $0x48] sm:$0xff]  ;;  %v252_v16 = vpack.c.bf16 %v224_v13, %v223_v12  ;;  %v227_v18 = vld [vmem:[%s5073_s22 + $0x50] sm:$0xff]  ;;  %v228_v19 = vld [vmem:[%s5073_s22 + $0x58] sm:$0xff]  ;;  %1344 = vst.msk [vmem:[#allocation2 + $0x8] sm:$0xff] %vm1342_vm1, %v4941_v51  ;;  %s4872_s10 = scalar_lea.vmem %s7728_s9, 4096  ;;  %p7788_p12 = scmp.ne.s32.totalorder %s7784_s27, 0 }
  0x3a   : > { %v253_v17 = vpack.c.bf16 %v226_v15, %v225_v14  ;;  %v229_v20 = vld [vmem:[%s5073_s22 + $0x60] sm:$0xff]  ;;  %v230_v21 = vld [vmem:[%s5073_s22 + $0x68] sm:$0xff]  ;;  %v254_v22 = vpack.c.bf16 %v228_v19, %v227_v18  ;;  %v231_v24 = vld [vmem:[%s5073_s22 + $0x70] sm:$0xff]  ;;  %1347 = vst.msk [vmem:[#allocation2 + $0x18] sm:$0xff] %vm1342_vm1, %v4941_v51  ;;  %p4873_p11 = scmp.ne.s32.totalorder %s7728_s9, %s4872_s10  ;;  %s4942_s11 = smov [#allocation6]  }
  0x3b   : > { %v255_v23 = vpack.c.bf16 %v230_v21, %v229_v20  ;;  %v232_v25 = vld [vmem:[%s5073_s22 + $0x78] sm:$0xff]  ;;  %v233_v26 = vld [vmem:[%s5073_s22 + $0x80] sm:$0xff]  ;;  %v234_v27 = vld [vmem:[%s5073_s22 + $0x88] sm:$0xff]  ;;  %1348 = vst.msk [vmem:[#allocation2 + $0x20] sm:$0xff] %vm1342_vm1, %v4941_v51  ;;  %s4876_s12 = sshll.u32 %s4942_s11, 4  ;;  %s4877_s12 = int_to_ptr.vmem [resolvable:$false] %s4876_s12 }
  0x3c   : > { %4466 = vmatmul.mubr.msk.bf16.vlgmr.msra.gmra.mxu0 %vm268_vm0, %v250_v10  ;;  %v256_v28 = vpack.c.bf16 %v232_v25, %v231_v24  ;;  %v257_v29 = vpack.c.bf16 %v234_v27, %v233_v26  ;;  %v235_v30 = vld [vmem:[%s5073_s22 + $0x90] sm:$0xff]  ;;  %v236_v31 = vld [vmem:[%s5073_s22 + $0x98] sm:$0xff]  ;;  %v237_v32 = vld [vmem:[%s5073_s22 + $0xa0] sm:$0xff]  ;;  %1353 = vst.msk [vmem:[#allocation2 + $0x48] sm:$0xff] %vm1342_vm1, %v4941_v51  ;;  %p4874_p13 = pnand %p4873_p11, %p7788_p12  ;;  %s4878_s26 = scalar_lea.vmem %s4877_s12, 8192 }
  0x3d   : > { %4469 = vmatprep.mubr.msk.bf16.mxu0 %vm268_vm0, %v251_v11  ;;  %v238_v33 = vld [vmem:[%s5073_s22 + $0xa8] sm:$0xff]  ;;  %v258_v34 = vpack.c.bf16 %v236_v31, %v235_v30  ;;  %v239_v36 = vld [vmem:[%s5073_s22 + $0xb0] sm:$0xff]  ;;  %v240_v37 = vld [vmem:[%s5073_s22 + $0xb8] sm:$0xff]  ;;  %1354 = vst.msk [vmem:[#allocation2 + $0x50] sm:$0xff] %vm1342_vm1, %v4941_v51  ;;  %p4879_p5 = scmp.lt.s32.totalorder %s7728_s9, %s4877_s12  ;;  %p4880_p7 = scmp.lt.s32.totalorder %s4878_s26, %s4872_s10 }
  0x3e   : > { %v259_v35 = vpack.c.bf16 %v238_v33, %v237_v32  ;;  %v241_v38 = vld [vmem:[%s5073_s22 + $0xc0] sm:$0xff]  ;;  %v242_v39 = vld [vmem:[%s5073_s22 + $0xc8] sm:$0xff]  ;;  %v260_v40 = vpack.c.bf16 %v240_v37, %v239_v36  ;;  %v243_v42 = vld [vmem:[%s5073_s22 + $0xd0] sm:$0xff]  ;;  %1356 = vst.msk [vmem:[#allocation2 + $0x60] sm:$0xff] %vm1342_vm1, %v4941_v51  ;;  %p4875_p4 = pneg %p4874_p13 }
  0x3f   : > { %v261_v41 = vpack.c.bf16 %v242_v39, %v241_v38  ;;  %v244_v43 = vld [vmem:[%s5073_s22 + $0xd8] sm:$0xff]  ;;  %v245_v44 = vld [vmem:[%s5073_s22 + $0xe0] sm:$0xff]  ;;  %v246_v45 = vld [vmem:[%s5073_s22 + $0xe8] sm:$0xff]  ;;  %1357 = vst.msk [vmem:[#allocation2 + $0x68] sm:$0xff] %vm1342_vm1, %v4941_v51  ;;  %p4881_p8 = por %p4880_p7, %p4879_p5 }
  0x40   : > { %v262_v46 = vpack.c.bf16 %v244_v43, %v243_v42  ;;  %v263_v47 = vpack.c.bf16 %v246_v45, %v245_v44  ;;  %v247_v48 = vld [vmem:[%s5073_s22 + $0xf0] sm:$0xff]  ;;  %v248_v49 = vld [vmem:[%s5073_s22 + $0xf8] sm:$0xff]  ;;  %1359 = vst.msk [vmem:[#allocation2 + $0x78] sm:$0xff] %vm1342_vm1, %v4941_v51  ;;  %1360 = vst.msk [vmem:[#allocation2 + $0x80] sm:$0xff] %vm1342_vm1, %v4941_v51 }
  0x41   : > { %v264_v50 = vpack.c.bf16 %v248_v49, %v247_v48  ;;  %1362 = vst.msk [vmem:[#allocation2 + $0x90] sm:$0xff] %vm1342_vm1, %v4941_v51  ;;  %1363 = vst.msk [vmem:[#allocation2 + $0x98] sm:$0xff] %vm1342_vm1, %v4941_v51  ;;  %p4882_p10 = pnand %p4881_p8, %p4875_p4 }
  0x42   : > { %1365 = vst.msk [vmem:[#allocation2 + $0xa8] sm:$0xff] %vm1342_vm1, %v4941_v51  ;;  %1366 = vst.msk [vmem:[#allocation2 + $0xb0] sm:$0xff] %vm1342_vm1, %v4941_v51 }
  0x43   : > { %1368 = vst.msk [vmem:[#allocation2 + $0xc0] sm:$0xff] %vm1342_vm1, %v4941_v51  ;;  %1369 = vst.msk [vmem:[#allocation2 + $0xc8] sm:$0xff] %vm1342_vm1, %v4941_v51 }
  0x44   : > { %4470 = vmatmul.mubr.msk.bf16.gmra.mxu0 %vm268_vm0, %v252_v16  ;;  %1371 = vst.msk [vmem:[#allocation2 + $0xd8] sm:$0xff] %vm1342_vm1, %v4941_v51  ;;  %1372 = vst.msk [vmem:[#allocation2 + $0xe0] sm:$0xff] %vm1342_vm1, %v4941_v51 }
  0x45   : > { %4473 = vmatprep.mubr.msk.bf16.mxu0 %vm268_vm0, %v253_v17  ;;  %1374 = vst.msk [vmem:[#allocation2 + $0xf0] sm:$0xff] %vm1342_vm1, %v4941_v51  ;;  %1375 = vst.msk [vmem:[#allocation2 + $0xf8] sm:$0xff] %vm1342_vm1, %v4941_v51 }
  0x46   : > { %1377 = vst.msk [vmem:[#allocation2 + $0x108] sm:$0xff] %vm1342_vm1, %v4941_v51  ;;  %1378 = vst.msk [vmem:[#allocation2 + $0x110] sm:$0xff] %vm1342_vm1, %v4941_v51 }
  0x47   : > { %1380 = vst.msk [vmem:[#allocation2 + $0x120] sm:$0xff] %vm1342_vm1, %v4941_v51  ;;  %1381 = vst.msk [vmem:[#allocation2 + $0x128] sm:$0xff] %vm1342_vm1, %v4941_v51 }
  0x48   : > { %1383 = vst.msk [vmem:[#allocation2 + $0x138] sm:$0xff] %vm1342_vm1, %v4941_v51  ;;  %1384 = vst.msk [vmem:[#allocation2 + $0x140] sm:$0xff] %vm1342_vm1, %v4941_v51 }
  0x49   : > { %1386 = vst.msk [vmem:[#allocation2 + $0x150] sm:$0xff] %vm1342_vm1, %v4941_v51  ;;  %1387 = vst.msk [vmem:[#allocation2 + $0x158] sm:$0xff] %vm1342_vm1, %v4941_v51 }
  0x4a   : > { %1389 = vst.msk [vmem:[#allocation2 + $0x168] sm:$0xff] %vm1342_vm1, %v4941_v51  ;;  %1390 = vst.msk [vmem:[#allocation2 + $0x170] sm:$0xff] %vm1342_vm1, %v4941_v51 }
  0x4b   : > { %1392 = vst.msk [vmem:[#allocation2 + $0x180] sm:$0xff] %vm1342_vm1, %v4941_v51  ;;  %1393 = vst.msk [vmem:[#allocation2 + $0x188] sm:$0xff] %vm1342_vm1, %v4941_v51 }
  0x4c   : > { %4474 = vmatmul.mubr.msk.bf16.gmra.mxu0 %vm268_vm0, %v254_v22  ;;  %1395 = vst.msk [vmem:[#allocation2 + $0x198] sm:$0xff] %vm1342_vm1, %v4941_v51  ;;  %1396 = vst.msk [vmem:[#allocation2 + $0x1a0] sm:$0xff] %vm1342_vm1, %v4941_v51 }
  0x4d   : > { %4477 = vmatprep.mubr.msk.bf16.mxu0 %vm268_vm0, %v255_v23  ;;  %1352 = vst.msk [vmem:[#allocation2 + $0x40] sm:$0x3] %vm1345_vm2, %v4941_v51  ;;  %1346 = vst.msk [vmem:[#allocation2 + $0x10] sm:$0x3] %vm1345_vm2, %v4941_v51 }
  0x4e   : > { %1349 = vst.msk [vmem:[#allocation2 + $0x28] sm:$0x3] %vm1345_vm2, %v4941_v51  ;;  %1355 = vst.msk [vmem:[#allocation2 + $0x58] sm:$0x3] %vm1345_vm2, %v4941_v51 }
  0x4f   : > { %1358 = vst.msk [vmem:[#allocation2 + $0x70] sm:$0x3] %vm1345_vm2, %v4941_v51  ;;  %1361 = vst.msk [vmem:[#allocation2 + $0x88] sm:$0x3] %vm1345_vm2, %v4941_v51 }
  0x50   : > { %1364 = vst.msk [vmem:[#allocation2 + $0xa0] sm:$0x3] %vm1345_vm2, %v4941_v51  ;;  %1367 = vst.msk [vmem:[#allocation2 + $0xb8] sm:$0x3] %vm1345_vm2, %v4941_v51 }
  0x51   : > { %1370 = vst.msk [vmem:[#allocation2 + $0xd0] sm:$0x3] %vm1345_vm2, %v4941_v51  ;;  %1373 = vst.msk [vmem:[#allocation2 + $0xe8] sm:$0x3] %vm1345_vm2, %v4941_v51 }
  0x52   : > { %1376 = vst.msk [vmem:[#allocation2 + $0x100] sm:$0x3] %vm1345_vm2, %v4941_v51  ;;  %1379 = vst.msk [vmem:[#allocation2 + $0x118] sm:$0x3] %vm1345_vm2, %v4941_v51 }
  0x53   : > { %1382 = vst.msk [vmem:[#allocation2 + $0x130] sm:$0x3] %vm1345_vm2, %v4941_v51  ;;  %1385 = vst.msk [vmem:[#allocation2 + $0x148] sm:$0x3] %vm1345_vm2, %v4941_v51 }
  0x54   : > { %4478 = vmatmul.mubr.msk.bf16.gmra.mxu0 %vm268_vm0, %v256_v28  ;;  %1388 = vst.msk [vmem:[#allocation2 + $0x160] sm:$0x3] %vm1345_vm2, %v4941_v51  ;;  %1391 = vst.msk [vmem:[#allocation2 + $0x178] sm:$0x3] %vm1345_vm2, %v4941_v51 }
  0x55   : > { %4481 = vmatprep.mubr.msk.bf16.mxu0 %vm268_vm0, %v257_v29  ;;  %1394 = vst.msk [vmem:[#allocation2 + $0x190] sm:$0x3] %vm1345_vm2, %v4941_v51  ;;  %1397 = vst.msk [vmem:[#allocation2 + $0x1a8] sm:$0x3] %vm1345_vm2, %v4941_v51 }
  0x5c   : > { %4482 = vmatmul.mubr.msk.bf16.gmra.mxu0 %vm268_vm0, %v258_v34 }
  0x5d   : > { %4485 = vmatprep.mubr.msk.bf16.mxu0 %vm268_vm0, %v259_v35 }
  0x64   : > { %4486 = vmatmul.mubr.msk.bf16.gmra.mxu0 %vm268_vm0, %v260_v40 }
  0x65   : > { %4489 = vmatprep.mubr.msk.bf16.mxu0 %vm268_vm0, %v261_v41 }
  0x6c   : > { %4490 = vmatmul.mubr.msk.bf16.gmra.mxu0 %vm268_vm0, %v262_v46 }
  0x6d   : > { %4493 = vmatprep.mubr.msk.bf16.mxu0 %vm268_vm0, %v263_v47 }
  0x74   : > { %4494 = vmatmul.mubr.msk.bf16.gmra.mxu0 %vm268_vm0, %v264_v50 }
  0xfc   : > { %v4467_v52 = vpop.f32.mrf.mxu0 }
  0xfd   : > { %v5187_v53 = vmul.f32 0.70710677, %v4467_v52  ;;  %v5233_v40 = vmul.f32 0.5, %v4467_v52 }
  0xfe   : > { %v5189_v54 = vpop.f32.mrf.mxu0 }
  0xff   : > { %v544_v55 = vand.u32 2147483647, %v5187_v53  ;;  %v5193_v56 = vmul.f32 0.70710677, %v5189_v54  ;;  %v5243_v52 = vmul.f32 0.5, %v5189_v54  ;;  %vm1184_vm3 = vcmp.lt.f32.partialorder %v5187_v53, 0.0 }
 0x100   : > { %v5195_v57 = vpop.f32.mrf.mxu0 }
 0x101   : > { %v576_v58 = vmul.f32 0.3275911, %v544_v55  ;;  %v992_v59 = vsub.f32 0.0, %v544_v55  ;;  %v542_v60 = vand.u32 2147483647, %v5193_v56  ;;  %vm1182_vm4 = vcmp.lt.f32.partialorder %v5193_v56, 0.0 }
 0x102   : > { %v5199_v61 = vmul.f32 0.70710677, %v5195_v57  ;;  %v5201_v62 = vpop.f32.mrf.mxu0 }
 0x103   : > { %v608_v63 = vadd.f32 1.0, %v576_v58  ;;  %v1024_v0 = vmul.f32 %v992_v59, %v544_v55  ;;  %v574_v1 = vmul.f32 0.3275911, %v542_v60  ;;  %v990_v2 = vsub.f32 0.0, %v542_v60 }
 0x104   : > { %v545_v3 = vand.u32 2147483647, %v5199_v61  ;;  %v5205_v4 = vmul.f32 0.70710677, %v5201_v62  ;;  %v5207_v5 = vpop.f32.mrf.mxu0  ;;  %vm1185_vm5 = vcmp.lt.f32.partialorder %v5199_v61, 0.0 }
 0x105   : > { %4588 = vrcp.f32 %v608_v63  ;;  %v1058_v6 = vmul.f32 1.442695, %v1024_v0  ;;  %v606_v7 = vadd.f32 1.0, %v574_v1  ;;  %v1022_v8 = vmul.f32 %v990_v2, %v542_v60 }
 0x106   : > { %v577_v9 = vmul.f32 0.3275911, %v545_v3  ;;  %v993_v10 = vsub.f32 0.0, %v545_v3  ;;  %v543_v11 = vand.u32 2147483647, %v5205_v4  ;;  %v5210_v12 = vpop.f32.mrf.mxu0  ;;  %v5249_v63 = vmul.f32 0.5, %v5195_v57 }
 0x107   : > { %v1054_v13 = vmul.f32 1.442695, %v1022_v8  ;;  %v5213_v14 = vmul.f32 0.70710677, %v5207_v5  ;;  %4590 = vrcp.f32 %v606_v7  ;;  %v5219_v26 = vmul.f32 0.70710677, %v5210_v12 }
 0x108   : > { %v609_v15 = vadd.f32 1.0, %v577_v9  ;;  %v1025_v16 = vmul.f32 %v993_v10, %v545_v3  ;;  %v575_v17 = vmul.f32 0.3275911, %v543_v11  ;;  %v5215_v18 = vpop.f32.mrf.mxu0  ;;  %4592 = vpow2.f32 %v1058_v6 }
 0x109   : > { %v991_v19 = vsub.f32 0.0, %v543_v11  ;;  %v548_v20 = vand.u32 2147483647, %v5213_v14  ;;  %v5224_v28 = vmul.f32 0.70710677, %v5215_v18  ;;  %v5260_v10 = vmul.f32 0.5, %v5201_v62 }
 0x10a   : > { %4594 = vrcp.f32 %v609_v15  ;;  %v1060_v21 = vmul.f32 1.442695, %v1025_v16  ;;  %v607_v22 = vadd.f32 1.0, %v575_v17  ;;  %v5221_v27 = vpop.f32.mrf.mxu0  ;;  %v546_v32 = vand.u32 2147483647, %v5219_v26 }
 0x10b   : > { %v1023_v23 = vmul.f32 %v991_v19, %v543_v11  ;;  %v580_v24 = vmul.f32 0.3275911, %v548_v20  ;;  %v996_v25 = vsub.f32 0.0, %v548_v20  ;;  %4596 = vpow2.f32 %v1054_v13 }
 0x10c   : > { %4598 = vrcp.f32 %v607_v22  ;;  %v549_v33 = vand.u32 2147483647, %v5224_v28  ;;  %v5229_v35 = vmul.f32 0.70710677, %v5221_v27  ;;  %v5231_v36 = vpop.f32.mrf.mxu0  ;;  %v578_v37 = vmul.f32 0.3275911, %v546_v32 }
 0x10d   : > { %v1056_v29 = vmul.f32 1.442695, %v1023_v23  ;;  %v612_v30 = vadd.f32 1.0, %v580_v24  ;;  %v1028_v31 = vmul.f32 %v996_v25, %v548_v20  ;;  %4600 = vpow2.f32 %v1060_v21 }
 0x10e   : > { %v994_v38 = vsub.f32 0.0, %v546_v32  ;;  %v581_v39 = vmul.f32 0.3275911, %v549_v33  ;;  %v997_v41 = vsub.f32 0.0, %v549_v33  ;;  %v547_v42 = vand.u32 2147483647, %v5229_v35  ;;  %v5254_v7 = vpop.f32.mrf.mxu0 }
 0x10f   : > { %4602 = vpow2.f32 %v1056_v29  ;;  %v1066_v34 = vmul.f32 1.442695, %v1028_v31  ;;  %v610_v44 = vadd.f32 1.0, %v578_v37  ;;  %v5239_v47 = vmul.f32 0.70710677, %v5231_v36 }
 0x110   : > { %4604 = vrcp.f32 %v612_v30  ;;  %v1026_v45 = vmul.f32 %v994_v38, %v546_v32  ;;  %v613_v46 = vadd.f32 1.0, %v581_v39  ;;  %v1029_v49 = vmul.f32 %v997_v41, %v549_v33  ;;  %v5274_v25 = vpop.f32.mrf.mxu0 }
 0x111   : > { %4606 = vpow2.f32 %v1066_v34  ;;  %v579_v50 = vmul.f32 0.3275911, %v547_v42  ;;  %v995_v51 = vsub.f32 0.0, %v547_v42  ;;  %v552_v58 = vand.u32 2147483647, %v5239_v47 }
 0x112   : > { %v5236_v43 = vpop.eup %4588  ;;  %4608 = vrcp.f32 %v610_v44  ;;  %v1062_v55 = vmul.f32 1.442695, %v1026_v45  ;;  %v1068_v3 = vmul.f32 1.442695, %v1029_v49  ;;  %v5266_v21 = vmul.f32 0.70710677, %v5254_v7 }
 0x113   : > { %v704_v48 = vmul.f32 1.0614054, %v5236_v43  ;;  %4610 = vrcp.f32 %v613_v46  ;;  %v611_v0 = vadd.f32 1.0, %v579_v50  ;;  %v1027_v6 = vmul.f32 %v995_v51, %v547_v42 }
 0x114   : > { %v5246_v59 = vpop.eup %4590  ;;  %v584_v54 = vmul.f32 0.3275911, %v552_v58  ;;  %4612 = vpow2.f32 %v1062_v55  ;;  %v1000_v57 = vsub.f32 0.0, %v552_v58  ;;  %v5272_v24 = vmul.f32 0.5, %v5207_v5 }
 0x115   : > { %v736_v60 = vadd.f32 -1.4531521, %v704_v48  ;;  %v5251_v1 = vpop.eup %4592  ;;  %v702_v2 = vmul.f32 1.0614054, %v5246_v59  ;;  %4614 = vrcp.f32 %v611_v0  ;;  %v1064_v15 = vmul.f32 1.442695, %v1027_v6 }
 0x116   : > { %v616_v19 = vadd.f32 1.0, %v584_v54  ;;  %v1032_v20 = vmul.f32 %v1000_v57, %v552_v58  ;;  %4616 = vpow2.f32 %v1068_v3  ;;  %v550_v5 = vand.u32 2147483647, %v5266_v21 }
 0x117   : > { %v5256_v8 = vpop.eup %4594  ;;  %v768_v9 = vmul.f32 %v5236_v43, %v736_v60  ;;  %v734_v11 = vadd.f32 -1.4531521, %v702_v2  ;;  %4618 = vpow2.f32 %v1064_v15  ;;  %v5287_v42 = vmul.f32 0.70710677, %v5274_v25 }
 0x118   : > { %v705_v13 = vmul.f32 1.0614054, %v5256_v8  ;;  %v5263_v16 = vpop.eup %4596  ;;  %v1074_v32 = vmul.f32 1.442695, %v1032_v20  ;;  %4620 = vrcp.f32 %v616_v19  ;;  %v582_v49 = vmul.f32 0.3275911, %v550_v5 }
 0x119   : > { %v800_v17 = vadd.f32 1.4214138, %v768_v9  ;;  %v5268_v22 = vpop.eup %4598  ;;  %v766_v62 = vmul.f32 %v5246_v59, %v734_v11  ;;  %v998_v55 = vsub.f32 0.0, %v550_v5  ;;  %v5296_v58 = vand.u32 2147483647, %v5287_v42 }
 0x11a   : > { %v737_v23 = vadd.f32 -1.4531521, %v705_v13  ;;  %v5276_v29 = vpop.eup %4600  ;;  %v703_v31 = vmul.f32 1.0614054, %v5268_v22  ;;  %4622 = vpow2.f32 %v1074_v32  ;;  %v614_v3 = vadd.f32 1.0, %v582_v49 }
 0x11b   : > { %v832_v30 = vmul.f32 %v5236_v43, %v800_v17  ;;  %v798_v34 = vadd.f32 1.4214138, %v766_v62  ;;  %v1030_v57 = vmul.f32 %v998_v55, %v550_v5  ;;  %v5302_v11 = vmul.f32 0.3275911, %v5296_v58 }
 0x11c   : > { %v5280_v33 = vpop.eup %4602  ;;  %v769_v37 = vmul.f32 %v5256_v8, %v737_v23  ;;  %v735_v41 = vadd.f32 -1.4531521, %v703_v31  ;;  %4624 = vrcp.f32 %v614_v3  ;;  %vm1183_vm6 = vcmp.lt.f32.partialorder %v5205_v4, 0.0 }
 0x11d   : > { %v5284_v38 = vpop.eup %4604  ;;  %v864_v39 = vadd.f32 -0.28449672, %v832_v30  ;;  %v830_v45 = vmul.f32 %v5246_v59, %v798_v34  ;;  %vm1188_vm7 = vcmp.lt.f32.partialorder %v5213_v14, 0.0  ;;  %vm1186_vm8 = vcmp.lt.f32.partialorder %v5219_v26, 0.0 }
 0x11e   : > { %v5289_v44 = vpop.eup %4606  ;;  %v801_v46 = vadd.f32 1.4214138, %v769_v37  ;;  %v708_v48 = vmul.f32 1.0614054, %v5284_v38  ;;  %v767_v51 = vmul.f32 %v5268_v22, %v735_v41  ;;  %vm1189_vm9 = vcmp.lt.f32.partialorder %v5224_v28, 0.0 }
 0x11f   : > { %v896_v50 = vmul.f32 %v5236_v43, %v864_v39  ;;  %v862_v60 = vadd.f32 -0.28449672, %v830_v45  ;;  %v5299_v6 = vpop.eup %4608  ;;  %vm1187_vm10 = vcmp.lt.f32.partialorder %v5229_v35, 0.0  ;;  %vm1192_vm11 = vcmp.lt.f32.partialorder %v5239_v47, 0.0 }
 0x120   : > { %v833_v0 = vmul.f32 %v5256_v8, %v801_v46  ;;  %v740_v2 = vadd.f32 -1.4531521, %v708_v48  ;;  %v799_v9 = vadd.f32 1.4214138, %v767_v51  ;;  %v5304_v13 = vpop.eup %4610  ;;  %v706_v20 = vmul.f32 1.0614054, %v5299_v6 }
 0x121   : > { %v928_v54 = vadd.f32 0.2548296, %v896_v50  ;;  %v894_v15 = vmul.f32 %v5246_v59, %v862_v60  ;;  %v709_v30 = vmul.f32 1.0614054, %v5304_v13  ;;  %v5313_v31 = vpop.eup %4612  ;;  %v1070_v46 = vmul.f32 1.442695, %v1030_v57 }
 0x122   : > { %v865_v17 = vadd.f32 -0.28449672, %v833_v0  ;;  %v772_v19 = vmul.f32 %v5284_v38, %v740_v2  ;;  %v831_v23 = vmul.f32 %v5268_v22, %v799_v9  ;;  %v738_v5 = vadd.f32 -1.4531521, %v706_v20  ;;  %v5316_v39 = vpop.eup %4614 }
 0x123   : > { %v960_v62 = vmul.f32 %v5236_v43, %v928_v54  ;;  %v926_v32 = vadd.f32 0.2548296, %v894_v15  ;;  %v741_v43 = vadd.f32 -1.4531521, %v709_v30  ;;  %v5323_v55 = vpop.eup %4616  ;;  %v707_v2 = vmul.f32 1.0614054, %v5316_v39 }
 0x124   : > { %v897_v34 = vmul.f32 %v5256_v8, %v865_v17  ;;  %v804_v37 = vadd.f32 1.4214138, %v772_v19  ;;  %v863_v45 = vadd.f32 -0.28449672, %v831_v23  ;;  %v770_v51 = vmul.f32 %v5299_v6, %v738_v5  ;;  %v5329_v3 = vpop.eup %4618 }
 0x125   : > { %v1120_v41 = vmul.f32 %v5251_v1, %v960_v62  ;;  %v958_v48 = vmul.f32 %v5246_v59, %v926_v32  ;;  %v773_v1 = vmul.f32 %v5304_v13, %v741_v43  ;;  %v5333_v15 = vpop.eup %4620  ;;  %4626 = vpow2.f32 %v1070_v46 }
 0x126   : > { %v929_v49 = vadd.f32 0.2548296, %v897_v34  ;;  %v836_v50 = vmul.f32 %v5284_v38, %v804_v37  ;;  %v895_v0 = vmul.f32 %v5268_v22, %v863_v45  ;;  %v802_v57 = vadd.f32 1.4214138, %v770_v51 }
 0x127   : > { %v1152_v60 = vsub.f32 1.0, %v1120_v41  ;;  %v1118_v59 = vmul.f32 %v5263_v16, %v958_v48  ;;  %v805_v20 = vadd.f32 1.4214138, %v773_v1  ;;  %v5335_v62 = vpop.eup %4622  ;;  %v739_v5 = vadd.f32 -1.4531521, %v707_v2 }
 0x128   : > { %v961_v54 = vmul.f32 %v5256_v8, %v929_v49  ;;  %v868_v9 = vadd.f32 -0.28449672, %v836_v50  ;;  %v927_v19 = vadd.f32 0.2548296, %v895_v0  ;;  %v834_v16 = vmul.f32 %v5299_v6, %v802_v57 }
 0x129   : > { %v1216_v17 = vsub.f32 0.0, %v1152_v60  ;;  %v1150_v23 = vsub.f32 1.0, %v1118_v59  ;;  %v837_v37 = vmul.f32 %v5304_v13, %v805_v20  ;;  %v771_v50 = vmul.f32 %v5316_v39, %v739_v5  ;;  %v5354_v59 = vpop.eup %4624 }
 0x12a   : > { %v1121_v30 = vmul.f32 %v5276_v29, %v961_v54  ;;  %v900_v32 = vmul.f32 %v5284_v38, %v868_v9  ;;  %v959_v34 = vmul.f32 %v5268_v22, %v927_v19  ;;  %v866_v48 = vadd.f32 -0.28449672, %v834_v16 }
 0x12b   : > { %v1248_v8 = vsel %vm1184_vm3, %v1216_v17, %v1152_v60  ;;  %v1214_v45 = vsub.f32 0.0, %v1150_v23  ;;  %v869_v49 = vadd.f32 -0.28449672, %v837_v37  ;;  %v803_v56 = vadd.f32 1.4214138, %v771_v50 }
 0x12c   : > { %v1280_v41 = vadd.f32 1.0, %v1248_v8  ;;  %v1153_v43 = vsub.f32 1.0, %v1121_v30  ;;  %v932_v46 = vadd.f32 0.2548296, %v900_v32  ;;  %v1119_v29 = vmul.f32 %v5280_v33, %v959_v34 }
 0x12d   : > { %v1246_v22 = vsel %vm1182_vm4, %v1214_v45, %v1150_v23  ;;  %v898_v2 = vmul.f32 %v5299_v6, %v866_v48  ;;  %v901_v33 = vmul.f32 %v5304_v13, %v869_v49  ;;  %v712_v9 = vmul.f32 1.0614054, %v5333_v15 }
 0x12e   : > { %v1312_v53 = vmul.f32 %v1280_v41, %v5233_v40  ;;  %v1217_v51 = vsub.f32 0.0, %v1153_v43  ;;  %v964_v60 = vmul.f32 %v5284_v38, %v932_v46  ;;  %v1278_v0 = vadd.f32 1.0, %v1246_v22 }
 0x12f   : > { %v1151_v1 = vsub.f32 1.0, %v1119_v29  ;;  %v930_v19 = vadd.f32 0.2548296, %v898_v2  ;;  %v933_v23 = vadd.f32 0.2548296, %v901_v33  ;;  %v835_v30 = vmul.f32 %v5316_v39, %v803_v56 }
 0x130   : > { %1401 = vst.msk [vmem:[#allocation2 + $0x31] sm:$0xff] %vm1342_vm1, %v1312_v53  ;;  %v1249_v54 = vsel %vm1185_vm5, %v1217_v51, %v1153_v43  ;;  %v1124_v40 = vmul.f32 %v5289_v44, %v964_v60  ;;  %v1310_v38 = vmul.f32 %v1278_v0, %v5243_v52  ;;  %v744_v32 = vadd.f32 -1.4531521, %v712_v9  ;;  %v5382_v53 = vpop.f32.mrf.mxu0 }
 0x131   : > { %v1281_v57 = vadd.f32 1.0, %v1249_v54  ;;  %v1215_v17 = vsub.f32 0.0, %v1151_v1  ;;  %v962_v16 = vmul.f32 %v5299_v6, %v930_v19  ;;  %v710_v8 = vmul.f32 1.0614054, %v5354_v59 }
 0x132   : > { %v1156_v20 = vsub.f32 1.0, %v1124_v40  ;;  %1399 = vst.msk [vmem:[#allocation2 + $0x19] sm:$0xff] %vm1342_vm1, %v1310_v38  ;;  %v965_v37 = vmul.f32 %v5304_v13, %v933_v23  ;;  %v867_v5 = vadd.f32 -0.28449672, %v835_v30  ;;  %v776_v45 = vmul.f32 %v5333_v15, %v744_v32  ;;  %v5374_v4 = vpop.eup %4626 }
 0x133   : > { %v1313_v61 = vmul.f32 %v1281_v57, %v5249_v63  ;;  %v1247_v44 = vsel %vm1183_vm6, %v1215_v17, %v1151_v1  ;;  %v1122_v41 = vmul.f32 %v5313_v31, %v962_v16  ;;  %v742_v43 = vadd.f32 -1.4531521, %v710_v8 }
 0x134   : > { %v1279_v52 = vadd.f32 1.0, %v1247_v44  ;;  %v1220_v34 = vsub.f32 0.0, %v1156_v20  ;;  %v617_v63 = vadd.f32 1.0, %v5302_v11  ;;  %v1125_v29 = vmul.f32 %v5323_v55, %v965_v37 }
 0x135   : > { %1402 = vst.msk [vmem:[#allocation2 + $0x39] sm:$0xff] %vm1342_vm1, %v1313_v61  ;;  %v899_v13 = vmul.f32 %v5316_v39, %v867_v5  ;;  %v1154_v49 = vsub.f32 1.0, %v1122_v41  ;;  %v808_v50 = vadd.f32 1.4214138, %v776_v45  ;;  %v774_v31 = vmul.f32 %v5354_v59, %v742_v43 }
 0x136   : > { %v1311_v6 = vmul.f32 %v1279_v52, %v5260_v10  ;;  %v1252_v46 = vsel %vm1188_vm7, %v1220_v34, %v1156_v20  ;;  %v1157_v11 = vsub.f32 1.0, %v1125_v29  ;;  %4628 = vrcp.f32 %v617_v63 }
 0x137   : > { %v1284_v48 = vadd.f32 1.0, %v1252_v46  ;;  %v931_v22 = vadd.f32 0.2548296, %v899_v13  ;;  %v1218_v14 = vsub.f32 0.0, %v1154_v49  ;;  %v840_v51 = vmul.f32 %v5333_v15, %v808_v50 }
 0x138   : > { %1400 = vst.msk [vmem:[#allocation2 + $0x21] sm:$0xff] %vm1342_vm1, %v1311_v6  ;;  %v806_v55 = vadd.f32 1.4214138, %v774_v31  ;;  %v482_v60 = vmul.f32 0.5, %v5210_v12  ;;  %v1221_v0 = vsub.f32 0.0, %v1157_v11  ;;  %v485_v56 = vmul.f32 0.5, %v5215_v18 }
 0x139   : > { %v1316_v10 = vmul.f32 %v1284_v48, %v5272_v24  ;;  %v963_v1 = vmul.f32 %v5316_v39, %v931_v22  ;;  %v1250_v2 = vsel %vm1186_vm8, %v1218_v14, %v1154_v49  ;;  %v872_v33 = vadd.f32 -0.28449672, %v840_v51  ;;  %v5393_v24 = vpop.f32.mrf.mxu0 }
 0x13a   : > { %v838_v54 = vmul.f32 %v5354_v59, %v806_v55  ;;  %v1282_v40 = vadd.f32 1.0, %v1250_v2  ;;  %v1253_v9 = vsel %vm1189_vm9, %v1221_v0, %v1157_v11  ;;  %v5399_v57 = vmul.f32 0.70710677, %v5382_v53 }
 0x13b   : > { %1405 = vst.msk [vmem:[#allocation2 + $0x61] sm:$0xff] %vm1342_vm1, %v1316_v10  ;;  %v1123_v12 = vmul.f32 %v5329_v3, %v963_v1  ;;  %v1285_v26 = vadd.f32 1.0, %v1253_v9  ;;  %v904_v38 = vmul.f32 %v5333_v15, %v872_v33  ;;  %v1001_v19 = vsub.f32 0.0, %v5296_v58  ;;  %v5404_v32 = vpop.f32.mrf.mxu0 }
 0x13c   : > { %v870_v39 = vadd.f32 -0.28449672, %v838_v54  ;;  %v1314_v17 = vmul.f32 %v1282_v40, %v482_v60  ;;  %v551_v18 = vand.u32 2147483647, %v5399_v57  ;;  %v483_v3 = vmul.f32 0.5, %v5221_v27 }
 0x13d   : > { %v1155_v28 = vsub.f32 1.0, %v1123_v12  ;;  %v1317_v20 = vmul.f32 %v1285_v26, %v485_v56  ;;  %v936_v23 = vadd.f32 0.2548296, %v904_v38  ;;  %v5409_v44 = vmul.f32 0.70710677, %v5393_v24  ;;  %v5421_v6 = vpop.f32.mrf.mxu0 }
 0x13e   : > { %v902_v30 = vmul.f32 %v5354_v59, %v870_v39  ;;  %1403 = vst.msk [vmem:[#allocation2 + $0x49] sm:$0xff] %vm1342_vm1, %v1314_v17  ;;  %v583_v52 = vmul.f32 0.3275911, %v551_v18  ;;  %v1033_v37 = vmul.f32 %v1001_v19, %v5296_v58  ;;  %v5417_v41 = vmul.f32 0.70710677, %v5404_v32 }
 0x13f   : > { %v1219_v61 = vsub.f32 0.0, %v1155_v28  ;;  %1406 = vst.msk [vmem:[#allocation2 + $0x69] sm:$0xff] %vm1342_vm1, %v1317_v20  ;;  %v968_v16 = vmul.f32 %v5333_v15, %v936_v23  ;;  %v556_v5 = vand.u32 2147483647, %v5409_v44  ;;  %v5433_v10 = vpop.f32.mrf.mxu0  ;;  %vm1190_vm12 = vcmp.lt.f32.partialorder %v5266_v21, 0.0 }
 0x140   : > { %v934_v8 = vadd.f32 0.2548296, %v902_v30  ;;  %v615_v63 = vadd.f32 1.0, %v583_v52  ;;  %v5424_v15 = vand.u32 2147483647, %v5417_v41  ;;  %v486_v2 = vmul.f32 0.5, %v5254_v7 }
 0x141   : > { %v1251_v34 = vsel %vm1187_vm10, %v1219_v61, %v1155_v28  ;;  %v1128_v45 = vmul.f32 %v5335_v62, %v968_v16  ;;  %v588_v35 = vmul.f32 0.3275911, %v556_v5  ;;  %v1076_v49 = vmul.f32 1.442695, %v1033_v37  ;;  %v5442_v47 = vpop.f32.mrf.mxu0 }
 0x142   : > { %v1283_v27 = vadd.f32 1.0, %v1251_v34  ;;  %v966_v43 = vmul.f32 %v5354_v59, %v934_v8  ;;  %4630 = vrcp.f32 %v615_v63  ;;  %v999_v62 = vsub.f32 0.0, %v551_v18 }
 0x143   : > { %v5426_v46 = vpop.eup %4628  ;;  %v1160_v29 = vsub.f32 1.0, %v1128_v45  ;;  %v620_v50 = vadd.f32 1.0, %v588_v35  ;;  %v488_v59 = vmul.f32 0.5, %v5231_v36  ;;  %v586_v22 = vmul.f32 0.3275911, %v5424_v15  ;;  %v5458_v30 = vpop.f32.mrf.mxu0 }
 0x144   : > { %v1315_v58 = vmul.f32 %v1283_v27, %v483_v3  ;;  %v1126_v13 = vmul.f32 %v5374_v4, %v966_v43  ;;  %v713_v48 = vmul.f32 1.0614054, %v5426_v46  ;;  %v1004_v14 = vsub.f32 0.0, %v556_v5 }
 0x145   : > { %v1224_v31 = vsub.f32 0.0, %v1160_v29  ;;  %4632 = vrcp.f32 %v620_v50  ;;  %v618_v60 = vadd.f32 1.0, %v586_v22  ;;  %v1031_v36 = vmul.f32 %v999_v62, %v551_v18 }
 0x146   : > { %1404 = vst.msk [vmem:[#allocation2 + $0x51] sm:$0xff] %vm1342_vm1, %v1315_v58  ;;  %v1158_v11 = vsub.f32 1.0, %v1126_v13  ;;  %v745_v4 = vadd.f32 -1.4531521, %v713_v48  ;;  %4634 = vpow2.f32 %v1076_v49  ;;  %v5440_v54 = vmul.f32 0.70710677, %v5421_v6  ;;  %v5484_v48 = vpop.f32.mrf.mxu0 }
 0x147   : > { %v1256_v51 = vsel %vm1192_vm11, %v1224_v31, %v1160_v29  ;;  %4636 = vrcp.f32 %v618_v60  ;;  %v1036_v9 = vmul.f32 %v1004_v14, %v556_v5  ;;  %v5446_v26 = vmul.f32 0.70710677, %v5433_v10 }
 0x148   : > { %v1222_v55 = vsub.f32 0.0, %v1158_v11  ;;  %v1288_v0 = vadd.f32 1.0, %v1256_v51  ;;  %v777_v1 = vmul.f32 %v5426_v46, %v745_v4  ;;  %v557_v12 = vand.u32 2147483647, %v5440_v54 }
 0x149   : > { %v5450_v7 = vmul.f32 0.5, %v5274_v25  ;;  %v1072_v17 = vmul.f32 1.442695, %v1031_v36  ;;  %v5454_v28 = vmul.f32 0.5, %v5382_v53  ;;  %v1002_v19 = vsub.f32 0.0, %v5424_v15 }
 0x14a   : > { %v1254_v33 = vsel %vm1190_vm12, %v1222_v55, %v1158_v11  ;;  %v1320_v21 = vmul.f32 %v1288_v0, %v488_v59  ;;  %v809_v56 = vadd.f32 1.4214138, %v777_v1  ;;  %v589_v20 = vmul.f32 0.3275911, %v557_v12 }
 0x14b   : > { %v1286_v40 = vadd.f32 1.0, %v1254_v33  ;;  %v555_v23 = vand.u32 2147483647, %v5446_v26  ;;  %v1082_v3 = vmul.f32 1.442695, %v1036_v9  ;;  %v5465_v61 = vmul.f32 0.5, %v5393_v24 }
 0x14c   : > { %1409 = vst.msk [vmem:[#allocation2 + $0x91] sm:$0xff] %vm1342_vm1, %v1320_v21  ;;  %v841_v39 = vmul.f32 %v5426_v46, %v809_v56  ;;  %v5462_v25 = vmul.f32 0.70710677, %v5442_v47  ;;  %v5468_v53 = vmul.f32 0.5, %v5404_v32  ;;  %v621_v16 = vadd.f32 1.0, %v589_v20 }
 0x14d   : > { %v1318_v38 = vmul.f32 %v1286_v40, %v486_v2  ;;  %v587_v8 = vmul.f32 0.3275911, %v555_v23  ;;  %4638 = vpow2.f32 %v1072_v17  ;;  %v5475_v5 = vmul.f32 0.70710677, %v5458_v30 }
 0x14e   : > { %v873_v18 = vadd.f32 -0.28449672, %v841_v39  ;;  %v560_v37 = vand.u32 2147483647, %v5462_v25  ;;  %v1034_v24 = vmul.f32 %v1002_v19, %v5424_v15  ;;  %4640 = vrcp.f32 %v621_v16 }
 0x14f   : > { %1407 = vst.msk [vmem:[#allocation2 + $0x79] sm:$0xff] %vm1342_vm1, %v1318_v38  ;;  %v5470_v52 = vpop.eup %4630  ;;  %v619_v45 = vadd.f32 1.0, %v587_v8  ;;  %4642 = vpow2.f32 %v1082_v3  ;;  %v1005_v43 = vsub.f32 0.0, %v557_v12  ;;  %vm1193_vm13 = vcmp.lt.f32.partialorder %v5287_v42, 0.0  ;;  %v5501_v3 = vpop.f32.mrf.mxu0 }
 0x150   : > { %v905_v34 = vmul.f32 %v5426_v46, %v873_v18  ;;  %v711_v27 = vmul.f32 1.0614054, %v5470_v52  ;;  %v592_v63 = vmul.f32 0.3275911, %v560_v37  ;;  %v5481_v58 = vmul.f32 0.5, %v5421_v6 }
 0x151   : > { %v1003_v29 = vsub.f32 0.0, %v555_v23  ;;  %v558_v13 = vand.u32 2147483647, %v5475_v5  ;;  %4644 = vrcp.f32 %v619_v45  ;;  %v1008_v50 = vsub.f32 0.0, %v560_v37 }
 0x152   : > { %v937_v32 = vadd.f32 0.2548296, %v905_v34  ;;  %v743_v35 = vadd.f32 -1.4531521, %v711_v27  ;;  %v5486_v49 = vpop.eup %4632  ;;  %v624_v62 = vadd.f32 1.0, %v592_v63  ;;  %v1037_v51 = vmul.f32 %v1005_v43, %v557_v12 }
 0x153   : > { %v4635_v59 = vpop.eup %4634  ;;  %v716_v11 = vmul.f32 1.0614054, %v5486_v49  ;;  %v1078_v22 = vmul.f32 1.442695, %v1034_v24  ;;  %v590_v6 = vmul.f32 0.3275911, %v558_v13  ;;  %v1035_v2 = vmul.f32 %v1003_v29, %v555_v23 }
 0x154   : > { %v969_v15 = vmul.f32 %v5426_v46, %v937_v32  ;;  %v775_v31 = vmul.f32 %v5470_v52, %v743_v35  ;;  %v5491_v4 = vpop.eup %4636  ;;  %v1006_v55 = vsub.f32 0.0, %v558_v13  ;;  %v5494_v60 = vmul.f32 0.70710677, %v5484_v48 }
 0x155   : > { %v748_v46 = vadd.f32 -1.4531521, %v716_v11  ;;  %v714_v1 = vmul.f32 1.0614054, %v5491_v4  ;;  %4646 = vrcp.f32 %v624_v62  ;;  %v1040_v33 = vmul.f32 %v1008_v50, %v560_v37 }
 0x156   : > { %v1129_v14 = vmul.f32 %v4635_v59, %v969_v15  ;;  %v807_v0 = vadd.f32 1.4214138, %v775_v31  ;;  %v622_v21 = vadd.f32 1.0, %v590_v6  ;;  %v561_v12 = vand.u32 2147483647, %v5494_v60 }
 0x157   : > { %v780_v56 = vmul.f32 %v5486_v49, %v748_v46  ;;  %v746_v9 = vadd.f32 -1.4531521, %v714_v1  ;;  %4648 = vpow2.f32 %v1078_v22  ;;  %v1084_v39 = vmul.f32 1.442695, %v1037_v51 }
 0x158   : > { %v1161_v36 = vsub.f32 1.0, %v1129_v14  ;;  %v839_v40 = vmul.f32 %v5470_v52, %v807_v0  ;;  %v1038_v17 = vmul.f32 %v1006_v55, %v558_v13  ;;  %4650 = vrcp.f32 %v622_v21 }
 0x159   : > { %v812_v20 = vadd.f32 1.4214138, %v780_v56  ;;  %v778_v18 = vmul.f32 %v5491_v4, %v746_v9  ;;  %v1080_v16 = vmul.f32 1.442695, %v1035_v2  ;;  %v1090_v8 = vmul.f32 1.442695, %v1040_v33 }
 0x15a   : > { %v1225_v38 = vsub.f32 0.0, %v1161_v36  ;;  %v871_v19 = vadd.f32 -0.28449672, %v839_v40  ;;  %v593_v34 = vmul.f32 0.3275911, %v561_v12  ;;  %v4639_v37 = vpop.eup %4638  ;;  %4652 = vpow2.f32 %v1084_v39 }
 0x15b   : > { %v844_v45 = vmul.f32 %v5486_v49, %v812_v20  ;;  %v810_v32 = vadd.f32 1.4214138, %v778_v18  ;;  %v5507_v43 = vpop.eup %4640  ;;  %v1086_v63 = vmul.f32 1.442695, %v1038_v17  ;;  %v5510_v29 = vmul.f32 0.70710677, %v5501_v3  ;;  %v5530_v17 = vpop.f32.mrf.mxu0 }
 0x15c   : > { %v1257_v23 = vsel %vm1193_vm13, %v1225_v38, %v1161_v36  ;;  %v903_v24 = vmul.f32 %v5470_v52, %v871_v19  ;;  %v625_v35 = vadd.f32 1.0, %v593_v34  ;;  %v4643_v42 = vpop.eup %4642  ;;  %vm1191_vm14 = vcmp.lt.f32.partialorder %v5399_v57, 0.0 }
 0x15d   : > { %v1289_v27 = vadd.f32 1.0, %v1257_v23  ;;  %v876_v62 = vadd.f32 -0.28449672, %v844_v45  ;;  %v842_v50 = vmul.f32 %v5491_v4, %v810_v32  ;;  %v717_v59 = vmul.f32 1.0614054, %v5507_v43 }
 0x15e   : > { %v935_v15 = vadd.f32 0.2548296, %v903_v24  ;;  %4654 = vrcp.f32 %v625_v35  ;;  %v1009_v31 = vsub.f32 0.0, %v561_v12  ;;  %v559_v11 = vand.u32 2147483647, %v5510_v29  ;;  %v5517_v22 = vpop.eup %4644 }
 0x15f   : > { %v1321_v13 = vmul.f32 %v1289_v27, %v5450_v7  ;;  %v908_v7 = vmul.f32 %v5486_v49, %v876_v62  ;;  %v874_v14 = vadd.f32 -0.28449672, %v842_v50  ;;  %4656 = vpow2.f32 %v1080_v16 }
 0x160   : > { %v967_v6 = vmul.f32 %v5470_v52, %v935_v15  ;;  %v749_v51 = vadd.f32 -1.4531521, %v717_v59  ;;  %v715_v55 = vmul.f32 1.0614054, %v5517_v22  ;;  %4658 = vpow2.f32 %v1090_v8 }
 0x161   : > { %1410 = vst.msk [vmem:[#allocation2 + $0x99] sm:$0xff] %vm1342_vm1, %v1321_v13  ;;  %v591_v0 = vmul.f32 0.3275911, %v559_v11  ;;  %v940_v1 = vadd.f32 0.2548296, %v908_v7  ;;  %v906_v36 = vmul.f32 %v5491_v4, %v874_v14  ;;  %4660 = vpow2.f32 %v1086_v63 }
 0x162   : > { %v1127_v46 = vmul.f32 %v4639_v37, %v967_v6  ;;  %v5524_v2 = vpop.eup %4646  ;;  %vm1196_vm15 = vcmp.lt.f32.partialorder %v5409_v44, 0.0  ;;  %v781_v52 = vmul.f32 %v5507_v43, %v749_v51  ;;  %v747_v33 = vadd.f32 -1.4531521, %v715_v55 }
 0x163   : > { %v1041_v21 = vmul.f32 %v1009_v31, %v561_v12  ;;  %v623_v40 = vadd.f32 1.0, %v591_v0  ;;  %v972_v9 = vmul.f32 %v5486_v49, %v940_v1  ;;  %v938_v38 = vadd.f32 0.2548296, %v906_v36 }
 0x164   : > { %v1159_v56 = vsub.f32 1.0, %v1127_v46  ;;  %v720_v39 = vmul.f32 1.0614054, %v5524_v2  ;;  %vm1194_vm2 = vcmp.lt.f32.partialorder %v5417_v41, 0.0  ;;  %v813_v19 = vadd.f32 1.4214138, %v781_v52  ;;  %v4649_v23 = vpop.eup %4648 }
 0x165   : > { %v779_v20 = vmul.f32 %v5517_v22, %v747_v33  ;;  %4662 = vrcp.f32 %v623_v40  ;;  %v1007_v18 = vsub.f32 0.0, %v559_v11  ;;  %v1132_v8 = vmul.f32 %v4643_v42, %v972_v9  ;;  %v5535_v37 = vpop.eup %4650 }
 0x166   : > { %v1223_v16 = vsub.f32 0.0, %v1159_v56  ;;  %v970_v12 = vmul.f32 %v5491_v4, %v938_v38  ;;  %v752_v34 = vadd.f32 -1.4531521, %v720_v39  ;;  %v845_v49 = vmul.f32 %v5507_v43, %v813_v19 }
 0x167   : > { %v811_v27 = vadd.f32 1.4214138, %v779_v20  ;;  %v1092_v24 = vmul.f32 1.442695, %v1041_v21  ;;  %v5539_v45 = vmul.f32 0.70710677, %v5530_v17  ;;  %v4653_v50 = vpop.eup %4652  ;;  %v1039_v7 = vmul.f32 %v1007_v18, %v559_v11 }
 0x168   : > { %v1255_v32 = vsel %vm1191_vm14, %v1223_v16, %v1159_v56  ;;  %v1164_v63 = vsub.f32 1.0, %v1132_v8  ;;  %v1130_v35 = vmul.f32 %v4649_v23, %v970_v12  ;;  %v784_v13 = vmul.f32 %v5524_v2, %v752_v34 }
 0x169   : > { %v1287_v42 = vadd.f32 1.0, %v1255_v32  ;;  %v877_v15 = vadd.f32 -0.28449672, %v845_v49  ;;  %v843_v4 = vmul.f32 %v5517_v22, %v811_v27  ;;  %v718_v62 = vmul.f32 1.0614054, %v5535_v37 }
 0x16a   : > { %v1228_v59 = vsub.f32 0.0, %v1164_v63  ;;  %v1162_v31 = vsub.f32 1.0, %v1130_v35  ;;  %v816_v6 = vadd.f32 1.4214138, %v784_v13  ;;  %v5554_v52 = vand.u32 2147483647, %v5539_v45 }
 0x16b   : > { %v1319_v14 = vmul.f32 %v1287_v42, %v5454_v28  ;;  %v909_v57 = vmul.f32 %v5507_v43, %v877_v15  ;;  %v875_v51 = vadd.f32 -0.28449672, %v843_v4  ;;  %v750_v55 = vadd.f32 -1.4531521, %v718_v62  ;;  %v5548_v0 = vpop.eup %4654 }
 0x16c   : > { %v1260_v46 = vsel %vm1196_vm15, %v1228_v59, %v1164_v63  ;;  %v1226_v1 = vsub.f32 0.0, %v1162_v31  ;;  %v848_v36 = vmul.f32 %v5524_v2, %v816_v6  ;;  %v4657_v33 = vpop.eup %4656  ;;  %vm1197_vm3 = vcmp.lt.f32.partialorder %v5440_v54, 0.0 }
 0x16d   : > { %1408 = vst.msk [vmem:[#allocation2 + $0x81] sm:$0xff] %vm1342_vm1, %v1319_v14  ;;  %v1292_v11 = vadd.f32 1.0, %v1260_v46  ;;  %v941_v28 = vadd.f32 0.2548296, %v909_v57  ;;  %v907_v21 = vmul.f32 %v5517_v22, %v875_v51  ;;  %v782_v40 = vmul.f32 %v5535_v37, %v750_v55  ;;  %v4659_v56 = vpop.eup %4658 }
 0x16e   : > { %v1258_v44 = vsel %vm1194_vm2, %v1226_v1, %v1162_v31  ;;  %v880_v9 = vadd.f32 -0.28449672, %v848_v36  ;;  %v721_v38 = vmul.f32 1.0614054, %v5548_v0  ;;  %v596_v39 = vmul.f32 0.3275911, %v5554_v52  ;;  %v4661_v19 = vpop.eup %4660 }
 0x16f   : > { %v1324_v20 = vmul.f32 %v1292_v11, %v5465_v61  ;;  %v1290_v18 = vadd.f32 1.0, %v1258_v44  ;;  %v973_v23 = vmul.f32 %v5507_v43, %v941_v28  ;;  %v939_v16 = vadd.f32 0.2548296, %v907_v21 }
 0x170   : > { %v912_v8 = vmul.f32 %v5524_v2, %v880_v9  ;;  %v814_v12 = vadd.f32 1.4214138, %v782_v40  ;;  %v753_v34 = vadd.f32 -1.4531521, %v721_v38  ;;  %v628_v41 = vadd.f32 1.0, %v596_v39 }
 0x171   : > { %1413 = vst.msk [vmem:[#allocation2 + $0xc1] sm:$0xff] %vm1342_vm1, %v1324_v20  ;;  %v1322_v49 = vmul.f32 %v1290_v18, %v5468_v53  ;;  %v1133_v27 = vmul.f32 %v4653_v50, %v973_v23  ;;  %v971_v32 = vmul.f32 %v5517_v22, %v939_v16  ;;  %v1088_v63 = vmul.f32 1.442695, %v1039_v7  ;;  %v5579_v7 = vpop.f32.mrf.mxu0 }
 0x172   : > { %v5570_v35 = vpop.eup %4662  ;;  %v944_v61 = vadd.f32 0.2548296, %v912_v8  ;;  %v846_v13 = vmul.f32 %v5535_v37, %v814_v12  ;;  %v785_v43 = vmul.f32 %v5548_v0, %v753_v34  ;;  %4664 = vrcp.f32 %v628_v41 }
 0x173   : > { %1411 = vst.msk [vmem:[#allocation2 + $0xa9] sm:$0xff] %vm1342_vm1, %v1322_v49  ;;  %v1165_v42 = vsub.f32 1.0, %v1133_v27  ;;  %v1131_v15 = vmul.f32 %v4657_v33, %v971_v32  ;;  %4666 = vpow2.f32 %v1092_v24  ;;  %v719_v4 = vmul.f32 1.0614054, %v5570_v35  ;;  %v5591_v21 = vpop.f32.mrf.mxu0 }
 0x174   : > { %v491_v53 = vmul.f32 0.5, %v5433_v10  ;;  %v976_v22 = vmul.f32 %v5524_v2, %v944_v61  ;;  %v878_v62 = vadd.f32 -0.28449672, %v846_v13  ;;  %v817_v50 = vadd.f32 1.4214138, %v785_v43 }
 0x175   : > { %v1229_v59 = vsub.f32 0.0, %v1165_v42  ;;  %v1163_v31 = vsub.f32 1.0, %v1131_v15  ;;  %vm1195_vm4 = vcmp.lt.f32.partialorder %v5446_v26, 0.0  ;;  %v751_v6 = vadd.f32 -1.4531521, %v719_v4  ;;  %v5609_v27 = vpop.f32.mrf.mxu0 }
 0x176   : > { %v1136_v14 = vmul.f32 %v4659_v56, %v976_v22  ;;  %v910_v57 = vmul.f32 %v5535_v37, %v878_v62  ;;  %v849_v24 = vmul.f32 %v5548_v0, %v817_v50  ;;  %4668 = vpow2.f32 %v1088_v63 }
 0x177   : > { %v1261_v10 = vsel %vm1197_vm3, %v1229_v59, %v1165_v42  ;;  %v1227_v51 = vsub.f32 0.0, %v1163_v31  ;;  %v783_v2 = vmul.f32 %v5570_v35, %v751_v6  ;;  %v1012_v55 = vsub.f32 0.0, %v5554_v52  ;;  %v5619_v59 = vpop.f32.mrf.mxu0 }
 0x178   : > { %v1293_v46 = vadd.f32 1.0, %v1261_v10  ;;  %v1168_v1 = vsub.f32 1.0, %v1136_v14  ;;  %v942_v26 = vadd.f32 0.2548296, %v910_v57  ;;  %v881_v36 = vadd.f32 -0.28449672, %v849_v24 }
 0x179   : > { %v1259_v33 = vsel %vm1195_vm4, %v1227_v51, %v1163_v31  ;;  %vm1200_vm5 = vcmp.lt.f32.partialorder %v5462_v25, 0.0  ;;  %v815_v11 = vadd.f32 1.4214138, %v783_v2  ;;  %v5589_v28 = vmul.f32 0.70710677, %v5579_v7 }
 0x17a   : > { %v1325_v54 = vmul.f32 %v1293_v46, %v5481_v58  ;;  %v1291_v40 = vadd.f32 1.0, %v1259_v33  ;;  %v1232_v56 = vsub.f32 0.0, %v1168_v1  ;;  %v974_v44 = vmul.f32 %v5535_v37, %v942_v26  ;;  %v447_v26 = vpop.f32.mrf.mxu0 }
 0x17b   : > { %v913_v9 = vmul.f32 %v5548_v0, %v881_v36  ;;  %v847_v38 = vmul.f32 %v5570_v35, %v815_v11  ;;  %v1044_v39 = vmul.f32 %v1012_v55, %v5554_v52  ;;  %v562_v25 = vand.u32 2147483647, %v5589_v28 }
 0x17c   : > { %1414 = vst.msk [vmem:[#allocation2 + $0xc9] sm:$0xff] %vm1342_vm1, %v1325_v54  ;;  %v1323_v20 = vmul.f32 %v1291_v40, %v491_v53  ;;  %v1264_v18 = vsel %vm1200_vm5, %v1232_v56, %v1168_v1  ;;  %v1134_v23 = vmul.f32 %v4661_v19, %v974_v44  ;;  %v5601_v16 = vmul.f32 0.70710677, %v5591_v21 }
 0x17d   : > { %v496_v58 = vmul.f32 0.5, %v5442_v47  ;;  %v1296_v8 = vadd.f32 1.0, %v1264_v18  ;;  %v945_v37 = vadd.f32 0.2548296, %v913_v9  ;;  %v879_v12 = vadd.f32 -0.28449672, %v847_v38 }
 0x17e   : > { %1412 = vst.msk [vmem:[#allocation2 + $0xb1] sm:$0xff] %vm1342_vm1, %v1323_v20  ;;  %v494_v34 = vmul.f32 0.5, %v5458_v30  ;;  %v1166_v52 = vsub.f32 1.0, %v1134_v23  ;;  %v594_v41 = vmul.f32 0.3275911, %v562_v25  ;;  %vm1198_vm6 = vcmp.lt.f32.partialorder %v5475_v5, 0.0  ;;  %v5640_v20 = vpop.f32.mrf.mxu0 }
 0x17f   : > { %v5607_v49 = vand.u32 2147483647, %v5601_v16  ;;  %v5611_v19 = vpop.eup %4664  ;;  %v1328_v32 = vmul.f32 %v1296_v8, %v496_v58  ;;  %v977_v63 = vmul.f32 %v5548_v0, %v945_v37  ;;  %v911_v47 = vmul.f32 %v5570_v35, %v879_v12 }
 0x180   : > { %v1098_v61 = vmul.f32 1.442695, %v1044_v39  ;;  %v4667_v13 = vpop.eup %4666  ;;  %v1230_v43 = vsub.f32 0.0, %v1166_v52  ;;  %v724_v42 = vmul.f32 1.0614054, %v5611_v19  ;;  %v626_v30 = vadd.f32 1.0, %v594_v41 }
 0x181   : > { %v597_v15 = vmul.f32 0.3275911, %v5607_v49  ;;  %1417 = vst.msk [vmem:[#allocation2 + $0xf1] sm:$0xff] %vm1342_vm1, %v1328_v32  ;;  %v1137_v4 = vmul.f32 %v4667_v13, %v977_v63  ;;  %v943_v53 = vadd.f32 0.2548296, %v911_v47  ;;  %v1010_v22 = vsub.f32 0.0, %v562_v25 }
 0x182   : > { %v1262_v62 = vsel %vm1198_vm6, %v1230_v43, %v1166_v52  ;;  %v756_v50 = vadd.f32 -1.4531521, %v724_v42  ;;  %4670 = vrcp.f32 %v626_v30  ;;  %v5624_v2 = vmul.f32 0.70710677, %v5609_v27  ;;  %v5655_v43 = vpop.f32.mrf.mxu0 }
 0x183   : > { %v629_v0 = vadd.f32 1.0, %v597_v15  ;;  %v4669_v31 = vpop.eup %4668  ;;  %v1294_v6 = vadd.f32 1.0, %v1262_v62  ;;  %v1169_v14 = vsub.f32 1.0, %v1137_v4  ;;  %v975_v57 = vmul.f32 %v5570_v35, %v943_v53 }
 0x184   : > { %4672 = vpow2.f32 %v1098_v61  ;;  %v788_v24 = vmul.f32 %v5611_v19, %v756_v50  ;;  %v497_v55 = vmul.f32 0.5, %v5484_v48  ;;  %vm1201_vm7 = vcmp.lt.f32.partialorder %v5494_v60, 0.0 }
 0x185   : > { %4674 = vrcp.f32 %v629_v0  ;;  %v1326_v10 = vmul.f32 %v1294_v6, %v494_v34  ;;  %v1233_v5 = vsub.f32 0.0, %v1169_v14  ;;  %v1135_v51 = vmul.f32 %v4669_v31, %v975_v57 }
 0x186   : > { %v820_v46 = vadd.f32 1.4214138, %v788_v24  ;;  %v1042_v1 = vmul.f32 %v1010_v22, %v562_v25  ;;  %v495_v36 = vmul.f32 0.5, %v5501_v3  ;;  %v563_v11 = vand.u32 2147483647, %v5624_v2 }
 0x187   : > { %1415 = vst.msk [vmem:[#allocation2 + $0xd9] sm:$0xff] %vm1342_vm1, %v1326_v10  ;;  %v1265_v35 = vsel %vm1201_vm7, %v1233_v5, %v1169_v14  ;;  %v1167_v33 = vsub.f32 1.0, %v1135_v51  ;;  %vm1199_vm8 = vcmp.lt.f32.partialorder %v5510_v29, 0.0  ;;  %v5634_v48 = vmul.f32 0.70710677, %v5619_v59  ;;  %v5675_v14 = vpop.f32.mrf.mxu0 }
 0x188   : > { %v1297_v54 = vadd.f32 1.0, %v1265_v35  ;;  %v852_v40 = vmul.f32 %v5611_v19, %v820_v46  ;;  %v1013_v56 = vsub.f32 0.0, %v5607_v49  ;;  %v595_v44 = vmul.f32 0.3275911, %v563_v11 }
 0x189   : > { %v1231_v60 = vsub.f32 0.0, %v1167_v33  ;;  %v5637_v9 = vmul.f32 0.70710677, %v447_v26  ;;  %v1094_v3 = vmul.f32 1.442695, %v1042_v1  ;;  %v1011_v23 = vsub.f32 0.0, %v563_v11 }
 0x18a   : > { %v1329_v38 = vmul.f32 %v1297_v54, %v497_v55  ;;  %v884_v39 = vadd.f32 -0.28449672, %v852_v40  ;;  %v568_v25 = vand.u32 2147483647, %v5634_v48  ;;  %v627_v29 = vadd.f32 1.0, %v595_v44 }
 0x18b   : > { %v1263_v18 = vsel %vm1199_vm8, %v1231_v60, %v1167_v33  ;;  %v566_v58 = vand.u32 2147483647, %v5637_v9  ;;  %v5645_v37 = vmul.f32 0.5, %v5530_v17  ;;  %v5649_v52 = vmul.f32 0.5, %v5579_v7 }
 0x18c   : > { %1418 = vst.msk [vmem:[#allocation2 + $0xf9] sm:$0xff] %vm1342_vm1, %v1329_v38  ;;  %v1295_v8 = vadd.f32 1.0, %v1263_v18  ;;  %v916_v12 = vmul.f32 %v5611_v19, %v884_v39  ;;  %v600_v34 = vmul.f32 0.3275911, %v568_v25  ;;  %v1045_v41 = vmul.f32 %v1013_v56, %v5607_v49 }
 0x18d   : > { %4676 = vrcp.f32 %v627_v29  ;;  %v598_v32 = vmul.f32 0.3275911, %v566_v58  ;;  %v5653_v61 = vmul.f32 0.5, %v5591_v21  ;;  %vm1204_vm9 = vcmp.lt.f32.partialorder %v5539_v45, 0.0 }
 0x18e   : > { %v1327_v63 = vmul.f32 %v1295_v8, %v495_v36  ;;  %v948_v47 = vadd.f32 0.2548296, %v916_v12  ;;  %v632_v13 = vadd.f32 1.0, %v600_v34  ;;  %4678 = vpow2.f32 %v1094_v3 }
 0x18f   : > { %v5657_v17 = vpop.eup %4670  ;;  %v1043_v42 = vmul.f32 %v1011_v23, %v563_v11  ;;  %v1016_v7 = vsub.f32 0.0, %v568_v25  ;;  %v630_v30 = vadd.f32 1.0, %v598_v32  ;;  %v5664_v21 = vmul.f32 0.5, %v5609_v27 }
 0x190   : > { %1416 = vst.msk [vmem:[#allocation2 + $0xe1] sm:$0xff] %vm1342_vm1, %v1327_v63  ;;  %v980_v49 = vmul.f32 %v5611_v19, %v948_v47  ;;  %v722_v4 = vmul.f32 1.0614054, %v5657_v17  ;;  %4680 = vrcp.f32 %v632_v13  ;;  %v1100_v22 = vmul.f32 1.442695, %v1045_v41 }
 0x191   : > { %v4673_v15 = vpop.eup %4672  ;;  %4682 = vrcp.f32 %v630_v30  ;;  %v1014_v62 = vsub.f32 0.0, %v566_v58  ;;  %v5669_v50 = vmul.f32 0.70710677, %v5640_v20  ;;  %v5673_v19 = vmul.f32 0.5, %v5619_v59 }
 0x192   : > { %v5666_v53 = vpop.eup %4674  ;;  %v1140_v0 = vmul.f32 %v4673_v15, %v980_v49  ;;  %v754_v31 = vadd.f32 -1.4531521, %v722_v4  ;;  %v1096_v27 = vmul.f32 1.442695, %v1043_v42  ;;  %v1048_v57 = vmul.f32 %v1016_v7, %v568_v25 }
 0x193   : > { %v725_v6 = vmul.f32 1.0614054, %v5666_v53  ;;  %v5677_v24 = vmul.f32 0.5, %v447_v26  ;;  %v569_v10 = vand.u32 2147483647, %v5669_v50  ;;  %4684 = vpow2.f32 %v1100_v22 }
 0x194   : > { %v1172_v5 = vsub.f32 1.0, %v1140_v0  ;;  %v786_v51 = vmul.f32 %v5657_v17, %v754_v31  ;;  %v5682_v46 = vmul.f32 0.70710677, %v5655_v43  ;;  %v1046_v1 = vmul.f32 %v1014_v62, %v566_v58  ;;  %v4044_v62 = vld [vmem:[%s7778_s3 + $0x30] sm:$0xff]  ;;  %v4045_v0 = vld [vmem:[%s7778_s3 + $0x38] sm:$0xff] }
 0x195   : > { %v757_v55 = vadd.f32 -1.4531521, %v725_v6  ;;  %v601_v35 = vmul.f32 0.3275911, %v569_v10  ;;  %v5685_v59 = vmul.f32 0.70710677, %v5675_v14  ;;  %4686 = vpow2.f32 %v1096_v27 }
 0x196   : > { %v1236_v36 = vsub.f32 0.0, %v1172_v5  ;;  %v818_v33 = vadd.f32 1.4214138, %v786_v51  ;;  %v567_v11 = vand.u32 2147483647, %v5682_v46  ;;  %v1017_v18 = vsub.f32 0.0, %v569_v10 }
 0x197   : > { %v789_v26 = vmul.f32 %v5666_v53, %v757_v55  ;;  %v1106_v54 = vmul.f32 1.442695, %v1048_v57  ;;  %v633_v40 = vadd.f32 1.0, %v601_v35  ;;  %v572_v60 = vand.u32 2147483647, %v5685_v59  ;;  %v5718_v57 = vpop.f32.mrf.mxu0 }
 0x198   : > { %v1268_v56 = vsel %vm1204_vm9, %v1236_v36, %v1172_v5  ;;  %v850_v44 = vmul.f32 %v5657_v17, %v818_v33  ;;  %v599_v39 = vmul.f32 0.3275911, %v567_v11  ;;  %v1102_v25 = vmul.f32 1.442695, %v1046_v1 }
 0x199   : > { %v821_v38 = vadd.f32 1.4214138, %v789_v26  ;;  %v1300_v3 = vadd.f32 1.0, %v1268_v56  ;;  %4688 = vrcp.f32 %v633_v40  ;;  %v604_v12 = vmul.f32 0.3275911, %v572_v60 }
 0x19a   : > { %v5693_v29 = vpop.eup %4676  ;;  %v882_v23 = vadd.f32 -0.28449672, %v850_v44  ;;  %v631_v8 = vadd.f32 1.0, %v599_v39  ;;  %4690 = vpow2.f32 %v1106_v54  ;;  %v1015_v41 = vsub.f32 0.0, %v567_v11 }
 0x19b   : > { %v853_v58 = vmul.f32 %v5666_v53, %v821_v38  ;;  %v1332_v34 = vmul.f32 %v1300_v3, %v5645_v37  ;;  %v723_v45 = vmul.f32 1.0614054, %v5693_v29  ;;  %v4679_v32 = vpop.eup %4678  ;;  %v636_v13 = vadd.f32 1.0, %v604_v12 }
 0x19c   : > { %v914_v63 = vmul.f32 %v5657_v17, %v882_v23  ;;  %4692 = vrcp.f32 %v631_v8  ;;  %v5703_v30 = vmul.f32 0.5, %v5640_v20  ;;  %v1049_v37 = vmul.f32 %v1017_v18, %v569_v10 }
 0x19d   : > { %v885_v47 = vadd.f32 -0.28449672, %v853_v58  ;;  %v5699_v42 = vpop.eup %4680  ;;  %1421 = vst.msk [vmem:[#allocation2 + $0x121] sm:$0xff] %vm1342_vm1, %v1332_v34  ;;  %v755_v7 = vadd.f32 -1.4531521, %v723_v45  ;;  %4694 = vpow2.f32 %v1102_v25  ;;  %vm1202_vm10 = vcmp.lt.f32.partialorder %v5589_v28, 0.0 }
 0x19e   : > { %v5705_v15 = vpop.eup %4682  ;;  %v946_v49 = vadd.f32 0.2548296, %v914_v63  ;;  %v728_v22 = vmul.f32 1.0614054, %v5699_v42  ;;  %4696 = vrcp.f32 %v636_v13  ;;  %v1047_v6 = vmul.f32 %v1015_v41, %v567_v11 }
 0x19f   : > { %v917_v4 = vmul.f32 %v5666_v53, %v885_v47  ;;  %v787_v20 = vmul.f32 %v5693_v29, %v755_v7  ;;  %v726_v31 = vmul.f32 1.0614054, %v5705_v15  ;;  %v1020_v27 = vsub.f32 0.0, %v572_v60 }
 0x1a0   : > { %v978_v10 = vmul.f32 %v5657_v17, %v946_v49  ;;  %v760_v51 = vadd.f32 -1.4531521, %v728_v22  ;;  %v5722_v55 = vmul.f32 0.5, %v5655_v43  ;;  %vm1205_vm11 = vcmp.lt.f32.partialorder %v5601_v16, 0.0  ;;  %v4685_v26 = vpop.eup %4684 }
 0x1a1   : > { %v949_v5 = vadd.f32 0.2548296, %v917_v4  ;;  %v819_v1 = vadd.f32 1.4214138, %v787_v20  ;;  %v758_v35 = vadd.f32 -1.4531521, %v726_v31  ;;  %v4049_v33 = vpack.c.bf16 %v4045_v0, %v4044_v62 }
 0x1a2   : > { %v1108_v36 = vmul.f32 1.442695, %v1049_v37  ;;  %v1138_v54 = vmul.f32 %v4679_v32, %v978_v10  ;;  %v792_v40 = vmul.f32 %v5699_v42, %v760_v51  ;;  %v5728_v56 = vmul.f32 0.70710677, %v5718_v57  ;;  %v4687_v39 = vpop.eup %4686 }
 0x1a3   : > { %v981_v11 = vmul.f32 %v5666_v53, %v949_v5  ;;  %v851_v17 = vmul.f32 %v5693_v29, %v819_v1  ;;  %v790_v43 = vmul.f32 %v5705_v15, %v758_v35  ;;  %v1104_v44 = vmul.f32 1.442695, %v1047_v6  ;;  %4497 = vmatprep.subr.bf16.mxu1 %v4049_v33 }
 0x1a4   : > { %v1052_v38 = vmul.f32 %v1020_v27, %v572_v60  ;;  %v1170_v3 = vsub.f32 1.0, %v1138_v54  ;;  %v824_v18 = vadd.f32 1.4214138, %v792_v40  ;;  %v5733_v23 = vand.u32 2147483647, %v5728_v56  ;;  %4498 = vmatpush3.bf16.msra.mxu1 %v4049_v33 }
 0x1a5   : > { %v1141_v25 = vmul.f32 %v4685_v26, %v981_v11  ;;  %v883_v53 = vadd.f32 -0.28449672, %v851_v17  ;;  %v822_v58 = vadd.f32 1.4214138, %v790_v43  ;;  %4698 = vpow2.f32 %v1108_v36  ;;  %v5761_v11 = vpop.f32.mrf.mxu0 }
 0x1a6   : > { %v5736_v8 = vmul.f32 0.5, %v5675_v14  ;;  %v5738_v12 = vpop.eup %4688  ;;  %v1234_v34 = vsub.f32 0.0, %v1170_v3  ;;  %v856_v60 = vmul.f32 %v5699_v42, %v824_v18  ;;  %v602_v41 = vmul.f32 0.3275911, %v5733_v23 }
 0x1a7   : > { %v1173_v45 = vsub.f32 1.0, %v1141_v25  ;;  %v915_v32 = vmul.f32 %v5693_v29, %v883_v53  ;;  %v854_v63 = vmul.f32 %v5705_v15, %v822_v58  ;;  %v729_v47 = vmul.f32 1.0614054, %v5738_v12  ;;  %v4691_v13 = vpop.eup %4690 }
 0x1a8   : > { %4700 = vpow2.f32 %v1104_v44  ;;  %v1266_v14 = vsel %vm1202_vm10, %v1234_v34, %v1170_v3  ;;  %v888_v37 = vadd.f32 -0.28449672, %v856_v60  ;;  %v1114_v49 = vmul.f32 1.442695, %v1052_v38 }
 0x1a9   : > { %v1237_v7 = vsub.f32 0.0, %v1173_v45  ;;  %v5747_v4 = vpop.eup %4692  ;;  %v1298_v22 = vadd.f32 1.0, %v1266_v14  ;;  %v947_v62 = vadd.f32 0.2548296, %v915_v32  ;;  %v886_v0 = vadd.f32 -0.28449672, %v854_v63 }
 0x1aa   : > { %v634_v20 = vadd.f32 1.0, %v602_v41  ;;  %v4695_v31 = vpop.eup %4694  ;;  %vm1203_vm12 = vcmp.lt.f32.partialorder %v5624_v2, 0.0  ;;  %v920_v27 = vmul.f32 %v5699_v42, %v888_v37  ;;  %v761_v10 = vadd.f32 -1.4531521, %v729_v47 }
 0x1ab   : > { %v1269_v6 = vsel %vm1205_vm11, %v1237_v7, %v1173_v45  ;;  %v727_v28 = vmul.f32 1.0614054, %v5747_v4  ;;  %v5754_v5 = vpop.eup %4696  ;;  %v1330_v51 = vmul.f32 %v1298_v22, %v5649_v52  ;;  %v979_v35 = vmul.f32 %v5693_v29, %v947_v62 }
 0x1ac   : > { %v1301_v1 = vadd.f32 1.0, %v1269_v6  ;;  %v918_v36 = vmul.f32 %v5705_v15, %v886_v0  ;;  %v952_v33 = vadd.f32 0.2548296, %v920_v27  ;;  %v793_v16 = vmul.f32 %v5738_v12, %v761_v10 }
 0x1ad   : > { %v759_v26 = vadd.f32 -1.4531521, %v727_v28  ;;  %v732_v54 = vmul.f32 1.0614054, %v5754_v5  ;;  %1419 = vst.msk [vmem:[#allocation2 + $0x109] sm:$0xff] %vm1342_vm1, %v1330_v51  ;;  %v1139_v17 = vmul.f32 %v4687_v39, %v979_v35  ;;  %vm1208_vm13 = vcmp.lt.f32.partialorder %v5634_v48, 0.0 }
 0x1ae   : > { %v1333_v40 = vmul.f32 %v1301_v1, %v5653_v61  ;;  %v950_v52 = vadd.f32 0.2548296, %v918_v36  ;;  %4702 = vrcp.f32 %v634_v20  ;;  %v984_v29 = vmul.f32 %v5699_v42, %v952_v33  ;;  %v466_v1 = vpop.f32.mrf.mxu0 }
 0x1af   : > { %vm1206_vm14 = vcmp.lt.f32.partialorder %v5637_v9, 0.0  ;;  %v825_v43 = vadd.f32 1.4214138, %v793_v16  ;;  %v791_v44 = vmul.f32 %v5747_v4, %v759_v26  ;;  %v764_v38 = vadd.f32 -1.4531521, %v732_v54  ;;  %v4042_v26 = vld [vmem:[%s7778_s3 + $0x20] sm:$0xff] }
 0x1b0   : > { %1422 = vst.msk [vmem:[#allocation2 + $0x129] sm:$0xff] %vm1342_vm1, %v1333_v40  ;;  %v1171_v3 = vsub.f32 1.0, %v1139_v17  ;;  %v982_v25 = vmul.f32 %v5705_v15, %v950_v52  ;;  %4704 = vpow2.f32 %v1114_v49  ;;  %v5772_v61 = vmul.f32 0.70710677, %v5761_v11  ;;  %v4043_v9 = vld [vmem:[%s7778_s3 + $0x28] sm:$0xff]  ;;  %v4040_v52 = vld [vmem:[%s7778_s3 + $0x10] sm:$0xff] }
 0x1b1   : > { %v1144_v39 = vmul.f32 %v4691_v13, %v984_v29  ;;  %v857_v18 = vmul.f32 %v5738_v12, %v825_v43  ;;  %v823_v53 = vadd.f32 1.4214138, %v791_v44  ;;  %v796_v42 = vmul.f32 %v5754_v5, %v764_v38  ;;  %v4041_v29 = vld [vmem:[%s7778_s3 + $0x18] sm:$0xff] }
 0x1b2   : > { %v1235_v58 = vsub.f32 0.0, %v1171_v3  ;;  %v1142_v34 = vmul.f32 %v4695_v31, %v982_v25  ;;  %v1018_v45 = vsub.f32 0.0, %v5733_v23  ;;  %v573_v60 = vand.u32 2147483647, %v5772_v61  ;;  %v4699_v41 = vpop.eup %4698 }
 0x1b3   : > { %v1176_v32 = vsub.f32 1.0, %v1144_v39  ;;  %v889_v63 = vadd.f32 -0.28449672, %v857_v18  ;;  %v855_v15 = vmul.f32 %v5747_v4, %v823_v53  ;;  %v828_v47 = vadd.f32 1.4214138, %v796_v42 }
 0x1b4   : > { %v1267_v13 = vsel %vm1203_vm12, %v1235_v58, %v1171_v3  ;;  %v1174_v14 = vsub.f32 1.0, %v1142_v34  ;;  %v5782_v7 = vmul.f32 0.5, %v5718_v57  ;;  %v605_v37 = vmul.f32 0.3275911, %v573_v60 }
 0x1b5   : > { %v4701_v49 = vpop.eup %4700  ;;  %v1299_v22 = vadd.f32 1.0, %v1267_v13  ;;  %v1240_v62 = vsub.f32 0.0, %v1176_v32  ;;  %v921_v0 = vmul.f32 %v5738_v12, %v889_v63  ;;  %v887_v20 = vadd.f32 -0.28449672, %v855_v15 }
 0x1b6   : > { %v1238_v31 = vsub.f32 0.0, %v1174_v14  ;;  %v860_v6 = vmul.f32 %v5754_v5, %v828_v47  ;;  %v1050_v27 = vmul.f32 %v1018_v45, %v5733_v23  ;;  %v637_v10 = vadd.f32 1.0, %v605_v37 }
 0x1b7   : > { %v1331_v2 = vmul.f32 %v1299_v22, %v5664_v21  ;;  %v1272_v28 = vsel %vm1208_vm13, %v1240_v62, %v1176_v32  ;;  %v953_v57 = vadd.f32 0.2548296, %v921_v0  ;;  %v919_v51 = vmul.f32 %v5747_v4, %v887_v20 }
 0x1b8   : > { %v1304_v35 = vadd.f32 1.0, %v1272_v28  ;;  %v1270_v36 = vsel %vm1206_vm14, %v1238_v31, %v1174_v14  ;;  %vm1209_vm15 = vcmp.lt.f32.partialorder %v5669_v50, 0.0  ;;  %v892_v33 = vadd.f32 -0.28449672, %v860_v6  ;;  %v1485_v6 = vld [vmem:[%s7777_s2] sm:$0x7] }
 0x1b9   : > { %4706 = vrcp.f32 %v637_v10  ;;  %1420 = vst.msk [vmem:[#allocation2 + $0x111] sm:$0xff] %vm1342_vm1, %v1331_v2  ;;  %v1302_v23 = vadd.f32 1.0, %v1270_v36  ;;  %v985_v21 = vmul.f32 %v5738_v12, %v953_v57  ;;  %v951_v16 = vadd.f32 0.2548296, %v919_v51 }
 0x1ba   : > { %v1021_v48 = vsub.f32 0.0, %v573_v60  ;;  %v1336_v54 = vmul.f32 %v1304_v35, %v5673_v19  ;;  %vm1207_vm2 = vcmp.lt.f32.partialorder %v5682_v46, 0.0  ;;  %v924_v40 = vmul.f32 %v5754_v5, %v892_v33  ;;  %v1431_v35 = vld [vmem:[#allocation2] sm:$0xff]  ;;  %v1432_v33 = vld [vmem:[#allocation2 + $0x8] sm:$0xff] }
 0x1bb   : > { %v5806_v17 = vmul.f32 0.5, %v5761_v11  ;;  %v5808_v12 = vmul.f32 0.70710677, %v466_v1  ;;  %v5816_v43 = vpop.eup %4702  ;;  %v1334_v19 = vmul.f32 %v1302_v23, %v5677_v24  ;;  %v1145_v44 = vmul.f32 %v4699_v41, %v985_v21  ;;  %v1433_v23 = vld [vmem:[#allocation2 + $0x10] sm:$0x3] }
 0x1bc   : > { %v983_v38 = vmul.f32 %v5747_v4, %v951_v16  ;;  %v1110_v3 = vmul.f32 1.442695, %v1050_v27  ;;  %1425 = vst.msk [vmem:[#allocation2 + $0x151] sm:$0xff] %vm1342_vm1, %v1336_v54  ;;  %v956_v11 = vadd.f32 0.2548296, %v924_v40  ;;  %v4048_v18 = vpack.c.bf16 %v4043_v9, %v4042_v26 }
 0x1bd   : > { %v730_v25 = vmul.f32 1.0614054, %v5816_v43  ;;  %v571_v39 = vand.u32 2147483647, %v5808_v12  ;;  %v4705_v53 = vpop.eup %4704  ;;  %1423 = vst.msk [vmem:[#allocation2 + $0x139] sm:$0xff] %vm1342_vm1, %v1334_v19  ;;  %v1177_v42 = vsub.f32 1.0, %v1145_v44  ;;  %v1053_v24 = vmul.f32 %v1021_v48, %v573_v60 }
 0x1be   : > { %v1143_v58 = vmul.f32 %v4701_v49, %v983_v38  ;;  %vm1212_vm3 = vcmp.lt.f32.partialorder %v5685_v59, 0.0  ;;  %v4047_v34 = vpack.c.bf16 %v4041_v29, %v4040_v52  ;;  %v988_v4 = vmul.f32 %v5754_v5, %v956_v11  ;;  %4499 = vmatprep.subr.bf16.mxu1 %v4048_v18  ;;  %v5860_v44 = vld [vmem:[#allocation2 + $0x28] sm:$0x3] }
 0x1bf   : > { %v762_v45 = vadd.f32 -1.4531521, %v730_v25  ;;  %v5826_v41 = vmul.f32 0.5, %v466_v1  ;;  %v603_v32 = vmul.f32 0.3275911, %v571_v39  ;;  %v1241_v63 = vsub.f32 0.0, %v1177_v42  ;;  %4500 = vmatpush3.bf16.msra.mxu1 %v4048_v18 }
 0x1c0   : > { %v1175_v15 = vsub.f32 1.0, %v1143_v58  ;;  %v1019_v47 = vsub.f32 0.0, %v571_v39  ;;  %v1488_v13 = vlaneseq  ;;  %v1148_v14 = vmul.f32 %v4705_v53, %v988_v4  ;;  %4501 = vmatprep.subr.bf16.mxu1 %v4047_v34  ;;  %v5870_v53 = vld [vmem:[#allocation2 + $0x40] sm:$0x3] }
 0x1c1   : > { %v794_v37 = vmul.f32 %v5816_v43, %v762_v45  ;;  %4708 = vpow2.f32 %v1110_v3  ;;  %v635_v49 = vadd.f32 1.0, %v603_v32  ;;  %v1273_v60 = vsel %vm1209_vm15, %v1241_v63, %v1177_v42  ;;  %v1486_v3 = vld [vmem:[%s7777_s2 + $0x4] sm:$0x7]  ;;  %v5883_v32 = vld [vmem:[#allocation2 + $0x18] sm:$0xff] }
 0x1c2   : > { %v1239_v5 = vsub.f32 0.0, %v1175_v15  ;;  %v1116_v22 = vmul.f32 1.442695, %v1053_v24  ;;  %v1489_v62 = vshrl.u32 %v1488_v13, 7  ;;  %v1305_v0 = vadd.f32 1.0, %v1273_v60 }
 0x1c3   : > { %v1180_v20 = vsub.f32 1.0, %v1148_v14  ;;  %v826_v31 = vadd.f32 1.4214138, %v794_v37  ;;  %4710 = vrcp.f32 %v635_v49  ;;  %v1051_v10 = vmul.f32 %v1019_v47, %v571_v39  ;;  %4502 = vmatpush3.bf16.msra.mxu1 %v4047_v34 }
 0x1c4   : > { %v1271_v27 = vsel %vm1207_vm2, %v1239_v5, %v1175_v15  ;;  %v5836_v2 = vsub.s32 0, %v1489_v62  ;;  %v5838_v50 = vsub.s32 1, %v1489_v62  ;;  %v1337_v28 = vmul.f32 %v1305_v0, %v5703_v30  ;;  %v5897_v5 = vld [vmem:[#allocation2 + $0x20] sm:$0xff] }
 0x1c5   : > { %v1303_v57 = vadd.f32 1.0, %v1271_v27  ;;  %v1244_v51 = vsub.f32 0.0, %v1180_v20  ;;  %v858_v1 = vmul.f32 %v5816_v43, %v826_v31  ;;  %4712 = vpow2.f32 %v1116_v22 }
 0x1c6   : > { %v5842_v36 = vpop.eup %4706  ;;  %v5845_v46 = vrot.slane %v1485_v6, %v5836_v2  ;;  %v5848_v21 = vrot.slane %v1485_v6, %v5838_v50  ;;  %vm1656_vm4 = vcmask 1046528   ;;  %1426 = vst.msk [vmem:[#allocation2 + $0x159] sm:$0xff] %vm1342_vm1, %v1337_v28  ;;  %v1112_v54 = vmul.f32 1.442695, %v1051_v10 }
 0x1c7   : > { %v1335_v30 = vmul.f32 %v1303_v57, %v5722_v55  ;;  %v1276_v16 = vsel %vm1212_vm3, %v1244_v51, %v1180_v20  ;;  %v890_v48 = vadd.f32 -0.28449672, %v858_v1  ;;  %v733_v26 = vmul.f32 1.0614054, %v5842_v36 }
 0x1c8   : > { %v1308_v9 = vadd.f32 1.0, %v1276_v16  ;;  %v1560_v40 = vmul.f32 %v5848_v21, %v1431_v35  ;;  %v5856_v52 = vsub.s32 2, %v1489_v62  ;;  %v1561_v55 = vmul.f32 %v5848_v21, %v1432_v33 }
 0x1c9   : > { %1424 = vst.msk [vmem:[#allocation2 + $0x141] sm:$0xff] %vm1342_vm1, %v1335_v30  ;;  %v922_v29 = vmul.f32 %v5816_v43, %v890_v48  ;;  %v765_v19 = vadd.f32 -1.4531521, %v733_v26  ;;  %v1562_v59 = vmul.f32 %v5848_v21, %v1433_v23  ;;  %v1492_v11 = vmul.f32 %v5845_v46, %v1431_v35 }
 0x1ca   : > { %v1340_v38 = vmul.f32 %v1308_v9, %v5736_v8  ;;  %v1657_v25 = vrot.slane %v1560_v40, 1  ;;  %vm1901_vm5 = vcmask 1045504   ;;  %v1658_v42 = vrot.slane %v1561_v55, 1 }
 0x1cb   : > { %v954_v39 = vadd.f32 0.2548296, %v922_v29  ;;  %v797_v18 = vmul.f32 %v5842_v36, %v765_v19  ;;  %v1660_v58 = vrot.slane %v1562_v59, 1  ;;  %vm1210_vm6 = vcmp.lt.f32.partialorder %v5728_v56, 0.0 }
 0x1cc   : > { %1429 = vst.msk [vmem:[#allocation2 + $0x181] sm:$0xff] %vm1342_vm1, %v1340_v38  ;;  %4714 = vpow2.f32 %v1112_v54  ;;  %v1493_v8 = vmul.f32 %v5845_v46, %v1432_v33  ;;  %v5877_v24 = vmul.f32 %v5848_v21, %v5860_v44  ;;  %v5880_v34 = vrot.slane %v1485_v6, %v5856_v52 }
 0x1cd   : > { %v986_v4 = vmul.f32 %v5816_v43, %v954_v39  ;;  %v829_v45 = vadd.f32 1.4214138, %v797_v18  ;;  %v1659_v63 = vsel %vm1656_vm4, %v1657_v25, %v1658_v42  ;;  %v1661_v15 = vsel %vm1656_vm4, %v1658_v42, %v1660_v58 }
 0x1ce   : > { %v4709_v47 = vpop.eup %4708  ;;  %v5889_v13 = vmul.f32 %v5848_v21, %v5870_v53  ;;  %v1805_v14 = vmul.f32 %v5880_v34, %v1431_v35  ;;  %v1806_v37 = vmul.f32 %v5880_v34, %v1432_v33  ;;  %v5894_v49 = vrot.slane %v1486_v3, %v5836_v2 }
 0x1cf   : > { %v1146_v43 = vmul.f32 %v4709_v47, %v986_v4  ;;  %v861_v60 = vmul.f32 %v5842_v36, %v829_v45  ;;  %v1769_v22 = vadd.f32 %v1659_v63, %v1492_v11  ;;  %v1807_v62 = vmul.f32 %v5880_v34, %v1433_v23  ;;  %v1487_v45 = vld [vmem:[%s7777_s2 + $0x8] sm:$0x7] }
 0x1d0   : > { %v5900_v0 = vpop.eup %4710  ;;  %v1770_v20 = vadd.f32 %v1661_v15, %v1493_v8  ;;  %v1902_v31 = vrot.slane %v1805_v14, 2  ;;  %v1903_v6 = vrot.slane %v1806_v37, 2  ;;  %v2050_v27 = vmul.f32 %v5894_v49, %v5883_v32 }
 0x1d1   : > { %v1178_v10 = vsub.f32 1.0, %v1146_v43  ;;  %v893_v28 = vadd.f32 -0.28449672, %v861_v60  ;;  %v731_v57 = vmul.f32 1.0614054, %v5900_v0  ;;  %v1905_v51 = vrot.slane %v1807_v62, 2 }
 0x1d2   : > { %v1904_v1 = vsel %vm1901_vm5, %v1902_v31, %v1903_v6  ;;  %v2051_v35 = vmul.f32 %v5894_v49, %v5897_v5  ;;  %v5909_v33 = vrot.slane %v1486_v3, %v5838_v50  ;;  %v5912_v23 = vrot.slane %v1486_v3, %v5856_v52  ;;  %v4713_v30 = vpop.eup %4712  ;;  %v4038_v60 = vld [vmem:[%s7778_s3] sm:$0xff] }
 0x1d3   : > { %v1242_v16 = vsub.f32 0.0, %v1178_v10  ;;  %v925_v48 = vmul.f32 %v5842_v36, %v893_v28  ;;  %v763_v26 = vadd.f32 -1.4531521, %v731_v57  ;;  %v1906_v9 = vsel %vm1901_vm5, %v1903_v6, %v1905_v51  ;;  %v5947_v28 = vld [vmem:[#allocation2 + $0x30] sm:$0xff]  ;;  %v5949_v57 = vld [vmem:[#allocation2 + $0x38] sm:$0xff] }
 0x1d4   : > { %v2014_v54 = vadd.f32 %v1904_v1, %v1769_v22  ;;  %v2015_v40 = vadd.f32 %v1906_v9, %v1770_v20  ;;  %v2118_v29 = vmul.f32 %v5909_v33, %v5883_v32  ;;  %v2119_v19 = vmul.f32 %v5909_v33, %v5897_v5  ;;  %v4039_v22 = vld [vmem:[%s7778_s3 + $0x8] sm:$0xff] }
 0x1d5   : > { %v1274_v55 = vsel %vm1210_vm6, %v1242_v16, %v1178_v10  ;;  %v957_v59 = vadd.f32 0.2548296, %v925_v48  ;;  %v795_v38 = vmul.f32 %v5900_v0, %v763_v26  ;;  %v2120_v3 = vmul.f32 %v5909_v33, %v5860_v44 }
 0x1d6   : > { %v1306_v11 = vadd.f32 1.0, %v1274_v55  ;;  %vm1213_vm7 = vcmp.lt.f32.partialorder %v5772_v61, 0.0  ;;  %v2082_v25 = vadd.f32 %v2050_v27, %v2014_v54  ;;  %v2083_v39 = vadd.f32 %v2051_v35, %v2015_v40 }
 0x1d7   : > { %v2214_v18 = vrot.slane %v2118_v29, 1  ;;  %v989_v42 = vmul.f32 %v5842_v36, %v957_v59  ;;  %v827_v58 = vadd.f32 1.4214138, %v795_v38  ;;  %v2215_v8 = vrot.slane %v2119_v19, 1 }
 0x1d8   : > { %v2217_v4 = vrot.slane %v2120_v3, 1  ;;  %v1338_v56 = vmul.f32 %v1306_v11, %v5782_v7  ;;  %v2362_v63 = vmul.f32 %v5912_v23, %v5883_v32  ;;  %v2363_v15 = vmul.f32 %v5912_v23, %v5897_v5 }
 0x1d9   : > { %v2364_v47 = vmul.f32 %v5912_v23, %v5860_v44  ;;  %v4715_v14 = vpop.eup %4714  ;;  %v1149_v36 = vmul.f32 %v4713_v30, %v989_v42  ;;  %v859_v37 = vmul.f32 %v5900_v0, %v827_v58  ;;  %v2216_v43 = vsel %vm1656_vm4, %v2214_v18, %v2215_v8 }
 0x1da   : > { %v2218_v7 = vsel %vm1656_vm4, %v2215_v8, %v2217_v4  ;;  %1427 = vst.msk [vmem:[#allocation2 + $0x169] sm:$0xff] %vm1342_vm1, %v1338_v56  ;;  %v2326_v62 = vadd.f32 %v2216_v43, %v2082_v25  ;;  %v2458_v31 = vrot.slane %v2362_v63, 2  ;;  %v2459_v6 = vrot.slane %v2363_v15, 2 }
 0x1db   : > { %v2327_v20 = vadd.f32 %v2218_v7, %v2083_v39  ;;  %v1181_v27 = vsub.f32 1.0, %v1149_v36  ;;  %v891_v10 = vadd.f32 -0.28449672, %v859_v37  ;;  %v2461_v51 = vrot.slane %v2364_v47, 2 }
 0x1dc   : > { %v5952_v1 = vrot.slane %v1487_v45, %v5836_v2  ;;  %v2460_v35 = vsel %vm1901_vm5, %v2458_v31, %v2459_v6  ;;  %v5956_v30 = vrot.slane %v1487_v45, %v5838_v50  ;;  %v5959_v16 = vrot.slane %v1487_v45, %v5856_v52 }
 0x1dd   : > { %v4046_v48 = vpack.c.bf16 %v4039_v22, %v4038_v60  ;;  %v1245_v26 = vsub.f32 0.0, %v1181_v27  ;;  %v923_v9 = vmul.f32 %v5900_v0, %v891_v10  ;;  %v2462_v54 = vsel %vm1901_vm5, %v2459_v6, %v2461_v51 }
 0x1de   : > { %v2570_v40 = vadd.f32 %v2460_v35, %v2326_v62  ;;  %v2571_v29 = vadd.f32 %v2462_v54, %v2327_v20  ;;  %v2606_v2 = vmul.f32 %v5952_v1, %v5947_v28  ;;  %v2607_v19 = vmul.f32 %v5952_v1, %v5949_v57 }
 0x1df   : > { %v2674_v50 = vmul.f32 %v5956_v30, %v5947_v28  ;;  %4503 = vmatprep.subr.bf16.mxu1 %v4046_v48  ;;  %v1277_v52 = vsel %vm1213_vm7, %v1245_v26, %v1181_v27  ;;  %v955_v55 = vadd.f32 0.2548296, %v923_v9  ;;  %v2675_v59 = vmul.f32 %v5956_v30, %v5949_v57 }
 0x1e0   : > { %v2676_v38 = vmul.f32 %v5956_v30, %v5870_v53  ;;  %4504 = vmatpush3.bf16.msra.mxu1 %v4046_v48  ;;  %v1309_v3 = vadd.f32 1.0, %v1277_v52  ;;  %vm1211_vm8 = vcmp.lt.f32.partialorder %v5808_v12, 0.0  ;;  %v2638_v11 = vadd.f32 %v2606_v2, %v2570_v40 }
 0x1e1   : > { %v2639_v25 = vadd.f32 %v2607_v19, %v2571_v29  ;;  %v2770_v39 = vrot.slane %v2674_v50, 1  ;;  %v987_v18 = vmul.f32 %v5900_v0, %v955_v55  ;;  %v2771_v42 = vrot.slane %v2675_v59, 1 }
 0x1e2   : > { %v2773_v58 = vrot.slane %v2676_v38, 1  ;;  %v2918_v61 = vmul.f32 %v5959_v16, %v5947_v28  ;;  %v1341_v8 = vmul.f32 %v1309_v3, %v5806_v17  ;;  %v1810_v4 = vmul.f32 %v5880_v34, %v5860_v44 }
 0x1e3   : > { %v2919_v56 = vmul.f32 %v5959_v16, %v5949_v57  ;;  %v2920_v45 = vmul.f32 %v5959_v16, %v5870_v53  ;;  %v1147_v63 = vmul.f32 %v4715_v14, %v987_v18  ;;  %v2772_v15 = vsel %vm1656_vm4, %v2770_v39, %v2771_v42 }
 0x1e4   : > { %v2774_v0 = vsel %vm1656_vm4, %v2771_v42, %v2773_v58  ;;  %v3014_v47 = vrot.slane %v2918_v61, 2  ;;  %1430 = vst.msk [vmem:[#allocation2 + $0x189] sm:$0xff] %vm1342_vm1, %v1341_v8  ;;  %v2882_v36 = vadd.f32 %v2772_v15, %v2638_v11  ;;  %v1665_v44 = vrot.slane %v5877_v24, 1 }
 0x1e5   : > { %v2883_v37 = vadd.f32 %v2774_v0, %v2639_v25  ;;  %v3015_v17 = vrot.slane %v2919_v56, 2  ;;  %v3017_v43 = vrot.slane %v2920_v45, 2  ;;  %v1179_v7 = vsub.f32 1.0, %v1147_v63 }
 0x1e6   : > { %v1563_v60 = vmul.f32 %v5848_v21, %v5883_v32  ;;  %v1564_v14 = vmul.f32 %v5848_v21, %v5897_v5  ;;  %v1808_v20 = vmul.f32 %v5880_v34, %v5883_v32  ;;  %v1809_v31 = vmul.f32 %v5880_v34, %v5897_v5 }
 0x1e7   : > { %v3016_v22 = vsel %vm1901_vm5, %v3014_v47, %v3015_v17  ;;  %v3018_v62 = vsel %vm1901_vm5, %v3015_v17, %v3017_v43  ;;  %v1243_v6 = vsub.f32 0.0, %v1179_v7  ;;  %v1910_v27 = vrot.slane %v1810_v4, 2 }
 0x1e8   : > { %v3126_v10 = vadd.f32 %v3016_v22, %v2882_v36  ;;  %v6000_v24 = vadd.f32 %v3018_v62, %v2883_v37  ;;  %v1494_v51 = vmul.f32 %v5845_v46, %v5883_v32  ;;  %v1662_v35 = vrot.slane %v1563_v60, 1  ;;  %v6038_v60 = vld [vmem:[#allocation2 + $0x50] sm:$0xff] }
 0x1e9   : > { %v1663_v48 = vrot.slane %v1564_v14, 1  ;;  %v1908_v26 = vrot.slane %v1809_v31, 2  ;;  %v1275_v9 = vsel %vm1211_vm8, %v1243_v6, %v1179_v7  ;;  %v1495_v40 = vmul.f32 %v5845_v46, %v5897_v5  ;;  %v6044_v6 = vld [vmem:[#allocation2 + $0x58] sm:$0x3] }
 0x1ea   : > { %v6006_v54 = vmul.f32 0.70710677, %v3126_v10  ;;  %v1907_v29 = vrot.slane %v1808_v20, 2  ;;  %v1307_v2 = vadd.f32 1.0, %v1275_v9  ;;  %v6011_v19 = vmul.f32 0.70710677, %v6000_v24 }
 0x1eb   : > { %v1664_v50 = vsel %vm1656_vm4, %v1662_v35, %v1663_v48  ;;  %v1666_v32 = vsel %vm1656_vm4, %v1663_v48, %v1665_v44  ;;  %v1911_v25 = vsel %vm1901_vm5, %v1908_v26, %v1910_v27  ;;  %v1670_v18 = vrot.slane %v5889_v13, 1  ;;  %v6036_v44 = vld [vmem:[#allocation2 + $0x48] sm:$0xff] }
 0x1ec   : > { %v3222_v52 = vand.u32 2147483647, %v6006_v54  ;;  %v1771_v55 = vadd.f32 %v1664_v50, %v1494_v51  ;;  %v1772_v59 = vadd.f32 %v1666_v32, %v1495_v40  ;;  %v1339_v12 = vmul.f32 %v1307_v2, %v5826_v41 }
 0x1ed   : > { %v3223_v38 = vand.u32 2147483647, %v6011_v19  ;;  %v1909_v3 = vsel %vm1901_vm5, %v1907_v29, %v1908_v26  ;;  %v2052_v8 = vmul.f32 %v5894_v49, %v5947_v28  ;;  %v2053_v41 = vmul.f32 %v5894_v49, %v5949_v57 }
 0x1ee   : > { %v3254_v5 = vmul.f32 0.3275911, %v3222_v52  ;;  %v3670_v11 = vsub.f32 0.0, %v3222_v52  ;;  %v2016_v39 = vadd.f32 %v1909_v3, %v1771_v55  ;;  %1428 = vst.msk [vmem:[#allocation2 + $0x171] sm:$0xff] %vm1342_vm1, %v1339_v12  ;;  %v2017_v58 = vadd.f32 %v1911_v25, %v1772_v59 }
 0x1ef   : > { %v3255_v42 = vmul.f32 0.3275911, %v3223_v38  ;;  %v2121_v4 = vmul.f32 %v5909_v33, %v5947_v28  ;;  %v3671_v45 = vsub.f32 0.0, %v3223_v38  ;;  %v2122_v15 = vmul.f32 %v5909_v33, %v5949_v57 }
 0x1f0   : > { %v3286_v61 = vadd.f32 1.0, %v3254_v5  ;;  %v3702_v63 = vmul.f32 %v3670_v11, %v3222_v52  ;;  %v2084_v0 = vadd.f32 %v2052_v8, %v2016_v39  ;;  %v2085_v47 = vadd.f32 %v2053_v41, %v2017_v58 }
 0x1f1   : > { %v3287_v56 = vadd.f32 1.0, %v3255_v42  ;;  %v2123_v36 = vmul.f32 %v5909_v33, %v5870_v53  ;;  %v2219_v37 = vrot.slane %v2121_v4, 1  ;;  %v2220_v17 = vrot.slane %v2122_v15, 1 }
 0x1f2   : > { %4716 = vrcp.f32 %v3286_v61  ;;  %v2365_v43 = vmul.f32 %v5912_v23, %v5947_v28  ;;  %v6034_v7 = vmul.f32 0.5, %v3126_v10  ;;  %v2366_v22 = vmul.f32 %v5912_v23, %v5949_v57 }
 0x1f3   : > { %4718 = vrcp.f32 %v3287_v56  ;;  %v2222_v14 = vrot.slane %v2123_v36, 1  ;;  %v2367_v62 = vmul.f32 %v5912_v23, %v5870_v53  ;;  %v3703_v20 = vmul.f32 %v3671_v45, %v3223_v38 }
 0x1f4   : > { %v3734_v31 = vmul.f32 1.442695, %v3702_v63  ;;  %v2221_v27 = vsel %vm1656_vm4, %v2219_v37, %v2220_v17  ;;  %v2463_v51 = vrot.slane %v2365_v43, 2  ;;  %v2464_v48 = vrot.slane %v2366_v22, 2 }
 0x1f5   : > { %v2223_v10 = vsel %vm1656_vm4, %v2220_v17, %v2222_v14  ;;  %v2328_v35 = vadd.f32 %v2221_v27, %v2084_v0  ;;  %v2466_v26 = vrot.slane %v2367_v62, 2  ;;  %v2608_v40 = vmul.f32 %v5952_v1, %v6036_v44 }
 0x1f6   : > { %v2329_v9 = vadd.f32 %v2223_v10, %v2085_v47  ;;  %v2677_v29 = vmul.f32 %v5956_v30, %v6036_v44  ;;  %v2678_v2 = vmul.f32 %v5956_v30, %v6038_v60  ;;  %v2465_v50 = vsel %vm1901_vm5, %v2463_v51, %v2464_v48 }
 0x1f7   : > { %v2467_v32 = vsel %vm1901_vm5, %v2464_v48, %v2466_v26  ;;  %v2679_v52 = vmul.f32 %v5956_v30, %v6044_v6  ;;  %v2921_v55 = vmul.f32 %v5959_v16, %v6036_v44  ;;  %v2572_v59 = vadd.f32 %v2465_v50, %v2328_v35 }
 0x1f8   : > { %v2573_v12 = vadd.f32 %v2467_v32, %v2329_v9  ;;  %v2609_v38 = vmul.f32 %v5952_v1, %v6038_v60  ;;  %v2776_v3 = vrot.slane %v2678_v2, 1  ;;  %v2775_v5 = vrot.slane %v2677_v29, 1 }
 0x1f9   : > { %v2778_v11 = vrot.slane %v2679_v52, 1  ;;  %v2922_v25 = vmul.f32 %v5959_v16, %v6038_v60  ;;  %v2923_v39 = vmul.f32 %v5959_v16, %v6044_v6  ;;  %v3736_v42 = vmul.f32 1.442695, %v3703_v20 }
 0x1fa   : > { %v2640_v58 = vadd.f32 %v2608_v40, %v2572_v59  ;;  %v2641_v61 = vadd.f32 %v2609_v38, %v2573_v12  ;;  %v3019_v8 = vrot.slane %v2921_v55, 2  ;;  %v2777_v41 = vsel %vm1656_vm4, %v2775_v5, %v2776_v3 }
 0x1fb   : > { %v2779_v4 = vsel %vm1656_vm4, %v2776_v3, %v2778_v11  ;;  %v3020_v56 = vrot.slane %v2922_v25, 2  ;;  %v3022_v45 = vrot.slane %v2923_v39, 2  ;;  %v1566_v0 = vmul.f32 %v5848_v21, %v5947_v28 }
 0x1fc   : > { %v2884_v63 = vadd.f32 %v2777_v41, %v2640_v58  ;;  %v2885_v15 = vadd.f32 %v2779_v4, %v2641_v61  ;;  %v1567_v47 = vmul.f32 %v5848_v21, %v5949_v57  ;;  %v6073_v36 = vmul.f32 0.5, %v6000_v24 }
 0x1fd   : > { %4720 = vpow2.f32 %v3734_v31  ;;  %v3021_v37 = vsel %vm1901_vm5, %v3019_v8, %v3020_v56  ;;  %v3023_v17 = vsel %vm1901_vm5, %v3020_v56, %v3022_v45  ;;  %v1812_v20 = vmul.f32 %v5880_v34, %v5949_v57 }
 0x1fe   : > { %v6079_v14 = vadd.f32 %v3021_v37, %v2884_v63  ;;  %v6081_v22 = vadd.f32 %v3023_v17, %v2885_v15  ;;  %v1668_v62 = vrot.slane %v1567_v47, 1  ;;  %4722 = vpow2.f32 %v3736_v42 }
 0x1ff   : > { %v6077_v43 = vpop.eup %4716  ;;  %v1667_v31 = vrot.slane %v1566_v0, 1  ;;  %v1811_v51 = vmul.f32 %v5880_v34, %v5947_v28  ;;  %v1496_v48 = vmul.f32 %v5845_v46, %v5947_v28  ;;  %v1813_v26 = vmul.f32 %v5880_v34, %v5870_v53 }
 0x200   : > { %v6085_v27 = vpop.eup %4718  ;;  %v3382_v24 = vmul.f32 1.0614054, %v6077_v43  ;;  %v6092_v35 = vmul.f32 0.70710677, %v6079_v14  ;;  %v6099_v40 = vmul.f32 0.70710677, %v6081_v22  ;;  %v1671_v2 = vsel %vm1656_vm4, %v1668_v62, %v1670_v18 }
 0x201   : > { %v3383_v10 = vmul.f32 1.0614054, %v6085_v27  ;;  %v1669_v29 = vsel %vm1656_vm4, %v1667_v31, %v1668_v62  ;;  %v1497_v52 = vmul.f32 %v5845_v46, %v5949_v57  ;;  %v1913_v28 = vrot.slane %v1812_v20, 2 }
 0x202   : > { %v3414_v9 = vadd.f32 -1.4531521, %v3382_v24  ;;  %v3224_v32 = vand.u32 2147483647, %v6092_v35  ;;  %v3225_v53 = vand.u32 2147483647, %v6099_v40  ;;  %v1773_v59 = vadd.f32 %v1669_v29, %v1496_v48 }
 0x203   : > { %v3415_v50 = vadd.f32 -1.4531521, %v3383_v10  ;;  %v1912_v12 = vrot.slane %v1811_v51, 2  ;;  %v1774_v13 = vadd.f32 %v1671_v2, %v1497_v52  ;;  %v1915_v39 = vrot.slane %v1813_v26, 2  ;;  %v6124_v10 = vld [vmem:[#allocation2 + $0x60] sm:$0xff] }
 0x204   : > { %v3446_v55 = vmul.f32 %v6077_v43, %v3414_v9  ;;  %v3256_v3 = vmul.f32 0.3275911, %v3224_v32  ;;  %v3672_v5 = vsub.f32 0.0, %v3224_v32  ;;  %v3257_v18 = vmul.f32 0.3275911, %v3225_v53 }
 0x205   : > { %v3447_v38 = vmul.f32 %v6085_v27, %v3415_v50  ;;  %v3673_v25 = vsub.f32 0.0, %v3225_v53  ;;  %v1914_v57 = vsel %vm1901_vm5, %v1912_v12, %v1913_v28  ;;  %v1916_v15 = vsel %vm1901_vm5, %v1913_v28, %v1915_v39  ;;  %v6136_v12 = vld [vmem:[#allocation2 + $0x68] sm:$0xff] }
 0x206   : > { %v3478_v11 = vadd.f32 1.4214138, %v3446_v55  ;;  %v3288_v58 = vadd.f32 1.0, %v3256_v3  ;;  %v3704_v61 = vmul.f32 %v3672_v5, %v3224_v32  ;;  %v3289_v41 = vadd.f32 1.0, %v3257_v18 }
 0x207   : > { %v3479_v42 = vadd.f32 1.4214138, %v3447_v38  ;;  %v3705_v4 = vmul.f32 %v3673_v25, %v3225_v53  ;;  %v2018_v56 = vadd.f32 %v1914_v57, %v1773_v59  ;;  %v2019_v47 = vadd.f32 %v1916_v15, %v1774_v13 }
 0x208   : > { %v3510_v8 = vmul.f32 %v6077_v43, %v3478_v11  ;;  %4724 = vrcp.f32 %v3288_v58  ;;  %v3738_v63 = vmul.f32 1.442695, %v3704_v61  ;;  %v2054_v37 = vmul.f32 %v5894_v49, %v6036_v44 }
 0x209   : > { %v3511_v45 = vmul.f32 %v6085_v27, %v3479_v42  ;;  %4726 = vrcp.f32 %v3289_v41  ;;  %v6117_v20 = vmul.f32 1.442695, %v3705_v4  ;;  %v2055_v24 = vmul.f32 %v5894_v49, %v6038_v60  ;;  %v6146_v42 = vld [vmem:[#allocation2 + $0x70] sm:$0x3] }
 0x20a   : > { %v3542_v0 = vadd.f32 -0.28449672, %v3510_v8  ;;  %v4721_v17 = vpop.eup %4720  ;;  %v2124_v31 = vmul.f32 %v5909_v33, %v6036_v44  ;;  %4728 = vpow2.f32 %v3738_v63  ;;  %v2086_v48 = vadd.f32 %v2054_v37, %v2018_v56 }
 0x20b   : > { %v3543_v62 = vadd.f32 -0.28449672, %v3511_v45  ;;  %v2125_v26 = vmul.f32 %v5909_v33, %v6038_v60  ;;  %v4723_v9 = vpop.eup %4722  ;;  %v2087_v2 = vadd.f32 %v2055_v24, %v2019_v47  ;;  %v2126_v50 = vmul.f32 %v5909_v33, %v6044_v6 }
 0x20c   : > { %v3574_v51 = vmul.f32 %v6077_v43, %v3542_v0  ;;  %v2224_v32 = vrot.slane %v2124_v31, 1  ;;  %v2368_v55 = vmul.f32 %v5912_v23, %v6036_v44  ;;  %v2369_v53 = vmul.f32 %v5912_v23, %v6038_v60 }
 0x20d   : > { %v3575_v29 = vmul.f32 %v6085_v27, %v3543_v62  ;;  %v2225_v28 = vrot.slane %v2125_v26, 1  ;;  %vm3862_vm9 = vcmp.lt.f32.partialorder %v6006_v54, 0.0  ;;  %v2227_v38 = vrot.slane %v2126_v50, 1 }
 0x20e   : > { %v3606_v52 = vadd.f32 0.2548296, %v3574_v51  ;;  %v2370_v3 = vmul.f32 %v5912_v23, %v6044_v6  ;;  %v2610_v5 = vmul.f32 %v5952_v1, %v6124_v10  ;;  %vm3863_vm10 = vcmp.lt.f32.partialorder %v6011_v19, 0.0 }
 0x20f   : > { %v3607_v59 = vadd.f32 0.2548296, %v3575_v29  ;;  %v2226_v11 = vsel %vm1656_vm4, %v2224_v32, %v2225_v28  ;;  %v2468_v18 = vrot.slane %v2368_v55, 2  ;;  %v2469_v25 = vrot.slane %v2369_v53, 2 }
 0x210   : > { %v3638_v13 = vmul.f32 %v6077_v43, %v3606_v52  ;;  %v2228_v58 = vsel %vm1656_vm4, %v2225_v28, %v2227_v38  ;;  %v2330_v61 = vadd.f32 %v2226_v11, %v2086_v48  ;;  %v2471_v57 = vrot.slane %v2370_v3, 2 }
 0x211   : > { %v3639_v39 = vmul.f32 %v6085_v27, %v3607_v59  ;;  %v2331_v41 = vadd.f32 %v2228_v58, %v2087_v2  ;;  %v2470_v4 = vsel %vm1901_vm5, %v2468_v18, %v2469_v25  ;;  %v2611_v43 = vmul.f32 %v5952_v1, %v6136_v12 }
 0x212   : > { %v3798_v8 = vmul.f32 %v4721_v17, %v3638_v13  ;;  %v2472_v45 = vsel %vm1901_vm5, %v2469_v25, %v2471_v57  ;;  %v2574_v63 = vadd.f32 %v2470_v4, %v2330_v61  ;;  %v2680_v27 = vmul.f32 %v5956_v30, %v6124_v10 }
 0x213   : > { %v3799_v56 = vmul.f32 %v4723_v9, %v3639_v39  ;;  %v2575_v0 = vadd.f32 %v2472_v45, %v2331_v41  ;;  %v2681_v47 = vmul.f32 %v5956_v30, %v6136_v12  ;;  %v2682_v37 = vmul.f32 %v5956_v30, %v6146_v42 }
 0x214   : > { %v3830_v15 = vsub.f32 1.0, %v3798_v8  ;;  %v2642_v62 = vadd.f32 %v2610_v5, %v2574_v63  ;;  %v2780_v24 = vrot.slane %v2680_v27, 1  ;;  %v2924_v31 = vmul.f32 %v5959_v16, %v6124_v10 }
 0x215   : > { %v3831_v17 = vsub.f32 1.0, %v3799_v56  ;;  %v6161_v51 = vpop.eup %4724  ;;  %v2643_v26 = vadd.f32 %v2611_v43, %v2575_v0  ;;  %v2781_v9 = vrot.slane %v2681_v47, 1  ;;  %v2783_v29 = vrot.slane %v2682_v37, 1 }
 0x216   : > { %v3894_v48 = vsub.f32 0.0, %v3830_v15  ;;  %v6163_v2 = vpop.eup %4726  ;;  %v3384_v32 = vmul.f32 1.0614054, %v6161_v51  ;;  %v2925_v52 = vmul.f32 %v5959_v16, %v6136_v12  ;;  %v2926_v28 = vmul.f32 %v5959_v16, %v6146_v42 }
 0x217   : > { %v3895_v50 = vsub.f32 0.0, %v3831_v17  ;;  %v3385_v53 = vmul.f32 1.0614054, %v6163_v2  ;;  %v2782_v59 = vsel %vm1656_vm4, %v2780_v24, %v2781_v9  ;;  %v2784_v38 = vsel %vm1656_vm4, %v2781_v9, %v2783_v29  ;;  %v6175_v3 = vpop.eup %4728 }
 0x218   : > { %v3926_v55 = vsel %vm3862_vm9, %v3894_v48, %v3830_v15  ;;  %v3416_v11 = vadd.f32 -1.4531521, %v3384_v32  ;;  %v2886_v18 = vadd.f32 %v2782_v59, %v2642_v62  ;;  %v2887_v58 = vadd.f32 %v2784_v38, %v2643_v26 }
 0x219   : > { %v3927_v5 = vsel %vm3863_vm10, %v3895_v50, %v3831_v17  ;;  %v3958_v13 = vadd.f32 1.0, %v3926_v55  ;;  %v3417_v39 = vadd.f32 -1.4531521, %v3385_v53  ;;  %v3024_v61 = vrot.slane %v2924_v31, 2 }
 0x21a   : > { %v3959_v25 = vadd.f32 1.0, %v3927_v5  ;;  %v3448_v57 = vmul.f32 %v6161_v51, %v3416_v11  ;;  %v3025_v8 = vrot.slane %v2925_v52, 2  ;;  %v3027_v41 = vrot.slane %v2926_v28, 2 }
 0x21b   : > { %v3990_v54 = vmul.f32 %v3958_v13, %v6034_v7  ;;  %v3449_v43 = vmul.f32 %v6163_v2, %v3417_v39  ;;  %4730 = vpow2.f32 %v6117_v20  ;;  %v1569_v63 = vmul.f32 %v5848_v21, %v6036_v44 }
 0x21c   : > { %v3991_v4 = vmul.f32 %v3959_v25, %v6073_v36  ;;  %v3480_v19 = vadd.f32 1.4214138, %v3448_v57  ;;  %v3026_v56 = vsel %vm1901_vm5, %v3024_v61, %v3025_v8  ;;  %v3028_v45 = vsel %vm1901_vm5, %v3025_v8, %v3027_v41 }
 0x21d   : > { %v3481_v7 = vadd.f32 1.4214138, %v3449_v43  ;;  %v6188_v15 = vadd.f32 %v3026_v56, %v2886_v18  ;;  %v6190_v0 = vadd.f32 %v3028_v45, %v2887_v58  ;;  %v1570_v47 = vmul.f32 %v5848_v21, %v6038_v60 }
 0x21e   : > { %v4022_v27 = vpack.c.bf16 %v3991_v4, %v3990_v54  ;;  %v3512_v36 = vmul.f32 %v6161_v51, %v3480_v19  ;;  %v1571_v20 = vmul.f32 %v5848_v21, %v6044_v6  ;;  %v6199_v37 = vmul.f32 0.5, %v6079_v14 }
 0x21f   : > { %v3513_v17 = vmul.f32 %v6163_v2, %v3481_v7  ;;  %v6203_v62 = vmul.f32 0.70710677, %v6188_v15  ;;  %v1672_v24 = vrot.slane %v1569_v63, 1  ;;  %v6206_v48 = vmul.f32 0.70710677, %v6190_v0 }
 0x220   : > { %4505 = vmatprep.mubr.msk.bf16.mxu1 %vm1342_vm1, %v4022_v27  ;;  %v3544_v31 = vadd.f32 -0.28449672, %v3512_v36  ;;  %v1673_v26 = vrot.slane %v1570_v47, 1  ;;  %v1675_v9 = vrot.slane %v1571_v20, 1  ;;  %v6209_v29 = vmul.f32 0.5, %v6081_v22 }
 0x221   : > { %v3545_v50 = vadd.f32 -0.28449672, %v3513_v17  ;;  %v3226_v32 = vand.u32 2147483647, %v6203_v62  ;;  %v1498_v14 = vmul.f32 %v5845_v46, %v6036_v44  ;;  %v3227_v28 = vand.u32 2147483647, %v6206_v48 }
 0x222   : > { %v3576_v52 = vmul.f32 %v6161_v51, %v3544_v31  ;;  %v1499_v55 = vmul.f32 %v5845_v46, %v6038_v60  ;;  %v1674_v53 = vsel %vm1656_vm4, %v1672_v24, %v1673_v26  ;;  %v1814_v5 = vmul.f32 %v5880_v34, %v6036_v44 }
 0x223   : > { %v3577_v59 = vmul.f32 %v6163_v2, %v3545_v50  ;;  %v3258_v38 = vmul.f32 0.3275911, %v3226_v32  ;;  %v3674_v22 = vsub.f32 0.0, %v3226_v32  ;;  %v3259_v11 = vmul.f32 0.3275911, %v3227_v28 }
 0x224   : > { %v3608_v13 = vadd.f32 0.2548296, %v3576_v52  ;;  %v3675_v18 = vsub.f32 0.0, %v3227_v28  ;;  %v1676_v25 = vsel %vm1656_vm4, %v1673_v26, %v1675_v9  ;;  %vm3864_vm11 = vcmp.lt.f32.partialorder %v6092_v35, 0.0 }
 0x225   : > { %v3609_v39 = vadd.f32 0.2548296, %v3577_v59  ;;  %v3290_v58 = vadd.f32 1.0, %v3258_v38  ;;  %v3706_v61 = vmul.f32 %v3674_v22, %v3226_v32  ;;  %v1775_v54 = vadd.f32 %v1674_v53, %v1498_v14 }
 0x226   : > { %v3640_v57 = vmul.f32 %v6161_v51, %v3608_v13  ;;  %vm3865_vm12 = vcmp.lt.f32.partialorder %v6099_v40, 0.0  ;;  %v3291_v8 = vadd.f32 1.0, %v3259_v11  ;;  %v3707_v41 = vmul.f32 %v3675_v18, %v3227_v28  ;;  %v6252_v13 = vld [vmem:[#allocation2 + $0x78] sm:$0xff]  ;;  %v6262_v40 = vld [vmem:[#allocation2 + $0x88] sm:$0x3] }
 0x227   : > { %v1815_v44 = vmul.f32 %v5880_v34, %v6038_v60  ;;  %v3641_v4 = vmul.f32 %v6163_v2, %v3609_v39  ;;  %4732 = vrcp.f32 %v3290_v58  ;;  %v3742_v43 = vmul.f32 1.442695, %v3706_v61  ;;  %v6256_v39 = vld [vmem:[#allocation2 + $0x80] sm:$0xff] }
 0x228   : > { %v1816_v19 = vmul.f32 %v5880_v34, %v6044_v6  ;;  %v4731_v56 = vpop.eup %4730  ;;  %v3800_v45 = vmul.f32 %v6175_v3, %v3640_v57  ;;  %4734 = vrcp.f32 %v3291_v8  ;;  %v6232_v63 = vmul.f32 1.442695, %v3707_v41 }
 0x229   : > { %v1776_v51 = vadd.f32 %v1676_v25, %v1499_v55  ;;  %v3801_v27 = vmul.f32 %v4731_v56, %v3641_v4  ;;  %v1917_v7 = vrot.slane %v1814_v5, 2  ;;  %v1918_v36 = vrot.slane %v1815_v44, 2 }
 0x22a   : > { %v1920_v47 = vrot.slane %v1816_v19, 2  ;;  %v3832_v20 = vsub.f32 1.0, %v3800_v45  ;;  %4736 = vpow2.f32 %v3742_v43  ;;  %v2056_v60 = vmul.f32 %v5894_v49, %v6124_v10 }
 0x22b   : > { %v2057_v2 = vmul.f32 %v5894_v49, %v6136_v12  ;;  %v3833_v6 = vsub.f32 1.0, %v3801_v27  ;;  %v1919_v17 = vsel %vm1901_vm5, %v1917_v7, %v1918_v36  ;;  %v2127_v24 = vmul.f32 %v5909_v33, %v6124_v10 }
 0x22c   : > { %v1921_v3 = vsel %vm1901_vm5, %v1918_v36, %v1920_v47  ;;  %v3896_v31 = vsub.f32 0.0, %v3832_v20  ;;  %v2020_v26 = vadd.f32 %v1919_v17, %v1775_v54  ;;  %v2128_v50 = vmul.f32 %v5909_v33, %v6136_v12 }
 0x22d   : > { %v2021_v9 = vadd.f32 %v1921_v3, %v1776_v51  ;;  %v3897_v32 = vsub.f32 0.0, %v3833_v6  ;;  %v2129_v14 = vmul.f32 %v5909_v33, %v6146_v42  ;;  %v2229_v52 = vrot.slane %v2127_v24, 1 }
 0x22e   : > { %v2371_v28 = vmul.f32 %v5912_v23, %v6124_v10  ;;  %v3928_v55 = vsel %vm3864_vm11, %v3896_v31, %v3832_v20  ;;  %v2088_v53 = vadd.f32 %v2056_v60, %v2020_v26  ;;  %v2230_v38 = vrot.slane %v2128_v50, 1 }
 0x22f   : > { %v2089_v59 = vadd.f32 %v2057_v2, %v2021_v9  ;;  %v3929_v22 = vsel %vm3865_vm12, %v3897_v32, %v3833_v6  ;;  %v3960_v5 = vadd.f32 1.0, %v3928_v55  ;;  %v2232_v11 = vrot.slane %v2129_v14, 1 }
 0x230   : > { %v2372_v18 = vmul.f32 %v5912_v23, %v6136_v12  ;;  %v3961_v25 = vadd.f32 1.0, %v3929_v22  ;;  %v2231_v58 = vsel %vm1656_vm4, %v2229_v52, %v2230_v38  ;;  %v2373_v35 = vmul.f32 %v5912_v23, %v6146_v42 }
 0x231   : > { %v2473_v61 = vrot.slane %v2371_v28, 2  ;;  %v3992_v54 = vmul.f32 %v3960_v5, %v6199_v37  ;;  %v2233_v57 = vsel %vm1656_vm4, %v2230_v38, %v2232_v11  ;;  %v2332_v8 = vadd.f32 %v2231_v58, %v2088_v53 }
 0x232   : > { %v2474_v41 = vrot.slane %v2372_v18, 2  ;;  %v3993_v44 = vmul.f32 %v3961_v25, %v6209_v29  ;;  %v2333_v4 = vadd.f32 %v2233_v57, %v2089_v59  ;;  %v2476_v43 = vrot.slane %v2373_v35, 2 }
 0x233   : > { %v2612_v19 = vmul.f32 %v5952_v1, %v6252_v13  ;;  %v2613_v45 = vmul.f32 %v5952_v1, %v6256_v39  ;;  %v2683_v37 = vmul.f32 %v5956_v30, %v6252_v13  ;;  %v2684_v51 = vmul.f32 %v5956_v30, %v6256_v39 }
 0x234   : > { %v2475_v56 = vsel %vm1901_vm5, %v2473_v61, %v2474_v41  ;;  %v6275_v27 = vpop.eup %4732  ;;  %v4023_v7 = vpack.c.bf16 %v3993_v44, %v3992_v54  ;;  %v2477_v29 = vsel %vm1901_vm5, %v2474_v41, %v2476_v43  ;;  %v2685_v47 = vmul.f32 %v5956_v30, %v6262_v40 }
 0x235   : > { %v2576_v36 = vadd.f32 %v2475_v56, %v2332_v8  ;;  %v6280_v20 = vpop.eup %4734  ;;  %v3386_v60 = vmul.f32 1.0614054, %v6275_v27  ;;  %v2577_v2 = vadd.f32 %v2477_v29, %v2333_v4  ;;  %v2785_v6 = vrot.slane %v2683_v37, 1 }
 0x236   : > { %v2786_v17 = vrot.slane %v2684_v51, 1  ;;  %4506 = vmatmul.mubr.msk.bf16.vlgmr.msra.gmra.mxu1 %vm1342_vm1, %v4023_v7  ;;  %v3387_v3 = vmul.f32 1.0614054, %v6280_v20  ;;  %v2788_v31 = vrot.slane %v2685_v47, 1  ;;  %v2927_v26 = vmul.f32 %v5959_v16, %v6252_v13 }
 0x237   : > { %v2644_v24 = vadd.f32 %v2612_v19, %v2576_v36  ;;  %v6287_v9 = vpop.eup %4736  ;;  %v3418_v50 = vadd.f32 -1.4531521, %v3386_v60  ;;  %v2645_v32 = vadd.f32 %v2613_v45, %v2577_v2  ;;  %v2928_v52 = vmul.f32 %v5959_v16, %v6256_v39 }
 0x238   : > { %v2787_v14 = vsel %vm1656_vm4, %v2785_v6, %v2786_v17  ;;  %v3419_v28 = vadd.f32 -1.4531521, %v3387_v3  ;;  %v2789_v55 = vsel %vm1656_vm4, %v2786_v17, %v2788_v31  ;;  %v2929_v59 = vmul.f32 %v5959_v16, %v6262_v40 }
 0x239   : > { %v2888_v53 = vadd.f32 %v2787_v14, %v2644_v24  ;;  %v3450_v38 = vmul.f32 %v6275_v27, %v3418_v50  ;;  %v2889_v22 = vadd.f32 %v2789_v55, %v2645_v32  ;;  %v3029_v5 = vrot.slane %v2927_v26, 2 }
 0x23a   : > { %v3030_v11 = vrot.slane %v2928_v52, 2  ;;  %v3451_v18 = vmul.f32 %v6280_v20, %v3419_v28  ;;  %4738 = vpow2.f32 %v6232_v63  ;;  %v3032_v25 = vrot.slane %v2929_v59, 2 }
 0x23b   : > { %v3482_v58 = vadd.f32 1.4214138, %v3450_v38  ;;  %v1572_v61 = vmul.f32 %v5848_v21, %v6124_v10  ;;  %v1573_v54 = vmul.f32 %v5848_v21, %v6136_v12  ;;  %v1574_v44 = vmul.f32 %v5848_v21, %v6146_v42 }
 0x23c   : > { %v3031_v35 = vsel %vm1901_vm5, %v3029_v5, %v3030_v11  ;;  %v3483_v57 = vadd.f32 1.4214138, %v3451_v18  ;;  %v3033_v8 = vsel %vm1901_vm5, %v3030_v11, %v3032_v25  ;;  %v6316_v51 = vmul.f32 0.5, %v6188_v15 }
 0x23d   : > { %v6304_v41 = vadd.f32 %v3031_v35, %v2888_v53  ;;  %v3514_v63 = vmul.f32 %v6275_v27, %v3482_v58  ;;  %v6309_v4 = vadd.f32 %v3033_v8, %v2889_v22  ;;  %v1677_v43 = vrot.slane %v1572_v61, 1 }
 0x23e   : > { %v1678_v19 = vrot.slane %v1573_v54, 1  ;;  %v3515_v56 = vmul.f32 %v6280_v20, %v3483_v57  ;;  %v1680_v37 = vrot.slane %v1574_v44, 1  ;;  %v6323_v47 = vmul.f32 0.5, %v6190_v0 }
 0x23f   : > { %v6313_v45 = vmul.f32 0.70710677, %v6304_v41  ;;  %v3546_v7 = vadd.f32 -0.28449672, %v3514_v63  ;;  %v6319_v29 = vmul.f32 0.70710677, %v6309_v4  ;;  %v1500_v6 = vmul.f32 %v5845_v46, %v6124_v10 }
 0x240   : > { %v1679_v36 = vsel %vm1656_vm4, %v1677_v43, %v1678_v19  ;;  %v3547_v60 = vadd.f32 -0.28449672, %v3515_v56  ;;  %v1501_v3 = vmul.f32 %v5845_v46, %v6136_v12  ;;  %v1681_v24 = vsel %vm1656_vm4, %v1678_v19, %v1680_v37 }
 0x241   : > { %v3228_v2 = vand.u32 2147483647, %v6313_v45  ;;  %v3578_v17 = vmul.f32 %v6275_v27, %v3546_v7  ;;  %v3229_v15 = vand.u32 2147483647, %v6319_v29  ;;  %v1777_v50 = vadd.f32 %v1679_v36, %v1500_v6 }
 0x242   : > { %v3579_v31 = vmul.f32 %v6280_v20, %v3547_v60  ;;  %v1817_v28 = vmul.f32 %v5880_v34, %v6124_v10  ;;  %vm3866_vm13 = vcmp.lt.f32.partialorder %v6203_v62, 0.0  ;;  %v1818_v38 = vmul.f32 %v5880_v34, %v6136_v12  ;;  %v6373_v62 = vld [vmem:[#allocation2 + $0xa0] sm:$0x3] }
 0x243   : > { %v3260_v26 = vmul.f32 0.3275911, %v3228_v2  ;;  %v3676_v0 = vsub.f32 0.0, %v3228_v2  ;;  %v3610_v32 = vadd.f32 0.2548296, %v3578_v17  ;;  %v3677_v52 = vsub.f32 0.0, %v3229_v15 }
 0x244   : > { %v3261_v14 = vmul.f32 0.3275911, %v3229_v15  ;;  %v3611_v55 = vadd.f32 0.2548296, %v3579_v31  ;;  %vm3867_vm14 = vcmp.lt.f32.partialorder %v6206_v48, 0.0  ;;  %v1819_v18 = vmul.f32 %v5880_v34, %v6146_v42 }
 0x245   : > { %v3292_v53 = vadd.f32 1.0, %v3260_v26  ;;  %v3708_v59 = vmul.f32 %v3676_v0, %v3228_v2  ;;  %v3642_v22 = vmul.f32 %v6275_v27, %v3610_v32  ;;  %v3709_v11 = vmul.f32 %v3677_v52, %v3229_v15  ;;  %v6365_v32 = vld [vmem:[#allocation2 + $0x90] sm:$0xff] }
 0x246   : > { %v3293_v5 = vadd.f32 1.0, %v3261_v14  ;;  %v3643_v25 = vmul.f32 %v6280_v20, %v3611_v55  ;;  %v1778_v58 = vadd.f32 %v1681_v24, %v1501_v3  ;;  %v1922_v54 = vrot.slane %v1817_v28, 2  ;;  %v6367_v14 = vld [vmem:[#allocation2 + $0x98] sm:$0xff] }
 0x247   : > { %4740 = vrcp.f32 %v3292_v53  ;;  %v3746_v10 = vmul.f32 1.442695, %v3708_v59  ;;  %v4739_v35 = vpop.eup %4738  ;;  %v3802_v61 = vmul.f32 %v6287_v9, %v3642_v22  ;;  %v1923_v12 = vrot.slane %v1818_v38, 2 }
 0x248   : > { %4742 = vrcp.f32 %v3293_v5  ;;  %v3803_v57 = vmul.f32 %v4739_v35, %v3643_v25  ;;  %v6345_v27 = vmul.f32 1.442695, %v3709_v11  ;;  %v1925_v8 = vrot.slane %v1819_v18, 2 }
 0x249   : > { %v2058_v44 = vmul.f32 %v5894_v49, %v6252_v13  ;;  %v3834_v63 = vsub.f32 1.0, %v3802_v61  ;;  %4744 = vpow2.f32 %v3746_v10  ;;  %v1924_v42 = vsel %vm1901_vm5, %v1922_v54, %v1923_v12 }
 0x24a   : > { %v2059_v20 = vmul.f32 %v5894_v49, %v6256_v39  ;;  %v3835_v43 = vsub.f32 1.0, %v3803_v57  ;;  %v1926_v9 = vsel %vm1901_vm5, %v1923_v12, %v1925_v8  ;;  %v2022_v19 = vadd.f32 %v1924_v42, %v1777_v50 }
 0x24b   : > { %v2130_v56 = vmul.f32 %v5909_v33, %v6252_v13  ;;  %v3898_v37 = vsub.f32 0.0, %v3834_v63  ;;  %v2023_v7 = vadd.f32 %v1926_v9, %v1778_v58  ;;  %v2131_v36 = vmul.f32 %v5909_v33, %v6256_v39 }
 0x24c   : > { %v2132_v60 = vmul.f32 %v5909_v33, %v6262_v40  ;;  %v3899_v2 = vsub.f32 0.0, %v3835_v43  ;;  %v2090_v6 = vadd.f32 %v2058_v44, %v2022_v19  ;;  %v2374_v15 = vmul.f32 %v5912_v23, %v6252_v13 }
 0x24d   : > { %v2234_v17 = vrot.slane %v2130_v56, 1  ;;  %v3930_v3 = vsel %vm3866_vm13, %v3898_v37, %v3834_v63  ;;  %v2091_v24 = vadd.f32 %v2059_v20, %v2023_v7  ;;  %v2235_v31 = vrot.slane %v2131_v36, 1 }
 0x24e   : > { %v2237_v26 = vrot.slane %v2132_v60, 1  ;;  %v3931_v0 = vsel %vm3867_vm14, %v3899_v2, %v3835_v43  ;;  %v3962_v50 = vadd.f32 1.0, %v3930_v3  ;;  %v2375_v52 = vmul.f32 %v5912_v23, %v6256_v39 }
 0x24f   : > { %v2376_v28 = vmul.f32 %v5912_v23, %v6262_v40  ;;  %v3963_v55 = vadd.f32 1.0, %v3931_v0  ;;  %v2236_v53 = vsel %vm1656_vm4, %v2234_v17, %v2235_v31  ;;  %v2478_v48 = vrot.slane %v2374_v15, 2 }
 0x250   : > { %v2238_v59 = vsel %vm1656_vm4, %v2235_v31, %v2237_v26  ;;  %v3994_v38 = vmul.f32 %v3962_v50, %v6316_v51  ;;  %v2334_v22 = vadd.f32 %v2236_v53, %v2090_v6  ;;  %v2479_v11 = vrot.slane %v2375_v52, 2 }
 0x251   : > { %v2335_v5 = vadd.f32 %v2238_v59, %v2091_v24  ;;  %v3995_v18 = vmul.f32 %v3963_v55, %v6323_v47  ;;  %v2481_v25 = vrot.slane %v2376_v28, 2  ;;  %v2614_v10 = vmul.f32 %v5952_v1, %v6365_v32 }
 0x252   : > { %v2615_v58 = vmul.f32 %v5952_v1, %v6367_v14  ;;  %v2480_v35 = vsel %vm1901_vm5, %v2478_v48, %v2479_v11  ;;  %v2686_v61 = vmul.f32 %v5956_v30, %v6365_v32  ;;  %v2687_v51 = vmul.f32 %v5956_v30, %v6367_v14 }
 0x253   : > { %v2688_v54 = vmul.f32 %v5956_v30, %v6373_v62  ;;  %v4024_v47 = vpack.c.bf16 %v3995_v18, %v3994_v38  ;;  %v2482_v57 = vsel %vm1901_vm5, %v2479_v11, %v2481_v25  ;;  %v2578_v8 = vadd.f32 %v2480_v35, %v2334_v22 }
 0x254   : > { %v6390_v12 = vpop.eup %4740  ;;  %v2930_v44 = vmul.f32 %v5959_v16, %v6365_v32  ;;  %v2579_v20 = vadd.f32 %v2482_v57, %v2335_v5  ;;  %v2790_v43 = vrot.slane %v2686_v61, 1  ;;  %v2791_v9 = vrot.slane %v2687_v51, 1 }
 0x255   : > { %v6395_v63 = vpop.eup %4742  ;;  %v3388_v42 = vmul.f32 1.0614054, %v6390_v12  ;;  %4509 = vmatprep.mubr.msk.bf16.mxu1 %vm1342_vm1, %v4024_v47  ;;  %v2646_v56 = vadd.f32 %v2614_v10, %v2578_v8  ;;  %v2793_v37 = vrot.slane %v2688_v54, 1  ;;  %v2931_v7 = vmul.f32 %v5959_v16, %v6367_v14 }
 0x256   : > { %v3389_v19 = vmul.f32 1.0614054, %v6395_v63  ;;  %v6402_v36 = vpop.eup %4744  ;;  %v2647_v2 = vadd.f32 %v2615_v58, %v2579_v20  ;;  %v2792_v6 = vsel %vm1656_vm4, %v2790_v43, %v2791_v9  ;;  %v2932_v17 = vmul.f32 %v5959_v16, %v6373_v62 }
 0x257   : > { %v3420_v60 = vadd.f32 -1.4531521, %v3388_v42  ;;  %v2794_v3 = vsel %vm1656_vm4, %v2791_v9, %v2793_v37  ;;  %v2890_v24 = vadd.f32 %v2792_v6, %v2646_v56  ;;  %v3034_v31 = vrot.slane %v2930_v44, 2 }
 0x258   : > { %v3421_v15 = vadd.f32 -1.4531521, %v3389_v19  ;;  %v2891_v0 = vadd.f32 %v2794_v3, %v2647_v2  ;;  %v3035_v50 = vrot.slane %v2931_v7, 2  ;;  %v3037_v52 = vrot.slane %v2932_v17, 2 }
 0x259   : > { %v3452_v26 = vmul.f32 %v6390_v12, %v3420_v60  ;;  %4746 = vpow2.f32 %v6345_v27  ;;  %v1575_v55 = vmul.f32 %v5848_v21, %v6252_v13  ;;  %v1576_v38 = vmul.f32 %v5848_v21, %v6256_v39 }
 0x25a   : > { %v3453_v28 = vmul.f32 %v6395_v63, %v3421_v15  ;;  %v3036_v59 = vsel %vm1901_vm5, %v3034_v31, %v3035_v50  ;;  %v3038_v48 = vsel %vm1901_vm5, %v3035_v50, %v3037_v52  ;;  %v1577_v18 = vmul.f32 %v5848_v21, %v6262_v40 }
 0x25b   : > { %v3484_v53 = vadd.f32 1.4214138, %v3452_v26  ;;  %v6417_v5 = vadd.f32 %v3036_v59, %v2890_v24  ;;  %v6419_v11 = vadd.f32 %v3038_v48, %v2891_v0  ;;  %v1682_v25 = vrot.slane %v1575_v55, 1 }
 0x25c   : > { %v3485_v22 = vadd.f32 1.4214138, %v3453_v28  ;;  %v1683_v10 = vrot.slane %v1576_v38, 1  ;;  %v6425_v58 = vmul.f32 0.5, %v6304_v41  ;;  %v1502_v51 = vmul.f32 %v5845_v46, %v6252_v13 }
 0x25d   : > { %v3516_v27 = vmul.f32 %v6390_v12, %v3484_v53  ;;  %v6429_v61 = vmul.f32 0.70710677, %v6417_v5  ;;  %v6434_v47 = vmul.f32 0.70710677, %v6419_v11  ;;  %v1685_v8 = vrot.slane %v1577_v18, 1 }
 0x25e   : > { %v3517_v35 = vmul.f32 %v6395_v63, %v3485_v22  ;;  %v1684_v57 = vsel %vm1656_vm4, %v1682_v25, %v1683_v10  ;;  %v6438_v44 = vmul.f32 0.5, %v6309_v4  ;;  %v1503_v20 = vmul.f32 %v5845_v46, %v6256_v39 }
 0x25f   : > { %v3548_v54 = vadd.f32 -0.28449672, %v3516_v27  ;;  %v3230_v42 = vand.u32 2147483647, %v6429_v61  ;;  %v3231_v9 = vand.u32 2147483647, %v6434_v47  ;;  %v1779_v19 = vadd.f32 %v1684_v57, %v1502_v51 }
 0x260   : > { %v3549_v41 = vadd.f32 -0.28449672, %v3517_v35  ;;  %v1820_v56 = vmul.f32 %v5880_v34, %v6252_v13  ;;  %v1686_v4 = vsel %vm1656_vm4, %v1683_v10, %v1685_v8  ;;  %v1821_v15 = vmul.f32 %v5880_v34, %v6256_v39 }
 0x261   : > { %v3580_v43 = vmul.f32 %v6390_v12, %v3548_v54  ;;  %v3262_v7 = vmul.f32 0.3275911, %v3230_v42  ;;  %v3678_v60 = vsub.f32 0.0, %v3230_v42  ;;  %v3263_v6 = vmul.f32 0.3275911, %v3231_v9 }
 0x262   : > { %v3581_v37 = vmul.f32 %v6395_v63, %v3549_v41  ;;  %v3679_v17 = vsub.f32 0.0, %v3231_v9  ;;  %vm3868_vm15 = vcmp.lt.f32.partialorder %v6313_v45, 0.0  ;;  %v1822_v13 = vmul.f32 %v5880_v34, %v6262_v40 }
 0x263   : > { %v3612_v2 = vadd.f32 0.2548296, %v3580_v43  ;;  %v3294_v24 = vadd.f32 1.0, %v3262_v7  ;;  %v3710_v31 = vmul.f32 %v3678_v60, %v3230_v42  ;;  %v3295_v0 = vadd.f32 1.0, %v3263_v6  ;;  %v6484_v6 = vld [vmem:[#allocation2 + $0xb0] sm:$0xff] }
 0x264   : > { %v3613_v3 = vadd.f32 0.2548296, %v3581_v37  ;;  %v3711_v50 = vmul.f32 %v3679_v17, %v3231_v9  ;;  %v1780_v52 = vadd.f32 %v1686_v4, %v1503_v20  ;;  %v1927_v55 = vrot.slane %v1820_v56, 2 }
 0x265   : > { %v3644_v26 = vmul.f32 %v6390_v12, %v3612_v2  ;;  %4748 = vrcp.f32 %v3294_v24  ;;  %v1928_v53 = vrot.slane %v1821_v15, 2  ;;  %vm3869_vm2 = vcmp.lt.f32.partialorder %v6319_v29, 0.0  ;;  %v6482_v2 = vld [vmem:[#allocation2 + $0xa8] sm:$0xff] }
 0x266   : > { %v3645_v28 = vmul.f32 %v6395_v63, %v3613_v3  ;;  %v4747_v59 = vpop.eup %4746  ;;  %4750 = vrcp.f32 %v3295_v0  ;;  %v1930_v48 = vrot.slane %v1822_v13, 2  ;;  %v6458_v22 = vmul.f32 1.442695, %v3710_v31 }
 0x267   : > { %v3804_v39 = vmul.f32 %v6402_v36, %v3644_v26  ;;  %v6460_v40 = vmul.f32 1.442695, %v3711_v50  ;;  %v1929_v12 = vsel %vm1901_vm5, %v1927_v55, %v1928_v53  ;;  %v2060_v25 = vmul.f32 %v5894_v49, %v6365_v32  ;;  %v6491_v26 = vld [vmem:[#allocation2 + $0xb8] sm:$0x3] }
 0x268   : > { %v3805_v38 = vmul.f32 %v4747_v59, %v3645_v28  ;;  %v1931_v63 = vsel %vm1901_vm5, %v1928_v53, %v1930_v48  ;;  %v2024_v27 = vadd.f32 %v1929_v12, %v1779_v19  ;;  %v2061_v35 = vmul.f32 %v5894_v49, %v6367_v14 }
 0x269   : > { %v3836_v18 = vsub.f32 1.0, %v3804_v39  ;;  %v2025_v36 = vadd.f32 %v1931_v63, %v1780_v52  ;;  %v2133_v51 = vmul.f32 %v5909_v33, %v6365_v32  ;;  %v2134_v8 = vmul.f32 %v5909_v33, %v6367_v14 }
 0x26a   : > { %v3837_v10 = vsub.f32 1.0, %v3805_v38  ;;  %v2092_v57 = vadd.f32 %v2060_v25, %v2024_v27  ;;  %v2135_v41 = vmul.f32 %v5909_v33, %v6373_v62  ;;  %v2377_v9 = vmul.f32 %v5912_v23, %v6365_v32 }
 0x26b   : > { %v3900_v54 = vsub.f32 0.0, %v3836_v18  ;;  %v2093_v20 = vadd.f32 %v2061_v35, %v2025_v36  ;;  %v2239_v43 = vrot.slane %v2133_v51, 1  ;;  %v2240_v56 = vrot.slane %v2134_v8, 1 }
 0x26c   : > { %v3901_v42 = vsub.f32 0.0, %v3837_v10  ;;  %v2242_v37 = vrot.slane %v2135_v41, 1  ;;  %v2378_v7 = vmul.f32 %v5912_v23, %v6367_v14  ;;  %v2379_v17 = vmul.f32 %v5912_v23, %v6373_v62 }
 0x26d   : > { %v3932_v19 = vsel %vm3868_vm15, %v3900_v54, %v3836_v18  ;;  %v2483_v15 = vrot.slane %v2377_v9, 2  ;;  %v2241_v45 = vsel %vm1656_vm4, %v2239_v43, %v2240_v56  ;;  %v2616_v55 = vmul.f32 %v5952_v1, %v6482_v2 }
 0x26e   : > { %v3933_v60 = vsel %vm3869_vm2, %v3901_v42, %v3837_v10  ;;  %v3964_v4 = vadd.f32 1.0, %v3932_v19  ;;  %v2243_v24 = vsel %vm1656_vm4, %v2240_v56, %v2242_v37  ;;  %v2484_v31 = vrot.slane %v2378_v7, 2 }
 0x26f   : > { %v3965_v3 = vadd.f32 1.0, %v3933_v60  ;;  %v2336_v29 = vadd.f32 %v2241_v45, %v2092_v57  ;;  %v2337_v0 = vadd.f32 %v2243_v24, %v2093_v20  ;;  %v2486_v50 = vrot.slane %v2379_v17, 2 }
 0x270   : > { %v3996_v13 = vmul.f32 %v3964_v4, %v6425_v58  ;;  %v2485_v28 = vsel %vm1901_vm5, %v2483_v15, %v2484_v31  ;;  %v2617_v53 = vmul.f32 %v5952_v1, %v6484_v6  ;;  %v2689_v58 = vmul.f32 %v5956_v30, %v6482_v2 }
 0x271   : > { %v3997_v52 = vmul.f32 %v3965_v3, %v6438_v44  ;;  %v2487_v59 = vsel %vm1901_vm5, %v2484_v31, %v2486_v50  ;;  %v2580_v39 = vadd.f32 %v2485_v28, %v2336_v29  ;;  %v2690_v48 = vmul.f32 %v5956_v30, %v6484_v6 }
 0x272   : > { %v6504_v38 = vpop.eup %4748  ;;  %v2581_v12 = vadd.f32 %v2487_v59, %v2337_v0  ;;  %v2691_v18 = vmul.f32 %v5956_v30, %v6491_v26  ;;  %v2933_v63 = vmul.f32 %v5959_v16, %v6482_v2  ;;  %v2795_v36 = vrot.slane %v2689_v58, 1 }
 0x273   : > { %v4025_v44 = vpack.c.bf16 %v3997_v52, %v3996_v13  ;;  %v6510_v27 = vpop.eup %4750  ;;  %v3390_v25 = vmul.f32 1.0614054, %v6504_v38  ;;  %v2648_v10 = vadd.f32 %v2616_v55, %v2580_v39  ;;  %v2796_v35 = vrot.slane %v2690_v48, 1 }
 0x274   : > { %v3391_v51 = vmul.f32 1.0614054, %v6510_v27  ;;  %v2649_v54 = vadd.f32 %v2617_v53, %v2581_v12  ;;  %v2798_v57 = vrot.slane %v2691_v18, 1  ;;  %v2934_v8 = vmul.f32 %v5959_v16, %v6484_v6 }
 0x275   : > { %4510 = vmatmul.mubr.msk.bf16.gmra.mxu1 %vm1342_vm1, %v4025_v44  ;;  %v3422_v41 = vadd.f32 -1.4531521, %v3390_v25  ;;  %v2797_v42 = vsel %vm1656_vm4, %v2795_v36, %v2796_v35  ;;  %v2935_v20 = vmul.f32 %v5959_v16, %v6491_v26  ;;  %v3039_v43 = vrot.slane %v2933_v63, 2 }
 0x276   : > { %v3423_v9 = vadd.f32 -1.4531521, %v3391_v51  ;;  %v2799_v19 = vsel %vm1656_vm4, %v2796_v35, %v2798_v57  ;;  %v2892_v56 = vadd.f32 %v2797_v42, %v2648_v10  ;;  %v3040_v37 = vrot.slane %v2934_v8, 2 }
 0x277   : > { %v3454_v7 = vmul.f32 %v6504_v38, %v3422_v41  ;;  %4752 = vpow2.f32 %v6458_v22  ;;  %v2893_v60 = vadd.f32 %v2799_v19, %v2649_v54  ;;  %v3042_v4 = vrot.slane %v2935_v20, 2 }
 0x278   : > { %v3455_v17 = vmul.f32 %v6510_v27, %v3423_v9  ;;  %4754 = vpow2.f32 %v6460_v40  ;;  %v3041_v15 = vsel %vm1901_vm5, %v3039_v43, %v3040_v37  ;;  %v1578_v3 = vmul.f32 %v5848_v21, %v6365_v32 }
 0x279   : > { %v3486_v45 = vadd.f32 1.4214138, %v3454_v7  ;;  %v3043_v24 = vsel %vm1901_vm5, %v3040_v37, %v3042_v4  ;;  %v6529_v31 = vadd.f32 %v3041_v15, %v2892_v56  ;;  %v1579_v13 = vmul.f32 %v5848_v21, %v6367_v14 }
 0x27a   : > { %v3487_v22 = vadd.f32 1.4214138, %v3455_v17  ;;  %v6533_v29 = vadd.f32 %v3043_v24, %v2893_v60  ;;  %v1580_v0 = vmul.f32 %v5848_v21, %v6373_v62  ;;  %v1687_v52 = vrot.slane %v1578_v3, 1 }
 0x27b   : > { %v3518_v40 = vmul.f32 %v6504_v38, %v3486_v45  ;;  %v6539_v50 = vmul.f32 0.70710677, %v6529_v31  ;;  %v1688_v28 = vrot.slane %v1579_v13, 1  ;;  %v6542_v55 = vmul.f32 0.5, %v6417_v5 }
 0x27c   : > { %v3519_v53 = vmul.f32 %v6510_v27, %v3487_v22  ;;  %v6546_v59 = vmul.f32 0.70710677, %v6533_v29  ;;  %v1690_v39 = vrot.slane %v1580_v0, 1  ;;  %v6549_v58 = vmul.f32 0.5, %v6419_v11 }
 0x27d   : > { %v3550_v48 = vadd.f32 -0.28449672, %v3518_v40  ;;  %v3232_v44 = vand.u32 2147483647, %v6539_v50  ;;  %v1689_v12 = vsel %vm1656_vm4, %v1687_v52, %v1688_v28  ;;  %v1504_v5 = vmul.f32 %v5845_v46, %v6365_v32 }
 0x27e   : > { %v3551_v18 = vadd.f32 -0.28449672, %v3519_v53  ;;  %v3233_v63 = vand.u32 2147483647, %v6546_v59  ;;  %v1505_v25 = vmul.f32 %v5845_v46, %v6367_v14  ;;  %v1691_v11 = vsel %vm1656_vm4, %v1688_v28, %v1690_v39 }
 0x27f   : > { %v3582_v10 = vmul.f32 %v6504_v38, %v3550_v48  ;;  %v3264_v36 = vmul.f32 0.3275911, %v3232_v44  ;;  %v3680_v35 = vsub.f32 0.0, %v3232_v44  ;;  %v1781_v8 = vadd.f32 %v1689_v12, %v1504_v5 }
 0x280   : > { %v3583_v51 = vmul.f32 %v6510_v27, %v3551_v18  ;;  %v3265_v54 = vmul.f32 0.3275911, %v3233_v63  ;;  %v3681_v57 = vsub.f32 0.0, %v3233_v63  ;;  %v1823_v43 = vmul.f32 %v5880_v34, %v6365_v32 }
 0x281   : > { %v3614_v41 = vadd.f32 0.2548296, %v3582_v10  ;;  %v3296_v42 = vadd.f32 1.0, %v3264_v36  ;;  %v3712_v20 = vmul.f32 %v3680_v35, %v3232_v44  ;;  %vm3870_vm3 = vcmp.lt.f32.partialorder %v6429_v61, 0.0 }
 0x282   : > { %v3615_v9 = vadd.f32 0.2548296, %v3583_v51  ;;  %v3297_v19 = vadd.f32 1.0, %v3265_v54  ;;  %v3713_v56 = vmul.f32 %v3681_v57, %v3233_v63  ;;  %v1824_v37 = vmul.f32 %v5880_v34, %v6367_v14  ;;  %v6589_v51 = vld [vmem:[#allocation2 + $0xc0] sm:$0xff] }
 0x283   : > { %v3646_v7 = vmul.f32 %v6504_v38, %v3614_v41  ;;  %vm3871_vm6 = vcmp.lt.f32.partialorder %v6434_v47, 0.0  ;;  %4756 = vrcp.f32 %v3296_v42  ;;  %v3754_v60 = vmul.f32 1.442695, %v3712_v20  ;;  %v6597_v20 = vld [vmem:[#allocation2 + $0xc8] sm:$0xff] }
 0x284   : > { %v1825_v4 = vmul.f32 %v5880_v34, %v6373_v62  ;;  %v4753_v17 = vpop.eup %4752  ;;  %v3647_v32 = vmul.f32 %v6510_v27, %v3615_v9  ;;  %4758 = vrcp.f32 %v3297_v19  ;;  %v6571_v15 = vmul.f32 1.442695, %v3713_v56  ;;  %v6600_v19 = vld [vmem:[#allocation2 + $0xd0] sm:$0x3] }
 0x285   : > { %v1782_v3 = vadd.f32 %v1691_v11, %v1505_v25  ;;  %v4755_v45 = vpop.eup %4754  ;;  %v3806_v24 = vmul.f32 %v4753_v17, %v3646_v7  ;;  %v1932_v13 = vrot.slane %v1823_v43, 2  ;;  %v1933_v14 = vrot.slane %v1824_v37, 2 }
 0x286   : > { %v1935_v22 = vrot.slane %v1825_v4, 2  ;;  %v3807_v38 = vmul.f32 %v4755_v45, %v3647_v32  ;;  %4760 = vpow2.f32 %v3754_v60  ;;  %v2062_v0 = vmul.f32 %v5894_v49, %v6482_v2 }
 0x287   : > { %v2063_v62 = vmul.f32 %v5894_v49, %v6484_v6  ;;  %v3838_v40 = vsub.f32 1.0, %v3806_v24  ;;  %v1934_v27 = vsel %vm1901_vm5, %v1932_v13, %v1933_v14  ;;  %v2136_v28 = vmul.f32 %v5909_v33, %v6482_v2 }
 0x288   : > { %v1936_v52 = vsel %vm1901_vm5, %v1933_v14, %v1935_v22  ;;  %v3839_v53 = vsub.f32 1.0, %v3807_v38  ;;  %v2026_v39 = vadd.f32 %v1934_v27, %v1781_v8  ;;  %v2137_v44 = vmul.f32 %v5909_v33, %v6484_v6 }
 0x289   : > { %v2027_v48 = vadd.f32 %v1936_v52, %v1782_v3  ;;  %v3902_v12 = vsub.f32 0.0, %v3838_v40  ;;  %v2138_v18 = vmul.f32 %v5909_v33, %v6491_v26  ;;  %v2244_v63 = vrot.slane %v2136_v28, 1 }
 0x28a   : > { %v2380_v5 = vmul.f32 %v5912_v23, %v6482_v2  ;;  %v3903_v25 = vsub.f32 0.0, %v3839_v53  ;;  %v2094_v10 = vadd.f32 %v2062_v0, %v2026_v39  ;;  %v2245_v35 = vrot.slane %v2137_v44, 1 }
 0x28b   : > { %v2095_v36 = vadd.f32 %v2063_v62, %v2027_v48  ;;  %v3934_v11 = vsel %vm3870_vm3, %v3902_v12, %v3838_v40  ;;  %v2247_v54 = vrot.slane %v2138_v18, 1  ;;  %v2381_v57 = vmul.f32 %v5912_v23, %v6484_v6 }
 0x28c   : > { %v2382_v8 = vmul.f32 %v5912_v23, %v6491_v26  ;;  %v3935_v41 = vsel %vm3871_vm6, %v3903_v25, %v3839_v53  ;;  %v3966_v42 = vadd.f32 1.0, %v3934_v11  ;;  %v2246_v43 = vsel %vm1656_vm4, %v2244_v63, %v2245_v35 }
 0x28d   : > { %v2488_v9 = vrot.slane %v2380_v5, 2  ;;  %v3967_v61 = vadd.f32 1.0, %v3935_v41  ;;  %v2248_v56 = vsel %vm1656_vm4, %v2245_v35, %v2247_v54  ;;  %v2338_v37 = vadd.f32 %v2246_v43, %v2094_v10 }
 0x28e   : > { %v2489_v7 = vrot.slane %v2381_v57, 2  ;;  %v3998_v60 = vmul.f32 %v3966_v42, %v6542_v55  ;;  %v2339_v4 = vadd.f32 %v2248_v56, %v2095_v36  ;;  %v2491_v17 = vrot.slane %v2382_v8, 2 }
 0x28f   : > { %v2618_v47 = vmul.f32 %v5952_v1, %v6589_v51  ;;  %v3999_v32 = vmul.f32 %v3967_v61, %v6549_v58  ;;  %v2619_v45 = vmul.f32 %v5952_v1, %v6597_v20  ;;  %v2692_v24 = vmul.f32 %v5956_v30, %v6589_v51 }
 0x290   : > { %v2490_v3 = vsel %vm1901_vm5, %v2488_v9, %v2489_v7  ;;  %v6612_v13 = vpop.eup %4756  ;;  %v2492_v14 = vsel %vm1901_vm5, %v2489_v7, %v2491_v17  ;;  %v2693_v22 = vmul.f32 %v5956_v30, %v6597_v20  ;;  %v2694_v38 = vmul.f32 %v5956_v30, %v6600_v19 }
 0x291   : > { %v2582_v55 = vadd.f32 %v2490_v3, %v2338_v37  ;;  %v6619_v58 = vpop.eup %4758  ;;  %v4026_v0 = vpack.c.bf16 %v3999_v32, %v3998_v60  ;;  %v3392_v62 = vmul.f32 1.0614054, %v6612_v13  ;;  %v2583_v40 = vadd.f32 %v2492_v14, %v2339_v4 }
 0x292   : > { %v2800_v27 = vrot.slane %v2692_v24, 1  ;;  %v3393_v52 = vmul.f32 1.0614054, %v6619_v58  ;;  %v2801_v53 = vrot.slane %v2693_v22, 1  ;;  %v2803_v39 = vrot.slane %v2694_v38, 1 }
 0x293   : > { %v2650_v28 = vadd.f32 %v2618_v47, %v2582_v55  ;;  %v6623_v48 = vpop.eup %4760  ;;  %4513 = vmatprep.mubr.msk.bf16.mxu1 %vm1342_vm1, %v4026_v0  ;;  %v3424_v44 = vadd.f32 -1.4531521, %v3392_v62  ;;  %v2651_v12 = vadd.f32 %v2619_v45, %v2583_v40  ;;  %v2936_v18 = vmul.f32 %v5959_v16, %v6589_v51 }
 0x294   : > { %v2937_v63 = vmul.f32 %v5959_v16, %v6597_v20  ;;  %v3425_v5 = vadd.f32 -1.4531521, %v3393_v52  ;;  %v2802_v25 = vsel %vm1656_vm4, %v2800_v27, %v2801_v53  ;;  %v2804_v10 = vsel %vm1656_vm4, %v2801_v53, %v2803_v39 }
 0x295   : > { %v2938_v36 = vmul.f32 %v5959_v16, %v6600_v19  ;;  %v3456_v35 = vmul.f32 %v6612_v13, %v3424_v44  ;;  %4762 = vpow2.f32 %v6571_v15  ;;  %v2894_v11 = vadd.f32 %v2802_v25, %v2650_v28 }
 0x296   : > { %v2895_v54 = vadd.f32 %v2804_v10, %v2651_v12  ;;  %v3457_v57 = vmul.f32 %v6619_v58, %v3425_v5  ;;  %v3044_v8 = vrot.slane %v2936_v18, 2  ;;  %v3045_v41 = vrot.slane %v2937_v63, 2 }
 0x297   : > { %v3047_v42 = vrot.slane %v2938_v36, 2  ;;  %v3488_v43 = vadd.f32 1.4214138, %v3456_v35  ;;  %v1581_v9 = vmul.f32 %v5848_v21, %v6482_v2  ;;  %v1582_v61 = vmul.f32 %v5848_v21, %v6484_v6 }
 0x298   : > { %v3489_v56 = vadd.f32 1.4214138, %v3457_v57  ;;  %v3046_v37 = vsel %vm1901_vm5, %v3044_v8, %v3045_v41  ;;  %v1583_v15 = vmul.f32 %v5848_v21, %v6491_v26  ;;  %v6646_v60 = vmul.f32 0.5, %v6529_v31 }
 0x299   : > { %v3048_v7 = vsel %vm1901_vm5, %v3045_v41, %v3047_v42  ;;  %v3520_v4 = vmul.f32 %v6612_v13, %v3488_v43  ;;  %v6649_v17 = vadd.f32 %v3046_v37, %v2894_v11  ;;  %v1692_v3 = vrot.slane %v1581_v9, 1 }
 0x29a   : > { %v6651_v47 = vadd.f32 %v3048_v7, %v2895_v54  ;;  %v3521_v32 = vmul.f32 %v6619_v58, %v3489_v56  ;;  %v1693_v45 = vrot.slane %v1582_v61, 1  ;;  %v1695_v24 = vrot.slane %v1583_v15, 1 }
 0x29b   : > { %v3552_v14 = vadd.f32 -0.28449672, %v3520_v4  ;;  %v6655_v55 = vmul.f32 0.70710677, %v6649_v17  ;;  %v1506_v22 = vmul.f32 %v5845_v46, %v6482_v2  ;;  %v1507_v31 = vmul.f32 %v5845_v46, %v6484_v6 }
 0x29c   : > { %v3553_v38 = vadd.f32 -0.28449672, %v3521_v32  ;;  %v6662_v0 = vmul.f32 0.70710677, %v6651_v47  ;;  %v1694_v62 = vsel %vm1656_vm4, %v1692_v3, %v1693_v45  ;;  %v1696_v40 = vsel %vm1656_vm4, %v1693_v45, %v1695_v24 }
 0x29d   : > { %v6667_v27 = vmul.f32 0.5, %v6533_v29  ;;  %v3584_v52 = vmul.f32 %v6612_v13, %v3552_v14  ;;  %v3234_v28 = vand.u32 2147483647, %v6655_v55  ;;  %v1826_v53 = vmul.f32 %v5880_v34, %v6482_v2 }
 0x29e   : > { %v3585_v39 = vmul.f32 %v6619_v58, %v3553_v38  ;;  %v3235_v44 = vand.u32 2147483647, %v6662_v0  ;;  %v1783_v12 = vadd.f32 %v1694_v62, %v1506_v22  ;;  %v1784_v18 = vadd.f32 %v1696_v40, %v1507_v31 }
 0x29f   : > { %v3616_v63 = vadd.f32 0.2548296, %v3584_v52  ;;  %v3266_v5 = vmul.f32 0.3275911, %v3234_v28  ;;  %v3682_v25 = vsub.f32 0.0, %v3234_v28  ;;  %v1827_v29 = vmul.f32 %v5880_v34, %v6484_v6 }
 0x2a0   : > { %v3617_v10 = vadd.f32 0.2548296, %v3585_v39  ;;  %vm3872_vm7 = vcmp.lt.f32.partialorder %v6539_v50, 0.0  ;;  %v3267_v36 = vmul.f32 0.3275911, %v3235_v44  ;;  %v3683_v35 = vsub.f32 0.0, %v3235_v44 }
 0x2a1   : > { %v1828_v2 = vmul.f32 %v5880_v34, %v6491_v26  ;;  %v3648_v11 = vmul.f32 %v6612_v13, %v3616_v63  ;;  %v3298_v54 = vadd.f32 1.0, %v3266_v5  ;;  %v3714_v57 = vmul.f32 %v3682_v25, %v3234_v28 }
 0x2a2   : > { %v1937_v8 = vrot.slane %v1826_v53, 2  ;;  %v4763_v41 = vpop.eup %4762  ;;  %v3649_v42 = vmul.f32 %v6619_v58, %v3617_v10  ;;  %v3299_v43 = vadd.f32 1.0, %v3267_v36  ;;  %v3715_v9 = vmul.f32 %v3683_v35, %v3235_v44 }
 0x2a3   : > { %v1938_v61 = vrot.slane %v1827_v29, 2  ;;  %v3808_v6 = vmul.f32 %v6623_v48, %v3648_v11  ;;  %4764 = vrcp.f32 %v3298_v54  ;;  %v3758_v56 = vmul.f32 1.442695, %v3714_v57  ;;  %v6708_v29 = vld [vmem:[#allocation2 + $0xe0] sm:$0xff] }
 0x2a4   : > { %v1940_v37 = vrot.slane %v1828_v2, 2  ;;  %v3809_v7 = vmul.f32 %v4763_v41, %v3649_v42  ;;  %vm3873_vm8 = vcmp.lt.f32.partialorder %v6546_v59, 0.0  ;;  %4766 = vrcp.f32 %v3299_v43  ;;  %v6714_v59 = vld [vmem:[#allocation2 + $0xe8] sm:$0x3] }
 0x2a5   : > { %v1939_v26 = vsel %vm1901_vm5, %v1937_v8, %v1938_v61  ;;  %v3840_v13 = vsub.f32 1.0, %v3808_v6  ;;  %v6685_v15 = vmul.f32 1.442695, %v3715_v9  ;;  %4768 = vpow2.f32 %v3758_v56 }
 0x2a6   : > { %v1941_v4 = vsel %vm1901_vm5, %v1938_v61, %v1940_v37  ;;  %v2028_v58 = vadd.f32 %v1939_v26, %v1783_v12  ;;  %v3841_v32 = vsub.f32 1.0, %v3809_v7  ;;  %v2064_v48 = vmul.f32 %v5894_v49, %v6589_v51 }
 0x2a7   : > { %v2029_v3 = vadd.f32 %v1941_v4, %v1784_v18  ;;  %v3904_v45 = vsub.f32 0.0, %v3840_v13  ;;  %v2065_v24 = vmul.f32 %v5894_v49, %v6597_v20  ;;  %v2139_v14 = vmul.f32 %v5909_v33, %v6589_v51  ;;  %v6704_v18 = vld [vmem:[#allocation2 + $0xd8] sm:$0xff] }
 0x2a8   : > { %v2140_v22 = vmul.f32 %v5909_v33, %v6597_v20  ;;  %v3905_v31 = vsub.f32 0.0, %v3841_v32  ;;  %v2096_v38 = vadd.f32 %v2064_v48, %v2028_v58  ;;  %v2141_v62 = vmul.f32 %v5909_v33, %v6600_v19 }
 0x2a9   : > { %v2383_v40 = vmul.f32 %v5912_v23, %v6589_v51  ;;  %v3936_v52 = vsel %vm3872_vm7, %v3904_v45, %v3840_v13  ;;  %v2097_v28 = vadd.f32 %v2065_v24, %v2029_v3  ;;  %v2249_v53 = vrot.slane %v2139_v14, 1 }
 0x2aa   : > { %v2250_v39 = vrot.slane %v2140_v22, 1  ;;  %v3937_v44 = vsel %vm3873_vm8, %v3905_v31, %v3841_v32  ;;  %v3968_v12 = vadd.f32 1.0, %v3936_v52  ;;  %v2252_v63 = vrot.slane %v2141_v62, 1 }
 0x2ab   : > { %v2384_v5 = vmul.f32 %v5912_v23, %v6597_v20  ;;  %v3969_v25 = vadd.f32 1.0, %v3937_v44  ;;  %v2385_v50 = vmul.f32 %v5912_v23, %v6600_v19  ;;  %v2493_v36 = vrot.slane %v2383_v40, 2 }
 0x2ac   : > { %v2251_v10 = vsel %vm1656_vm4, %v2249_v53, %v2250_v39  ;;  %v4000_v35 = vmul.f32 %v3968_v12, %v6646_v60  ;;  %v2253_v2 = vsel %vm1656_vm4, %v2250_v39, %v2252_v63  ;;  %v2620_v42 = vmul.f32 %v5952_v1, %v6704_v18 }
 0x2ad   : > { %v2340_v11 = vadd.f32 %v2251_v10, %v2096_v38  ;;  %v2494_v54 = vrot.slane %v2384_v5, 2  ;;  %v4001_v57 = vmul.f32 %v3969_v25, %v6667_v27  ;;  %v2341_v8 = vadd.f32 %v2253_v2, %v2097_v28 }
 0x2ae   : > { %v2496_v41 = vrot.slane %v2385_v50, 2  ;;  %v2621_v9 = vmul.f32 %v5952_v1, %v6708_v29  ;;  %v2695_v60 = vmul.f32 %v5956_v30, %v6704_v18  ;;  %v2696_v61 = vmul.f32 %v5956_v30, %v6708_v29 }
 0x2af   : > { %v2495_v43 = vsel %vm1901_vm5, %v2493_v36, %v2494_v54  ;;  %v4027_v6 = vpack.c.bf16 %v4001_v57, %v4000_v35  ;;  %v2697_v37 = vmul.f32 %v5956_v30, %v6714_v59  ;;  %v2939_v58 = vmul.f32 %v5959_v16, %v6704_v18 }
 0x2b0   : > { %v2497_v56 = vsel %vm1901_vm5, %v2494_v54, %v2496_v41  ;;  %v2584_v27 = vadd.f32 %v2495_v43, %v2340_v11  ;;  %v6730_v7 = vpop.eup %4764  ;;  %v2805_v13 = vrot.slane %v2695_v60, 1  ;;  %v2806_v4 = vrot.slane %v2696_v61, 1 }
 0x2b1   : > { %v2585_v26 = vadd.f32 %v2497_v56, %v2341_v8  ;;  %v6734_v32 = vpop.eup %4766  ;;  %4514 = vmatmul.mubr.msk.bf16.gmra.mxu1 %vm1342_vm1, %v4027_v6  ;;  %v3394_v3 = vmul.f32 1.0614054, %v6730_v7  ;;  %v2808_v45 = vrot.slane %v2697_v37, 1  ;;  %v2940_v24 = vmul.f32 %v5959_v16, %v6708_v29 }
 0x2b2   : > { %v2652_v48 = vadd.f32 %v2620_v42, %v2584_v27  ;;  %v3395_v14 = vmul.f32 1.0614054, %v6734_v32  ;;  %v2807_v31 = vsel %vm1656_vm4, %v2805_v13, %v2806_v4  ;;  %v2941_v38 = vmul.f32 %v5959_v16, %v6714_v59  ;;  %v6744_v62 = vpop.eup %4768 }
 0x2b3   : > { %v2653_v22 = vadd.f32 %v2621_v9, %v2585_v26  ;;  %v3426_v40 = vadd.f32 -1.4531521, %v3394_v3  ;;  %v2809_v52 = vsel %vm1656_vm4, %v2806_v4, %v2808_v45  ;;  %v3049_v53 = vrot.slane %v2939_v58, 2 }
 0x2b4   : > { %v2896_v28 = vadd.f32 %v2807_v31, %v2652_v48  ;;  %v3427_v39 = vadd.f32 -1.4531521, %v3395_v14  ;;  %v3050_v12 = vrot.slane %v2940_v24, 2  ;;  %v3052_v63 = vrot.slane %v2941_v38, 2 }
 0x2b5   : > { %v2897_v44 = vadd.f32 %v2809_v52, %v2653_v22  ;;  %v3458_v5 = vmul.f32 %v6730_v7, %v3426_v40  ;;  %4770 = vpow2.f32 %v6685_v15  ;;  %v1584_v25 = vmul.f32 %v5848_v21, %v6589_v51 }
 0x2b6   : > { %v3459_v10 = vmul.f32 %v6734_v32, %v3427_v39  ;;  %v3051_v50 = vsel %vm1901_vm5, %v3049_v53, %v3050_v12  ;;  %v3053_v36 = vsel %vm1901_vm5, %v3050_v12, %v3052_v63  ;;  %v1585_v35 = vmul.f32 %v5848_v21, %v6597_v20 }
 0x2b7   : > { %v3490_v2 = vadd.f32 1.4214138, %v3458_v5  ;;  %v6756_v11 = vadd.f32 %v3051_v50, %v2896_v28  ;;  %v6758_v54 = vadd.f32 %v3053_v36, %v2897_v44  ;;  %v1586_v15 = vmul.f32 %v5848_v21, %v6600_v19 }
 0x2b8   : > { %v6763_v57 = vmul.f32 0.5, %v6649_v17  ;;  %v3491_v8 = vadd.f32 1.4214138, %v3459_v10  ;;  %v1697_v41 = vrot.slane %v1584_v25, 1  ;;  %v1698_v42 = vrot.slane %v1585_v35, 1 }
 0x2b9   : > { %v6766_v43 = vmul.f32 0.5, %v6651_v47  ;;  %v3522_v9 = vmul.f32 %v6730_v7, %v3490_v2  ;;  %v6770_v60 = vmul.f32 0.70710677, %v6756_v11  ;;  %v1508_v61 = vmul.f32 %v5845_v46, %v6589_v51 }
 0x2ba   : > { %v3523_v6 = vmul.f32 %v6734_v32, %v3491_v8  ;;  %v6776_v56 = vmul.f32 0.70710677, %v6758_v54  ;;  %v1699_v17 = vsel %vm1656_vm4, %v1697_v41, %v1698_v42  ;;  %v1700_v27 = vrot.slane %v1586_v15, 1 }
 0x2bb   : > { %v3554_v37 = vadd.f32 -0.28449672, %v3522_v9  ;;  %v3236_v47 = vand.u32 2147483647, %v6770_v60  ;;  %v1509_v26 = vmul.f32 %v5845_v46, %v6597_v20  ;;  %v1829_v13 = vmul.f32 %v5880_v34, %v6589_v51 }
 0x2bc   : > { %v3555_v4 = vadd.f32 -0.28449672, %v3523_v6  ;;  %v3237_v58 = vand.u32 2147483647, %v6776_v56  ;;  %v1701_v3 = vsel %vm1656_vm4, %v1698_v42, %v1700_v27  ;;  %v1785_v48 = vadd.f32 %v1699_v17, %v1508_v61  ;;  %v6807_v17 = vld [vmem:[#allocation2 + $0xf0] sm:$0xff] }
 0x2bd   : > { %v3586_v45 = vmul.f32 %v6730_v7, %v3554_v37  ;;  %v3268_v24 = vmul.f32 0.3275911, %v3236_v47  ;;  %v3684_v14 = vsub.f32 0.0, %v3236_v47  ;;  %v1786_v22 = vadd.f32 %v1701_v3, %v1509_v26 }
 0x2be   : > { %v3587_v31 = vmul.f32 %v6734_v32, %v3555_v4  ;;  %v3269_v38 = vmul.f32 0.3275911, %v3237_v58  ;;  %v3685_v40 = vsub.f32 0.0, %v3237_v58  ;;  %v1830_v52 = vmul.f32 %v5880_v34, %v6597_v20 }
 0x2bf   : > { %v3618_v28 = vadd.f32 0.2548296, %v3586_v45  ;;  %v3300_v51 = vadd.f32 1.0, %v3268_v24  ;;  %v3716_v53 = vmul.f32 %v3684_v14, %v3236_v47  ;;  %v1831_v39 = vmul.f32 %v5880_v34, %v6600_v19 }
 0x2c0   : > { %v3619_v44 = vadd.f32 0.2548296, %v3587_v31  ;;  %vm3874_vm9 = vcmp.lt.f32.partialorder %v6655_v55, 0.0  ;;  %v3301_v12 = vadd.f32 1.0, %v3269_v38  ;;  %v3717_v63 = vmul.f32 %v3685_v40, %v3237_v58 }
 0x2c1   : > { %v1942_v5 = vrot.slane %v1829_v13, 2  ;;  %v3650_v25 = vmul.f32 %v6730_v7, %v3618_v28  ;;  %4772 = vrcp.f32 %v3300_v51  ;;  %v3762_v10 = vmul.f32 1.442695, %v3716_v53  ;;  %v6827_v51 = vld [vmem:[#allocation2 + $0x100] sm:$0x3] }
 0x2c2   : > { %v1943_v50 = vrot.slane %v1830_v52, 2  ;;  %v4771_v36 = vpop.eup %4770  ;;  %v3651_v20 = vmul.f32 %v6734_v32, %v3619_v44  ;;  %vm3875_vm10 = vcmp.lt.f32.partialorder %v6662_v0, 0.0  ;;  %4774 = vrcp.f32 %v3301_v12 }
 0x2c3   : > { %v1945_v35 = vrot.slane %v1831_v39, 2  ;;  %v3810_v19 = vmul.f32 %v6744_v62, %v3650_v25  ;;  %v6797_v2 = vmul.f32 1.442695, %v3717_v63  ;;  %v2066_v8 = vmul.f32 %v5894_v49, %v6704_v18 }
 0x2c4   : > { %v1944_v15 = vsel %vm1901_vm5, %v1942_v5, %v1943_v50  ;;  %v3811_v7 = vmul.f32 %v4771_v36, %v3651_v20  ;;  %4776 = vpow2.f32 %v3762_v10  ;;  %v2067_v61 = vmul.f32 %v5894_v49, %v6708_v29 }
 0x2c5   : > { %v1946_v41 = vsel %vm1901_vm5, %v1943_v50, %v1945_v35  ;;  %v2030_v42 = vadd.f32 %v1944_v15, %v1785_v48  ;;  %v3842_v9 = vsub.f32 1.0, %v3810_v19  ;;  %v2142_v62 = vmul.f32 %v5909_v33, %v6704_v18 }
 0x2c6   : > { %v2031_v32 = vadd.f32 %v1946_v41, %v1786_v22  ;;  %v3843_v6 = vsub.f32 1.0, %v3811_v7  ;;  %v2143_v37 = vmul.f32 %v5909_v33, %v6708_v29  ;;  %v2144_v47 = vmul.f32 %v5909_v33, %v6714_v59  ;;  %v6819_v22 = vld [vmem:[#allocation2 + $0xf8] sm:$0xff] }
 0x2c7   : > { %v2098_v27 = vadd.f32 %v2066_v8, %v2030_v42  ;;  %v3906_v26 = vsub.f32 0.0, %v3842_v9  ;;  %v2254_v4 = vrot.slane %v2142_v62, 1  ;;  %v2386_v58 = vmul.f32 %v5912_v23, %v6704_v18 }
 0x2c8   : > { %v2099_v13 = vadd.f32 %v2067_v61, %v2031_v32  ;;  %v3907_v3 = vsub.f32 0.0, %v3843_v6  ;;  %v2255_v48 = vrot.slane %v2143_v37, 1  ;;  %v2257_v45 = vrot.slane %v2144_v47, 1 }
 0x2c9   : > { %v2387_v24 = vmul.f32 %v5912_v23, %v6708_v29  ;;  %v3938_v14 = vsel %vm3874_vm9, %v3906_v26, %v3842_v9  ;;  %v2388_v31 = vmul.f32 %v5912_v23, %v6714_v59  ;;  %v2498_v38 = vrot.slane %v2386_v58, 2 }
 0x2ca   : > { %v2622_v40 = vmul.f32 %v5952_v1, %v6807_v17  ;;  %v3939_v52 = vsel %vm3875_vm10, %v3907_v3, %v3843_v6  ;;  %v3970_v28 = vadd.f32 1.0, %v3938_v14  ;;  %v2256_v53 = vsel %vm1656_vm4, %v2254_v4, %v2255_v48 }
 0x2cb   : > { %v2258_v55 = vsel %vm1656_vm4, %v2255_v48, %v2257_v45  ;;  %v3971_v39 = vadd.f32 1.0, %v3939_v52  ;;  %v2342_v44 = vadd.f32 %v2256_v53, %v2098_v27  ;;  %v2499_v63 = vrot.slane %v2387_v24, 2 }
 0x2cc   : > { %v2343_v12 = vadd.f32 %v2258_v55, %v2099_v13  ;;  %v4002_v5 = vmul.f32 %v3970_v28, %v6763_v57  ;;  %v2501_v25 = vrot.slane %v2388_v31, 2  ;;  %v2623_v10 = vmul.f32 %v5952_v1, %v6819_v22 }
 0x2cd   : > { %v2698_v0 = vmul.f32 %v5956_v30, %v6807_v17  ;;  %v4003_v50 = vmul.f32 %v3971_v39, %v6766_v43  ;;  %v2500_v36 = vsel %vm1901_vm5, %v2498_v38, %v2499_v63  ;;  %v2699_v20 = vmul.f32 %v5956_v30, %v6819_v22 }
 0x2ce   : > { %v2700_v35 = vmul.f32 %v5956_v30, %v6827_v51  ;;  %v6842_v19 = vpop.eup %4772  ;;  %v2502_v57 = vsel %vm1901_vm5, %v2499_v63, %v2501_v25  ;;  %v2586_v15 = vadd.f32 %v2500_v36, %v2342_v44  ;;  %v2942_v7 = vmul.f32 %v5959_v16, %v6807_v17 }
 0x2cf   : > { %v2810_v8 = vrot.slane %v2698_v0, 1  ;;  %v6847_v41 = vpop.eup %4774  ;;  %v4028_v43 = vpack.c.bf16 %v4003_v50, %v4002_v5  ;;  %v3396_v42 = vmul.f32 1.0614054, %v6842_v19  ;;  %v2587_v9 = vadd.f32 %v2502_v57, %v2343_v12 }
 0x2d0   : > { %v2811_v32 = vrot.slane %v2699_v20, 1  ;;  %v3397_v61 = vmul.f32 1.0614054, %v6847_v41  ;;  %v2654_v62 = vadd.f32 %v2622_v40, %v2586_v15  ;;  %v2813_v6 = vrot.slane %v2700_v35, 1 }
 0x2d1   : > { %v2943_v27 = vmul.f32 %v5959_v16, %v6819_v22  ;;  %v6853_v37 = vpop.eup %4776  ;;  %4517 = vmatprep.mubr.msk.bf16.mxu1 %vm1342_vm1, %v4028_v43  ;;  %v3428_v47 = vadd.f32 -1.4531521, %v3396_v42  ;;  %v2655_v26 = vadd.f32 %v2623_v10, %v2587_v9  ;;  %v2944_v4 = vmul.f32 %v5959_v16, %v6827_v51 }
 0x2d2   : > { %v2812_v13 = vsel %vm1656_vm4, %v2810_v8, %v2811_v32  ;;  %v3429_v58 = vadd.f32 -1.4531521, %v3397_v61  ;;  %v2814_v3 = vsel %vm1656_vm4, %v2811_v32, %v2813_v6  ;;  %v3054_v45 = vrot.slane %v2942_v7, 2 }
 0x2d3   : > { %v2898_v48 = vadd.f32 %v2812_v13, %v2654_v62  ;;  %v3460_v24 = vmul.f32 %v6842_v19, %v3428_v47  ;;  %v2899_v14 = vadd.f32 %v2814_v3, %v2655_v26  ;;  %v3055_v31 = vrot.slane %v2943_v27, 2 }
 0x2d4   : > { %v3057_v38 = vrot.slane %v2944_v4, 2  ;;  %v3461_v40 = vmul.f32 %v6847_v41, %v3429_v58  ;;  %4778 = vpow2.f32 %v6797_v2  ;;  %v1587_v52 = vmul.f32 %v5848_v21, %v6704_v18 }
 0x2d5   : > { %v3492_v28 = vadd.f32 1.4214138, %v3460_v24  ;;  %v3056_v53 = vsel %vm1901_vm5, %v3054_v45, %v3055_v31  ;;  %v1588_v39 = vmul.f32 %v5848_v21, %v6708_v29  ;;  %v1589_v5 = vmul.f32 %v5848_v21, %v6714_v59 }
 0x2d6   : > { %v3058_v55 = vsel %vm1901_vm5, %v3055_v31, %v3057_v38  ;;  %v3493_v44 = vadd.f32 1.4214138, %v3461_v40  ;;  %v6869_v12 = vadd.f32 %v3056_v53, %v2898_v48  ;;  %v1702_v25 = vrot.slane %v1587_v52, 1 }
 0x2d7   : > { %v6871_v63 = vadd.f32 %v3058_v55, %v2899_v14  ;;  %v3524_v2 = vmul.f32 %v6842_v19, %v3492_v28  ;;  %v1703_v10 = vrot.slane %v1588_v39, 1  ;;  %v6877_v0 = vmul.f32 0.5, %v6756_v11 }
 0x2d8   : > { %v3525_v50 = vmul.f32 %v6847_v41, %v3493_v44  ;;  %v6881_v36 = vmul.f32 0.70710677, %v6869_v12  ;;  %v1510_v20 = vmul.f32 %v5845_v46, %v6704_v18  ;;  %v1705_v8 = vrot.slane %v1589_v5, 1 }
 0x2d9   : > { %v3556_v35 = vadd.f32 -0.28449672, %v3524_v2  ;;  %v6886_v57 = vmul.f32 0.70710677, %v6871_v63  ;;  %v1704_v15 = vsel %vm1656_vm4, %v1702_v25, %v1703_v10  ;;  %v6890_v7 = vmul.f32 0.5, %v6758_v54 }
 0x2da   : > { %v3557_v11 = vadd.f32 -0.28449672, %v3525_v50  ;;  %v3238_v43 = vand.u32 2147483647, %v6881_v36  ;;  %v1511_v42 = vmul.f32 %v5845_v46, %v6708_v29  ;;  %v1787_v61 = vadd.f32 %v1704_v15, %v1510_v20 }
 0x2db   : > { %v3588_v9 = vmul.f32 %v6842_v19, %v3556_v35  ;;  %v3239_v32 = vand.u32 2147483647, %v6886_v57  ;;  %v1832_v62 = vmul.f32 %v5880_v34, %v6704_v18  ;;  %v1706_v54 = vsel %vm1656_vm4, %v1703_v10, %v1705_v8 }
 0x2dc   : > { %v3589_v6 = vmul.f32 %v6847_v41, %v3557_v11  ;;  %v3270_v27 = vmul.f32 0.3275911, %v3238_v43  ;;  %v3686_v47 = vsub.f32 0.0, %v3238_v43  ;;  %v1833_v58 = vmul.f32 %v5880_v34, %v6708_v29 }
 0x2dd   : > { %v3620_v26 = vadd.f32 0.2548296, %v3588_v9  ;;  %v3271_v13 = vmul.f32 0.3275911, %v3239_v32  ;;  %v3687_v4 = vsub.f32 0.0, %v3239_v32  ;;  %vm3876_vm11 = vcmp.lt.f32.partialorder %v6770_v60, 0.0 }
 0x2de   : > { %v3621_v3 = vadd.f32 0.2548296, %v3589_v6  ;;  %v3302_v48 = vadd.f32 1.0, %v3270_v27  ;;  %v3718_v45 = vmul.f32 %v3686_v47, %v3238_v43  ;;  %v1834_v18 = vmul.f32 %v5880_v34, %v6714_v59 }
 0x2df   : > { %v3652_v24 = vmul.f32 %v6842_v19, %v3620_v26  ;;  %v3303_v14 = vadd.f32 1.0, %v3271_v13  ;;  %v3719_v31 = vmul.f32 %v3687_v4, %v3239_v32  ;;  %v1788_v38 = vadd.f32 %v1706_v54, %v1511_v42  ;;  %v6934_v26 = vld [vmem:[#allocation2 + $0x108] sm:$0xff]  ;;  %v6936_v13 = vld [vmem:[#allocation2 + $0x110] sm:$0xff] }
 0x2e0   : > { %v3653_v40 = vmul.f32 %v6847_v41, %v3621_v3  ;;  %4780 = vrcp.f32 %v3302_v48  ;;  %v1947_v52 = vrot.slane %v1832_v62, 2  ;;  %v1948_v28 = vrot.slane %v1833_v58, 2 }
 0x2e1   : > { %v4779_v53 = vpop.eup %4778  ;;  %v3812_v29 = vmul.f32 %v6853_v37, %v3652_v24  ;;  %vm3877_vm12 = vcmp.lt.f32.partialorder %v6776_v56, 0.0  ;;  %4782 = vrcp.f32 %v3303_v14  ;;  %v1950_v55 = vrot.slane %v1834_v18, 2  ;;  %v6943_v24 = vld [vmem:[#allocation2 + $0x118] sm:$0x3] }
 0x2e2   : > { %v3813_v39 = vmul.f32 %v4779_v53, %v3653_v40  ;;  %v6910_v44 = vmul.f32 1.442695, %v3718_v45  ;;  %v6912_v59 = vmul.f32 1.442695, %v3719_v31  ;;  %v1949_v19 = vsel %vm1901_vm5, %v1947_v52, %v1948_v28 }
 0x2e3   : > { %v3844_v5 = vsub.f32 1.0, %v3812_v29  ;;  %v1951_v41 = vsel %vm1901_vm5, %v1948_v28, %v1950_v55  ;;  %v2032_v2 = vadd.f32 %v1949_v19, %v1787_v61  ;;  %v2068_v25 = vmul.f32 %v5894_v49, %v6807_v17 }
 0x2e4   : > { %v3845_v10 = vsub.f32 1.0, %v3813_v39  ;;  %v2033_v37 = vadd.f32 %v1951_v41, %v1788_v38  ;;  %v2069_v50 = vmul.f32 %v5894_v49, %v6819_v22  ;;  %v2145_v20 = vmul.f32 %v5909_v33, %v6807_v17 }
 0x2e5   : > { %v3908_v35 = vsub.f32 0.0, %v3844_v5  ;;  %v2100_v15 = vadd.f32 %v2068_v25, %v2032_v2  ;;  %v2146_v8 = vmul.f32 %v5909_v33, %v6819_v22  ;;  %v2147_v11 = vmul.f32 %v5909_v33, %v6827_v51 }
 0x2e6   : > { %v3909_v43 = vsub.f32 0.0, %v3845_v10  ;;  %v2101_v42 = vadd.f32 %v2069_v50, %v2033_v37  ;;  %v2259_v9 = vrot.slane %v2145_v20, 1  ;;  %v2389_v32 = vmul.f32 %v5912_v23, %v6807_v17 }
 0x2e7   : > { %v3940_v61 = vsel %vm3876_vm11, %v3908_v35, %v3844_v5  ;;  %v2260_v62 = vrot.slane %v2146_v8, 1  ;;  %v2262_v6 = vrot.slane %v2147_v11, 1  ;;  %v2390_v27 = vmul.f32 %v5912_v23, %v6819_v22 }
 0x2e8   : > { %v3941_v47 = vsel %vm3877_vm12, %v3909_v43, %v3845_v10  ;;  %v3972_v54 = vadd.f32 1.0, %v3940_v61  ;;  %v2391_v4 = vmul.f32 %v5912_v23, %v6827_v51  ;;  %v2503_v58 = vrot.slane %v2389_v32, 2 }
 0x2e9   : > { %v3973_v3 = vadd.f32 1.0, %v3941_v47  ;;  %v2261_v60 = vsel %vm1656_vm4, %v2259_v9, %v2260_v62  ;;  %v2263_v48 = vsel %vm1656_vm4, %v2260_v62, %v2262_v6  ;;  %v2504_v45 = vrot.slane %v2390_v27, 2 }
 0x2ea   : > { %v4004_v18 = vmul.f32 %v3972_v54, %v6877_v0  ;;  %v2344_v56 = vadd.f32 %v2261_v60, %v2100_v15  ;;  %v2345_v14 = vadd.f32 %v2263_v48, %v2101_v42  ;;  %v2506_v31 = vrot.slane %v2391_v4, 2 }
 0x2eb   : > { %v4005_v38 = vmul.f32 %v3973_v3, %v6890_v7  ;;  %v2505_v40 = vsel %vm1901_vm5, %v2503_v58, %v2504_v45  ;;  %v2624_v52 = vmul.f32 %v5952_v1, %v6934_v26  ;;  %v2625_v28 = vmul.f32 %v5952_v1, %v6936_v13 }
 0x2ec   : > { %v2507_v53 = vsel %vm1901_vm5, %v2504_v45, %v2506_v31  ;;  %v2588_v29 = vadd.f32 %v2505_v40, %v2344_v56  ;;  %v2701_v0 = vmul.f32 %v5956_v30, %v6934_v26  ;;  %v2702_v55 = vmul.f32 %v5956_v30, %v6936_v13 }
 0x2ed   : > { %v6956_v39 = vpop.eup %4780  ;;  %v4029_v7 = vpack.c.bf16 %v4005_v38, %v4004_v18  ;;  %v2589_v19 = vadd.f32 %v2507_v53, %v2345_v14  ;;  %v2703_v5 = vmul.f32 %v5956_v30, %v6943_v24  ;;  %v2945_v41 = vmul.f32 %v5959_v16, %v6934_v26 }
 0x2ee   : > { %v6962_v2 = vpop.eup %4782  ;;  %v3398_v25 = vmul.f32 1.0614054, %v6956_v39  ;;  %v2656_v10 = vadd.f32 %v2624_v52, %v2588_v29  ;;  %v2815_v37 = vrot.slane %v2701_v0, 1  ;;  %v2816_v50 = vrot.slane %v2702_v55, 1 }
 0x2ef   : > { %4518 = vmatmul.mubr.msk.bf16.gmra.mxu1 %vm1342_vm1, %v4029_v7  ;;  %v3399_v20 = vmul.f32 1.0614054, %v6962_v2  ;;  %v2657_v35 = vadd.f32 %v2625_v28, %v2589_v19  ;;  %v2818_v15 = vrot.slane %v2703_v5, 1  ;;  %v2946_v8 = vmul.f32 %v5959_v16, %v6936_v13 }
 0x2f0   : > { %v3430_v11 = vadd.f32 -1.4531521, %v3398_v25  ;;  %v2817_v43 = vsel %vm1656_vm4, %v2815_v37, %v2816_v50  ;;  %v2947_v42 = vmul.f32 %v5959_v16, %v6943_v24  ;;  %v3059_v9 = vrot.slane %v2945_v41, 2 }
 0x2f1   : > { %v3431_v32 = vadd.f32 -1.4531521, %v3399_v20  ;;  %v2819_v61 = vsel %vm1656_vm4, %v2816_v50, %v2818_v15  ;;  %v2900_v62 = vadd.f32 %v2817_v43, %v2656_v10  ;;  %v3060_v6 = vrot.slane %v2946_v8, 2 }
 0x2f2   : > { %v3462_v27 = vmul.f32 %v6956_v39, %v3430_v11  ;;  %4784 = vpow2.f32 %v6910_v44  ;;  %v2901_v47 = vadd.f32 %v2819_v61, %v2657_v35  ;;  %v3062_v54 = vrot.slane %v2947_v42, 2 }
 0x2f3   : > { %v3463_v4 = vmul.f32 %v6962_v2, %v3431_v32  ;;  %4786 = vpow2.f32 %v6912_v59  ;;  %v3061_v58 = vsel %vm1901_vm5, %v3059_v9, %v3060_v6  ;;  %v1590_v3 = vmul.f32 %v5848_v21, %v6807_v17 }
 0x2f4   : > { %v3494_v60 = vadd.f32 1.4214138, %v3462_v27  ;;  %v3063_v48 = vsel %vm1901_vm5, %v3060_v6, %v3062_v54  ;;  %v6981_v45 = vadd.f32 %v3061_v58, %v2900_v62  ;;  %v1591_v18 = vmul.f32 %v5848_v21, %v6819_v22 }
 0x2f5   : > { %v3495_v44 = vadd.f32 1.4214138, %v3463_v4  ;;  %v6985_v56 = vadd.f32 %v3063_v48, %v2901_v47  ;;  %v1592_v14 = vmul.f32 %v5848_v21, %v6827_v51  ;;  %v1707_v38 = vrot.slane %v1590_v3, 1 }
 0x2f6   : > { %v3526_v59 = vmul.f32 %v6956_v39, %v3494_v60  ;;  %v6991_v31 = vmul.f32 0.70710677, %v6981_v45  ;;  %v1708_v40 = vrot.slane %v1591_v18, 1  ;;  %v6994_v52 = vmul.f32 0.5, %v6869_v12 }
 0x2f7   : > { %v3527_v28 = vmul.f32 %v6962_v2, %v3495_v44  ;;  %v6998_v53 = vmul.f32 0.70710677, %v6985_v56  ;;  %v1710_v29 = vrot.slane %v1592_v14, 1  ;;  %v7001_v0 = vmul.f32 0.5, %v6871_v63 }
 0x2f8   : > { %v3558_v55 = vadd.f32 -0.28449672, %v3526_v59  ;;  %v3240_v7 = vand.u32 2147483647, %v6991_v31  ;;  %v1709_v19 = vsel %vm1656_vm4, %v1707_v38, %v1708_v40  ;;  %v1512_v12 = vmul.f32 %v5845_v46, %v6807_v17 }
 0x2f9   : > { %v3559_v5 = vadd.f32 -0.28449672, %v3527_v28  ;;  %v3241_v41 = vand.u32 2147483647, %v6998_v53  ;;  %v1513_v25 = vmul.f32 %v5845_v46, %v6819_v22  ;;  %v1711_v63 = vsel %vm1656_vm4, %v1708_v40, %v1710_v29 }
 0x2fa   : > { %v3590_v10 = vmul.f32 %v6956_v39, %v3558_v55  ;;  %v3272_v37 = vmul.f32 0.3275911, %v3240_v7  ;;  %v3688_v50 = vsub.f32 0.0, %v3240_v7  ;;  %v1789_v8 = vadd.f32 %v1709_v19, %v1512_v12 }
 0x2fb   : > { %v3591_v20 = vmul.f32 %v6962_v2, %v3559_v5  ;;  %v3273_v35 = vmul.f32 0.3275911, %v3241_v41  ;;  %v3689_v15 = vsub.f32 0.0, %v3241_v41  ;;  %v1835_v9 = vmul.f32 %v5880_v34, %v6807_v17 }
 0x2fc   : > { %v3622_v11 = vadd.f32 0.2548296, %v3590_v10  ;;  %v3304_v43 = vadd.f32 1.0, %v3272_v37  ;;  %v3720_v42 = vmul.f32 %v3688_v50, %v3240_v7  ;;  %vm3878_vm13 = vcmp.lt.f32.partialorder %v6881_v36, 0.0 }
 0x2fd   : > { %v3623_v32 = vadd.f32 0.2548296, %v3591_v20  ;;  %v3305_v61 = vadd.f32 1.0, %v3273_v35  ;;  %v3721_v62 = vmul.f32 %v3689_v15, %v3241_v41  ;;  %v1836_v6 = vmul.f32 %v5880_v34, %v6819_v22  ;;  %v7041_v20 = vld [vmem:[#allocation2 + $0x120] sm:$0xff] }
 0x2fe   : > { %v3654_v27 = vmul.f32 %v6956_v39, %v3622_v11  ;;  %vm3879_vm14 = vcmp.lt.f32.partialorder %v6886_v57, 0.0  ;;  %4788 = vrcp.f32 %v3304_v43  ;;  %v3770_v47 = vmul.f32 1.442695, %v3720_v42  ;;  %v7049_v42 = vld [vmem:[#allocation2 + $0x128] sm:$0xff] }
 0x2ff   : > { %v1837_v54 = vmul.f32 %v5880_v34, %v6827_v51  ;;  %v4785_v4 = vpop.eup %4784  ;;  %v3655_v17 = vmul.f32 %v6962_v2, %v3623_v32  ;;  %4790 = vrcp.f32 %v3305_v61  ;;  %v7023_v58 = vmul.f32 1.442695, %v3721_v62  ;;  %v7052_v61 = vld [vmem:[#allocation2 + $0x130] sm:$0x3] }
 0x300   : > { %v1790_v3 = vadd.f32 %v1711_v63, %v1513_v25  ;;  %v4787_v60 = vpop.eup %4786  ;;  %v3814_v48 = vmul.f32 %v4785_v4, %v3654_v27  ;;  %v1952_v18 = vrot.slane %v1835_v9, 2  ;;  %v1953_v22 = vrot.slane %v1836_v6, 2 }
 0x301   : > { %v1955_v44 = vrot.slane %v1837_v54, 2  ;;  %v3815_v39 = vmul.f32 %v4787_v60, %v3655_v17  ;;  %4792 = vpow2.f32 %v3770_v47  ;;  %v2070_v14 = vmul.f32 %v5894_v49, %v6934_v26 }
 0x302   : > { %v2071_v51 = vmul.f32 %v5894_v49, %v6936_v13  ;;  %v3846_v59 = vsub.f32 1.0, %v3814_v48  ;;  %v1954_v2 = vsel %vm1901_vm5, %v1952_v18, %v1953_v22  ;;  %v2148_v40 = vmul.f32 %v5909_v33, %v6934_v26 }
 0x303   : > { %v1956_v38 = vsel %vm1901_vm5, %v1953_v22, %v1955_v44  ;;  %v3847_v28 = vsub.f32 1.0, %v3815_v39  ;;  %v2034_v29 = vadd.f32 %v1954_v2, %v1789_v8  ;;  %v2149_v7 = vmul.f32 %v5909_v33, %v6936_v13 }
 0x304   : > { %v2035_v55 = vadd.f32 %v1956_v38, %v1790_v3  ;;  %v3910_v19 = vsub.f32 0.0, %v3846_v59  ;;  %v2150_v5 = vmul.f32 %v5909_v33, %v6943_v24  ;;  %v2264_v41 = vrot.slane %v2148_v40, 1 }
 0x305   : > { %v2392_v12 = vmul.f32 %v5912_v23, %v6934_v26  ;;  %v3911_v25 = vsub.f32 0.0, %v3847_v28  ;;  %v2102_v10 = vadd.f32 %v2070_v14, %v2034_v29  ;;  %v2265_v50 = vrot.slane %v2149_v7, 1 }
 0x306   : > { %v2103_v37 = vadd.f32 %v2071_v51, %v2035_v55  ;;  %v3942_v63 = vsel %vm3878_vm13, %v3910_v19, %v3846_v59  ;;  %v2267_v35 = vrot.slane %v2150_v5, 1  ;;  %v2393_v15 = vmul.f32 %v5912_v23, %v6936_v13 }
 0x307   : > { %v2394_v8 = vmul.f32 %v5912_v23, %v6943_v24  ;;  %v3943_v11 = vsel %vm3879_vm14, %v3911_v25, %v3847_v28  ;;  %v3974_v43 = vadd.f32 1.0, %v3942_v63  ;;  %v2266_v9 = vsel %vm1656_vm4, %v2264_v41, %v2265_v50 }
 0x308   : > { %v2508_v32 = vrot.slane %v2392_v12, 2  ;;  %v3975_v36 = vadd.f32 1.0, %v3943_v11  ;;  %v2268_v62 = vsel %vm1656_vm4, %v2265_v50, %v2267_v35  ;;  %v2346_v6 = vadd.f32 %v2266_v9, %v2102_v10 }
 0x309   : > { %v2509_v27 = vrot.slane %v2393_v15, 2  ;;  %v4006_v47 = vmul.f32 %v3974_v43, %v6994_v52  ;;  %v2347_v54 = vadd.f32 %v2268_v62, %v2103_v37  ;;  %v2511_v4 = vrot.slane %v2394_v8, 2 }
 0x30a   : > { %v2626_v57 = vmul.f32 %v5952_v1, %v7041_v20  ;;  %v4007_v17 = vmul.f32 %v3975_v36, %v7001_v0  ;;  %v2627_v60 = vmul.f32 %v5952_v1, %v7049_v42  ;;  %v2704_v48 = vmul.f32 %v5956_v30, %v7041_v20 }
 0x30b   : > { %v2510_v3 = vsel %vm1901_vm5, %v2508_v32, %v2509_v27  ;;  %v7064_v18 = vpop.eup %4788  ;;  %v2512_v22 = vsel %vm1901_vm5, %v2509_v27, %v2511_v4  ;;  %v2705_v44 = vmul.f32 %v5956_v30, %v7049_v42  ;;  %v2706_v39 = vmul.f32 %v5956_v30, %v7052_v61 }
 0x30c   : > { %v2590_v52 = vadd.f32 %v2510_v3, %v2346_v6  ;;  %v7071_v0 = vpop.eup %4790  ;;  %v4030_v14 = vpack.c.bf16 %v4007_v17, %v4006_v47  ;;  %v3400_v51 = vmul.f32 1.0614054, %v7064_v18  ;;  %v2591_v59 = vadd.f32 %v2512_v22, %v2347_v54 }
 0x30d   : > { %v2820_v2 = vrot.slane %v2704_v48, 1  ;;  %v3401_v38 = vmul.f32 1.0614054, %v7071_v0  ;;  %v2821_v28 = vrot.slane %v2705_v44, 1  ;;  %v2823_v29 = vrot.slane %v2706_v39, 1 }
 0x30e   : > { %v2658_v40 = vadd.f32 %v2626_v57, %v2590_v52  ;;  %v7075_v55 = vpop.eup %4792  ;;  %4521 = vmatprep.mubr.msk.bf16.mxu1 %vm1342_vm1, %v4030_v14  ;;  %v3432_v7 = vadd.f32 -1.4531521, %v3400_v51  ;;  %v2659_v19 = vadd.f32 %v2627_v60, %v2591_v59  ;;  %v2948_v5 = vmul.f32 %v5959_v16, %v7041_v20 }
 0x30f   : > { %v2949_v41 = vmul.f32 %v5959_v16, %v7049_v42  ;;  %v3433_v12 = vadd.f32 -1.4531521, %v3401_v38  ;;  %v2822_v25 = vsel %vm1656_vm4, %v2820_v2, %v2821_v28  ;;  %v2824_v10 = vsel %vm1656_vm4, %v2821_v28, %v2823_v29 }
 0x310   : > { %v2950_v37 = vmul.f32 %v5959_v16, %v7052_v61  ;;  %v3464_v50 = vmul.f32 %v7064_v18, %v3432_v7  ;;  %4794 = vpow2.f32 %v7023_v58  ;;  %v2902_v63 = vadd.f32 %v2822_v25, %v2658_v40 }
 0x311   : > { %v2903_v35 = vadd.f32 %v2824_v10, %v2659_v19  ;;  %v3465_v15 = vmul.f32 %v7071_v0, %v3433_v12  ;;  %v3064_v8 = vrot.slane %v2948_v5, 2  ;;  %v3065_v11 = vrot.slane %v2949_v41, 2 }
 0x312   : > { %v3067_v43 = vrot.slane %v2950_v37, 2  ;;  %v3496_v9 = vadd.f32 1.4214138, %v3464_v50  ;;  %v1593_v32 = vmul.f32 %v5848_v21, %v6934_v26  ;;  %v1594_v36 = vmul.f32 %v5848_v21, %v6936_v13 }
 0x313   : > { %v3497_v62 = vadd.f32 1.4214138, %v3465_v15  ;;  %v3066_v6 = vsel %vm1901_vm5, %v3064_v8, %v3065_v11  ;;  %v1595_v58 = vmul.f32 %v5848_v21, %v6943_v24  ;;  %v7098_v47 = vmul.f32 0.5, %v6981_v45 }
 0x314   : > { %v3068_v27 = vsel %vm1901_vm5, %v3065_v11, %v3067_v43  ;;  %v3528_v54 = vmul.f32 %v7064_v18, %v3496_v9  ;;  %v7101_v4 = vadd.f32 %v3066_v6, %v2902_v63  ;;  %v1712_v3 = vrot.slane %v1593_v32, 1 }
 0x315   : > { %v7103_v57 = vadd.f32 %v3068_v27, %v2903_v35  ;;  %v3529_v17 = vmul.f32 %v7071_v0, %v3497_v62  ;;  %v1713_v60 = vrot.slane %v1594_v36, 1  ;;  %v1715_v48 = vrot.slane %v1595_v58, 1 }
 0x316   : > { %v3560_v22 = vadd.f32 -0.28449672, %v3528_v54  ;;  %v7107_v52 = vmul.f32 0.70710677, %v7101_v4  ;;  %v1514_v44 = vmul.f32 %v5845_v46, %v6934_v26  ;;  %v1515_v45 = vmul.f32 %v5845_v46, %v6936_v13 }
 0x317   : > { %v3561_v39 = vadd.f32 -0.28449672, %v3529_v17  ;;  %v7114_v14 = vmul.f32 0.70710677, %v7103_v57  ;;  %v1714_v51 = vsel %vm1656_vm4, %v1712_v3, %v1713_v60  ;;  %v1716_v59 = vsel %vm1656_vm4, %v1713_v60, %v1715_v48 }
 0x318   : > { %v7119_v2 = vmul.f32 0.5, %v6985_v56  ;;  %v3592_v38 = vmul.f32 %v7064_v18, %v3560_v22  ;;  %v3242_v40 = vand.u32 2147483647, %v7107_v52  ;;  %v1838_v28 = vmul.f32 %v5880_v34, %v6934_v26 }
 0x319   : > { %v3593_v29 = vmul.f32 %v7071_v0, %v3561_v39  ;;  %v3243_v7 = vand.u32 2147483647, %v7114_v14  ;;  %v1791_v19 = vadd.f32 %v1714_v51, %v1514_v44  ;;  %v1792_v5 = vadd.f32 %v1716_v59, %v1515_v45 }
 0x31a   : > { %v3624_v41 = vadd.f32 0.2548296, %v3592_v38  ;;  %v3274_v12 = vmul.f32 0.3275911, %v3242_v40  ;;  %v3690_v25 = vsub.f32 0.0, %v3242_v40  ;;  %v1839_v56 = vmul.f32 %v5880_v34, %v6936_v13 }
 0x31b   : > { %v3625_v10 = vadd.f32 0.2548296, %v3593_v29  ;;  %vm3880_vm15 = vcmp.lt.f32.partialorder %v6991_v31, 0.0  ;;  %v3275_v37 = vmul.f32 0.3275911, %v3243_v7  ;;  %v3691_v50 = vsub.f32 0.0, %v3243_v7 }
 0x31c   : > { %v1840_v26 = vmul.f32 %v5880_v34, %v6943_v24  ;;  %v3656_v63 = vmul.f32 %v7064_v18, %v3624_v41  ;;  %v3306_v35 = vadd.f32 1.0, %v3274_v12  ;;  %v3722_v15 = vmul.f32 %v3690_v25, %v3242_v40 }
 0x31d   : > { %v1957_v8 = vrot.slane %v1838_v28, 2  ;;  %v4795_v11 = vpop.eup %4794  ;;  %v3657_v43 = vmul.f32 %v7071_v0, %v3625_v10  ;;  %v3307_v9 = vadd.f32 1.0, %v3275_v37  ;;  %v3723_v32 = vmul.f32 %v3691_v50, %v3243_v7 }
 0x31e   : > { %v1958_v36 = vrot.slane %v1839_v56, 2  ;;  %v3816_v13 = vmul.f32 %v7075_v55, %v3656_v63  ;;  %4796 = vrcp.f32 %v3306_v35  ;;  %v3774_v62 = vmul.f32 1.442695, %v3722_v15  ;;  %v7160_v56 = vld [vmem:[#allocation2 + $0x140] sm:$0xff] }
 0x31f   : > { %v1960_v6 = vrot.slane %v1840_v26, 2  ;;  %v3817_v27 = vmul.f32 %v4795_v11, %v3657_v43  ;;  %vm3881_vm2 = vcmp.lt.f32.partialorder %v6998_v53, 0.0  ;;  %4798 = vrcp.f32 %v3307_v9  ;;  %v7166_v53 = vld [vmem:[#allocation2 + $0x148] sm:$0x3] }
 0x320   : > { %v1959_v24 = vsel %vm1901_vm5, %v1957_v8, %v1958_v36  ;;  %v3848_v18 = vsub.f32 1.0, %v3816_v13  ;;  %v7137_v58 = vmul.f32 1.442695, %v3723_v32  ;;  %4800 = vpow2.f32 %v3774_v62 }
 0x321   : > { %v1961_v54 = vsel %vm1901_vm5, %v1958_v36, %v1960_v6  ;;  %v2036_v0 = vadd.f32 %v1959_v24, %v1791_v19  ;;  %v3849_v17 = vsub.f32 1.0, %v3817_v27  ;;  %v2072_v55 = vmul.f32 %v5894_v49, %v7041_v20 }
 0x322   : > { %v2037_v3 = vadd.f32 %v1961_v54, %v1792_v5  ;;  %v3912_v60 = vsub.f32 0.0, %v3848_v18  ;;  %v2073_v48 = vmul.f32 %v5894_v49, %v7049_v42  ;;  %v2151_v22 = vmul.f32 %v5909_v33, %v7041_v20  ;;  %v7156_v5 = vld [vmem:[#allocation2 + $0x138] sm:$0xff] }
 0x323   : > { %v2152_v44 = vmul.f32 %v5909_v33, %v7049_v42  ;;  %v3913_v45 = vsub.f32 0.0, %v3849_v17  ;;  %v2104_v39 = vadd.f32 %v2072_v55, %v2036_v0  ;;  %v2153_v51 = vmul.f32 %v5909_v33, %v7052_v61 }
 0x324   : > { %v2395_v59 = vmul.f32 %v5912_v23, %v7041_v20  ;;  %v3944_v38 = vsel %vm3880_vm15, %v3912_v60, %v3848_v18  ;;  %v2105_v40 = vadd.f32 %v2073_v48, %v2037_v3  ;;  %v2269_v28 = vrot.slane %v2151_v22, 1 }
 0x325   : > { %v2270_v29 = vrot.slane %v2152_v44, 1  ;;  %v3945_v7 = vsel %vm3881_vm2, %v3913_v45, %v3849_v17  ;;  %v3976_v19 = vadd.f32 1.0, %v3944_v38  ;;  %v2272_v41 = vrot.slane %v2153_v51, 1 }
 0x326   : > { %v2396_v12 = vmul.f32 %v5912_v23, %v7049_v42  ;;  %v3977_v25 = vadd.f32 1.0, %v3945_v7  ;;  %v2397_v31 = vmul.f32 %v5912_v23, %v7052_v61  ;;  %v2513_v37 = vrot.slane %v2395_v59, 2 }
 0x327   : > { %v2271_v10 = vsel %vm1656_vm4, %v2269_v28, %v2270_v29  ;;  %v4008_v50 = vmul.f32 %v3976_v19, %v7098_v47  ;;  %v2273_v26 = vsel %vm1656_vm4, %v2270_v29, %v2272_v41  ;;  %v2628_v43 = vmul.f32 %v5952_v1, %v7156_v5 }
 0x328   : > { %v2348_v63 = vadd.f32 %v2271_v10, %v2104_v39  ;;  %v2514_v35 = vrot.slane %v2396_v12, 2  ;;  %v4009_v15 = vmul.f32 %v3977_v25, %v7119_v2  ;;  %v2349_v8 = vadd.f32 %v2273_v26, %v2105_v40 }
 0x329   : > { %v2516_v11 = vrot.slane %v2397_v31, 2  ;;  %v2629_v32 = vmul.f32 %v5952_v1, %v7160_v56  ;;  %v2707_v47 = vmul.f32 %v5956_v30, %v7156_v5  ;;  %v2708_v36 = vmul.f32 %v5956_v30, %v7160_v56 }
 0x32a   : > { %v2515_v9 = vsel %vm1901_vm5, %v2513_v37, %v2514_v35  ;;  %v4031_v13 = vpack.c.bf16 %v4009_v15, %v4008_v50  ;;  %v2709_v6 = vmul.f32 %v5956_v30, %v7166_v53  ;;  %v2951_v0 = vmul.f32 %v5959_v16, %v7156_v5 }
 0x32b   : > { %v2517_v62 = vsel %vm1901_vm5, %v2514_v35, %v2516_v11  ;;  %v2592_v2 = vadd.f32 %v2515_v9, %v2348_v63  ;;  %v7182_v27 = vpop.eup %4796  ;;  %v2825_v18 = vrot.slane %v2707_v47, 1  ;;  %v2826_v54 = vrot.slane %v2708_v36, 1 }
 0x32c   : > { %v2593_v24 = vadd.f32 %v2517_v62, %v2349_v8  ;;  %v7186_v17 = vpop.eup %4798  ;;  %4522 = vmatmul.mubr.msk.bf16.gmra.mxu1 %vm1342_vm1, %v4031_v13  ;;  %v3402_v3 = vmul.f32 1.0614054, %v7182_v27  ;;  %v2828_v60 = vrot.slane %v2709_v6, 1  ;;  %v2952_v48 = vmul.f32 %v5959_v16, %v7160_v56 }
 0x32d   : > { %v2660_v55 = vadd.f32 %v2628_v43, %v2592_v2  ;;  %v3403_v22 = vmul.f32 1.0614054, %v7186_v17  ;;  %v2827_v45 = vsel %vm1656_vm4, %v2825_v18, %v2826_v54  ;;  %v2953_v39 = vmul.f32 %v5959_v16, %v7166_v53  ;;  %v7196_v51 = vpop.eup %4800 }
 0x32e   : > { %v2661_v44 = vadd.f32 %v2629_v32, %v2593_v24  ;;  %v3434_v59 = vadd.f32 -1.4531521, %v3402_v3  ;;  %v2829_v38 = vsel %vm1656_vm4, %v2826_v54, %v2828_v60  ;;  %v3069_v28 = vrot.slane %v2951_v0, 2 }
 0x32f   : > { %v2904_v40 = vadd.f32 %v2827_v45, %v2660_v55  ;;  %v3435_v29 = vadd.f32 -1.4531521, %v3403_v22  ;;  %v3070_v19 = vrot.slane %v2952_v48, 2  ;;  %v3072_v41 = vrot.slane %v2953_v39, 2 }
 0x330   : > { %v2905_v7 = vadd.f32 %v2829_v38, %v2661_v44  ;;  %v3466_v12 = vmul.f32 %v7182_v27, %v3434_v59  ;;  %4802 = vpow2.f32 %v7137_v58  ;;  %v1596_v25 = vmul.f32 %v5848_v21, %v7041_v20 }
 0x331   : > { %v3467_v10 = vmul.f32 %v7186_v17, %v3435_v29  ;;  %v3071_v31 = vsel %vm1901_vm5, %v3069_v28, %v3070_v19  ;;  %v3073_v37 = vsel %vm1901_vm5, %v3070_v19, %v3072_v41  ;;  %v1597_v50 = vmul.f32 %v5848_v21, %v7049_v42 }
 0x332   : > { %v3498_v26 = vadd.f32 1.4214138, %v3466_v12  ;;  %v7208_v63 = vadd.f32 %v3071_v31, %v2904_v40  ;;  %v7210_v35 = vadd.f32 %v3073_v37, %v2905_v7  ;;  %v1598_v58 = vmul.f32 %v5848_v21, %v7052_v61 }
 0x333   : > { %v7215_v15 = vmul.f32 0.5, %v7101_v4  ;;  %v3499_v8 = vadd.f32 1.4214138, %v3467_v10  ;;  %v1717_v11 = vrot.slane %v1596_v25, 1  ;;  %v1718_v43 = vrot.slane %v1597_v50, 1 }
 0x334   : > { %v7218_v9 = vmul.f32 0.5, %v7103_v57  ;;  %v3530_v32 = vmul.f32 %v7182_v27, %v3498_v26  ;;  %v7222_v47 = vmul.f32 0.70710677, %v7208_v63  ;;  %v1516_v36 = vmul.f32 %v5845_v46, %v7041_v20 }
 0x335   : > { %v3531_v13 = vmul.f32 %v7186_v17, %v3499_v8  ;;  %v7228_v62 = vmul.f32 0.70710677, %v7210_v35  ;;  %v1719_v4 = vsel %vm1656_vm4, %v1717_v11, %v1718_v43  ;;  %v1720_v2 = vrot.slane %v1598_v58, 1 }
 0x336   : > { %v3562_v6 = vadd.f32 -0.28449672, %v3530_v32  ;;  %v3244_v57 = vand.u32 2147483647, %v7222_v47  ;;  %v1517_v24 = vmul.f32 %v5845_v46, %v7049_v42  ;;  %v1841_v18 = vmul.f32 %v5880_v34, %v7041_v20 }
 0x337   : > { %v3563_v54 = vadd.f32 -0.28449672, %v3531_v13  ;;  %v3245_v0 = vand.u32 2147483647, %v7228_v62  ;;  %v1721_v3 = vsel %vm1656_vm4, %v1718_v43, %v1720_v2  ;;  %v1793_v55 = vadd.f32 %v1719_v4, %v1516_v36  ;;  %v7259_v4 = vld [vmem:[#allocation2 + $0x150] sm:$0xff] }
 0x338   : > { %v3594_v60 = vmul.f32 %v7182_v27, %v3562_v6  ;;  %v3276_v48 = vmul.f32 0.3275911, %v3244_v57  ;;  %v3692_v22 = vsub.f32 0.0, %v3244_v57  ;;  %v1794_v44 = vadd.f32 %v1721_v3, %v1517_v24 }
 0x339   : > { %v3595_v45 = vmul.f32 %v7186_v17, %v3563_v54  ;;  %v3277_v39 = vmul.f32 0.3275911, %v3245_v0  ;;  %v3693_v59 = vsub.f32 0.0, %v3245_v0  ;;  %v1842_v38 = vmul.f32 %v5880_v34, %v7049_v42 }
 0x33a   : > { %v3626_v40 = vadd.f32 0.2548296, %v3594_v60  ;;  %v3308_v20 = vadd.f32 1.0, %v3276_v48  ;;  %v3724_v28 = vmul.f32 %v3692_v22, %v3244_v57  ;;  %v1843_v29 = vmul.f32 %v5880_v34, %v7052_v61 }
 0x33b   : > { %v3627_v7 = vadd.f32 0.2548296, %v3595_v45  ;;  %vm3882_vm3 = vcmp.lt.f32.partialorder %v7107_v52, 0.0  ;;  %v3309_v19 = vadd.f32 1.0, %v3277_v39  ;;  %v3725_v41 = vmul.f32 %v3693_v59, %v3245_v0 }
 0x33c   : > { %v1962_v12 = vrot.slane %v1841_v18, 2  ;;  %v3658_v25 = vmul.f32 %v7182_v27, %v3626_v40  ;;  %4804 = vrcp.f32 %v3308_v20  ;;  %v3778_v10 = vmul.f32 1.442695, %v3724_v28  ;;  %v7279_v20 = vld [vmem:[#allocation2 + $0x160] sm:$0x3] }
 0x33d   : > { %v1963_v31 = vrot.slane %v1842_v38, 2  ;;  %v4803_v37 = vpop.eup %4802  ;;  %v3659_v42 = vmul.f32 %v7186_v17, %v3627_v7  ;;  %vm3883_vm6 = vcmp.lt.f32.partialorder %v7114_v14, 0.0  ;;  %4806 = vrcp.f32 %v3309_v19 }
 0x33e   : > { %v1965_v50 = vrot.slane %v1843_v29, 2  ;;  %v3818_v61 = vmul.f32 %v7196_v51, %v3658_v25  ;;  %v7249_v26 = vmul.f32 1.442695, %v3725_v41  ;;  %v2074_v8 = vmul.f32 %v5894_v49, %v7156_v5 }
 0x33f   : > { %v1964_v58 = vsel %vm1901_vm5, %v1962_v12, %v1963_v31  ;;  %v3819_v27 = vmul.f32 %v4803_v37, %v3659_v42  ;;  %4808 = vpow2.f32 %v3778_v10  ;;  %v2075_v36 = vmul.f32 %v5894_v49, %v7160_v56 }
 0x340   : > { %v1966_v11 = vsel %vm1901_vm5, %v1963_v31, %v1965_v50  ;;  %v2038_v43 = vadd.f32 %v1964_v58, %v1793_v55  ;;  %v3850_v32 = vsub.f32 1.0, %v3818_v61  ;;  %v2154_v51 = vmul.f32 %v5909_v33, %v7156_v5 }
 0x341   : > { %v2039_v17 = vadd.f32 %v1966_v11, %v1794_v44  ;;  %v3851_v13 = vsub.f32 1.0, %v3819_v27  ;;  %v2155_v6 = vmul.f32 %v5909_v33, %v7160_v56  ;;  %v2156_v57 = vmul.f32 %v5909_v33, %v7166_v53  ;;  %v7271_v44 = vld [vmem:[#allocation2 + $0x158] sm:$0xff] }
 0x342   : > { %v2106_v2 = vadd.f32 %v2074_v8, %v2038_v43  ;;  %v3914_v24 = vsub.f32 0.0, %v3850_v32  ;;  %v2274_v54 = vrot.slane %v2154_v51, 1  ;;  %v2398_v0 = vmul.f32 %v5912_v23, %v7156_v5 }
 0x343   : > { %v2107_v18 = vadd.f32 %v2075_v36, %v2039_v17  ;;  %v3915_v3 = vsub.f32 0.0, %v3851_v13  ;;  %v2275_v55 = vrot.slane %v2155_v6, 1  ;;  %v2277_v60 = vrot.slane %v2156_v57, 1 }
 0x344   : > { %v2399_v48 = vmul.f32 %v5912_v23, %v7160_v56  ;;  %v3946_v22 = vsel %vm3882_vm3, %v3914_v24, %v3850_v32  ;;  %v2400_v45 = vmul.f32 %v5912_v23, %v7166_v53  ;;  %v2518_v39 = vrot.slane %v2398_v0, 2 }
 0x345   : > { %v2630_v59 = vmul.f32 %v5952_v1, %v7259_v4  ;;  %v3947_v38 = vsel %vm3883_vm6, %v3915_v3, %v3851_v13  ;;  %v3978_v40 = vadd.f32 1.0, %v3946_v22  ;;  %v2276_v28 = vsel %vm1656_vm4, %v2274_v54, %v2275_v55 }
 0x346   : > { %v2278_v52 = vsel %vm1656_vm4, %v2275_v55, %v2277_v60  ;;  %v3979_v29 = vadd.f32 1.0, %v3947_v38  ;;  %v2350_v7 = vadd.f32 %v2276_v28, %v2106_v2  ;;  %v2519_v41 = vrot.slane %v2399_v48, 2 }
 0x347   : > { %v2351_v19 = vadd.f32 %v2278_v52, %v2107_v18  ;;  %v4010_v12 = vmul.f32 %v3978_v40, %v7215_v15  ;;  %v2521_v25 = vrot.slane %v2400_v45, 2  ;;  %v2631_v10 = vmul.f32 %v5952_v1, %v7271_v44 }
 0x348   : > { %v2710_v14 = vmul.f32 %v5956_v30, %v7259_v4  ;;  %v4011_v31 = vmul.f32 %v3979_v29, %v7218_v9  ;;  %v2520_v37 = vsel %vm1901_vm5, %v2518_v39, %v2519_v41  ;;  %v2711_v42 = vmul.f32 %v5956_v30, %v7271_v44 }
 0x349   : > { %v2712_v50 = vmul.f32 %v5956_v30, %v7279_v20  ;;  %v7294_v61 = vpop.eup %4804  ;;  %v2522_v15 = vsel %vm1901_vm5, %v2519_v41, %v2521_v25  ;;  %v2594_v58 = vadd.f32 %v2520_v37, %v2350_v7  ;;  %v2954_v27 = vmul.f32 %v5959_v16, %v7259_v4 }
 0x34a   : > { %v2830_v8 = vrot.slane %v2710_v14, 1  ;;  %v7299_v11 = vpop.eup %4806  ;;  %v4032_v9 = vpack.c.bf16 %v4011_v31, %v4010_v12  ;;  %v3404_v43 = vmul.f32 1.0614054, %v7294_v61  ;;  %v2595_v32 = vadd.f32 %v2522_v15, %v2351_v19 }
 0x34b   : > { %v2831_v17 = vrot.slane %v2711_v42, 1  ;;  %v3405_v36 = vmul.f32 1.0614054, %v7299_v11  ;;  %v2662_v51 = vadd.f32 %v2630_v59, %v2594_v58  ;;  %v2833_v13 = vrot.slane %v2712_v50, 1 }
 0x34c   : > { %v2955_v2 = vmul.f32 %v5959_v16, %v7271_v44  ;;  %v7305_v6 = vpop.eup %4808  ;;  %4525 = vmatprep.mubr.msk.bf16.mxu1 %vm1342_vm1, %v4032_v9  ;;  %v3436_v57 = vadd.f32 -1.4531521, %v3404_v43  ;;  %v2663_v24 = vadd.f32 %v2631_v10, %v2595_v32  ;;  %v2956_v54 = vmul.f32 %v5959_v16, %v7279_v20 }
 0x34d   : > { %v2832_v18 = vsel %vm1656_vm4, %v2830_v8, %v2831_v17  ;;  %v3437_v0 = vadd.f32 -1.4531521, %v3405_v36  ;;  %v2834_v3 = vsel %vm1656_vm4, %v2831_v17, %v2833_v13  ;;  %v3074_v60 = vrot.slane %v2954_v27, 2 }
 0x34e   : > { %v2906_v55 = vadd.f32 %v2832_v18, %v2662_v51  ;;  %v3468_v48 = vmul.f32 %v7294_v61, %v3436_v57  ;;  %v2907_v22 = vadd.f32 %v2834_v3, %v2663_v24  ;;  %v3075_v45 = vrot.slane %v2955_v2, 2 }
 0x34f   : > { %v3077_v39 = vrot.slane %v2956_v54, 2  ;;  %v3469_v59 = vmul.f32 %v7299_v11, %v3437_v0  ;;  %4810 = vpow2.f32 %v7249_v26  ;;  %v1599_v38 = vmul.f32 %v5848_v21, %v7156_v5 }
 0x350   : > { %v3500_v40 = vadd.f32 1.4214138, %v3468_v48  ;;  %v3076_v28 = vsel %vm1901_vm5, %v3074_v60, %v3075_v45  ;;  %v1600_v29 = vmul.f32 %v5848_v21, %v7160_v56  ;;  %v1601_v12 = vmul.f32 %v5848_v21, %v7166_v53 }
 0x351   : > { %v3078_v52 = vsel %vm1901_vm5, %v3075_v45, %v3077_v39  ;;  %v3501_v7 = vadd.f32 1.4214138, %v3469_v59  ;;  %v7321_v19 = vadd.f32 %v3076_v28, %v2906_v55  ;;  %v1722_v25 = vrot.slane %v1599_v38, 1 }
 0x352   : > { %v7323_v41 = vadd.f32 %v3078_v52, %v2907_v22  ;;  %v3532_v26 = vmul.f32 %v7294_v61, %v3500_v40  ;;  %v1723_v10 = vrot.slane %v1600_v29, 1  ;;  %v7329_v14 = vmul.f32 0.5, %v7208_v63 }
 0x353   : > { %v3533_v31 = vmul.f32 %v7299_v11, %v3501_v7  ;;  %v7333_v37 = vmul.f32 0.70710677, %v7321_v19  ;;  %v1518_v42 = vmul.f32 %v5845_v46, %v7156_v5  ;;  %v1725_v8 = vrot.slane %v1601_v12, 1 }
 0x354   : > { %v3564_v50 = vadd.f32 -0.28449672, %v3532_v26  ;;  %v7338_v15 = vmul.f32 0.70710677, %v7323_v41  ;;  %v1724_v58 = vsel %vm1656_vm4, %v1722_v25, %v1723_v10  ;;  %v7342_v27 = vmul.f32 0.5, %v7210_v35 }
 0x355   : > { %v3565_v63 = vadd.f32 -0.28449672, %v3533_v31  ;;  %v3246_v9 = vand.u32 2147483647, %v7333_v37  ;;  %v1519_v43 = vmul.f32 %v5845_v46, %v7160_v56  ;;  %v1795_v36 = vadd.f32 %v1724_v58, %v1518_v42 }
 0x356   : > { %v3596_v32 = vmul.f32 %v7294_v61, %v3564_v50  ;;  %v3247_v17 = vand.u32 2147483647, %v7338_v15  ;;  %v1844_v51 = vmul.f32 %v5880_v34, %v7156_v5  ;;  %v1726_v35 = vsel %vm1656_vm4, %v1723_v10, %v1725_v8 }
 0x357   : > { %v3597_v13 = vmul.f32 %v7299_v11, %v3565_v63  ;;  %v3278_v2 = vmul.f32 0.3275911, %v3246_v9  ;;  %v3694_v57 = vsub.f32 0.0, %v3246_v9  ;;  %v1845_v0 = vmul.f32 %v5880_v34, %v7160_v56 }
 0x358   : > { %v3628_v24 = vadd.f32 0.2548296, %v3596_v32  ;;  %v3279_v18 = vmul.f32 0.3275911, %v3247_v17  ;;  %v3695_v54 = vsub.f32 0.0, %v3247_v17  ;;  %vm3884_vm7 = vcmp.lt.f32.partialorder %v7222_v47, 0.0 }
 0x359   : > { %v3629_v3 = vadd.f32 0.2548296, %v3597_v13  ;;  %v3310_v55 = vadd.f32 1.0, %v3278_v2  ;;  %v3726_v60 = vmul.f32 %v3694_v57, %v3246_v9  ;;  %v1846_v5 = vmul.f32 %v5880_v34, %v7166_v53 }
 0x35a   : > { %v3660_v48 = vmul.f32 %v7294_v61, %v3628_v24  ;;  %v3311_v22 = vadd.f32 1.0, %v3279_v18  ;;  %v3727_v45 = vmul.f32 %v3695_v54, %v3247_v17  ;;  %v1796_v39 = vadd.f32 %v1726_v35, %v1519_v43  ;;  %v7386_v24 = vld [vmem:[#allocation2 + $0x168] sm:$0xff]  ;;  %v7388_v18 = vld [vmem:[#allocation2 + $0x170] sm:$0xff] }
 0x35b   : > { %v3661_v59 = vmul.f32 %v7299_v11, %v3629_v3  ;;  %4812 = vrcp.f32 %v3310_v55  ;;  %v1967_v38 = vrot.slane %v1844_v51, 2  ;;  %v1968_v40 = vrot.slane %v1845_v0, 2 }
 0x35c   : > { %v4811_v28 = vpop.eup %4810  ;;  %v3820_v56 = vmul.f32 %v7305_v6, %v3660_v48  ;;  %vm3885_vm8 = vcmp.lt.f32.partialorder %v7228_v62, 0.0  ;;  %4814 = vrcp.f32 %v3311_v22  ;;  %v1970_v52 = vrot.slane %v1846_v5, 2  ;;  %v7395_v62 = vld [vmem:[#allocation2 + $0x178] sm:$0x3] }
 0x35d   : > { %v3821_v29 = vmul.f32 %v4811_v28, %v3661_v59  ;;  %v7362_v7 = vmul.f32 1.442695, %v3726_v60  ;;  %v7364_v53 = vmul.f32 1.442695, %v3727_v45  ;;  %v1969_v61 = vsel %vm1901_vm5, %v1967_v38, %v1968_v40 }
 0x35e   : > { %v3852_v12 = vsub.f32 1.0, %v3820_v56  ;;  %v1971_v11 = vsel %vm1901_vm5, %v1968_v40, %v1970_v52  ;;  %v2040_v26 = vadd.f32 %v1969_v61, %v1795_v36  ;;  %v2076_v25 = vmul.f32 %v5894_v49, %v7259_v4 }
 0x35f   : > { %v3853_v10 = vsub.f32 1.0, %v3821_v29  ;;  %v2041_v6 = vadd.f32 %v1971_v11, %v1796_v39  ;;  %v2077_v31 = vmul.f32 %v5894_v49, %v7271_v44  ;;  %v2157_v42 = vmul.f32 %v5909_v33, %v7259_v4  ;;  %v4507_v39 = vpop.f32.mrf.mxu1 }
 0x360   : > { %v3916_v50 = vsub.f32 0.0, %v3852_v12  ;;  %v2108_v58 = vadd.f32 %v2076_v25, %v2040_v26  ;;  %v2158_v8 = vmul.f32 %v5909_v33, %v7271_v44  ;;  %v2159_v63 = vmul.f32 %v5909_v33, %v7279_v20  ;;  %4261 = vst.msk [vmem:[%s7405_s7 + $0x10] sm:$0xff] %vm268_vm0, %v4507_v39 }
 0x361   : > { %v3917_v9 = vsub.f32 0.0, %v3853_v10  ;;  %v2109_v43 = vadd.f32 %v2077_v31, %v2041_v6  ;;  %v2279_v32 = vrot.slane %v2157_v42, 1  ;;  %v2401_v17 = vmul.f32 %v5912_v23, %v7259_v4  ;;  %v4132_v29 = vpop.f32.mrf.mxu1 }
 0x362   : > { %v3948_v36 = vsel %vm3884_vm7, %v3916_v50, %v3852_v12  ;;  %v2280_v51 = vrot.slane %v2158_v8, 1  ;;  %v2282_v13 = vrot.slane %v2159_v63, 1  ;;  %v2402_v2 = vmul.f32 %v5912_v23, %v7271_v44  ;;  %4259 = vst.msk [vmem:[%s7405_s7] sm:$0xff] %vm268_vm0, %v4132_v29 }
 0x363   : > { %v3949_v57 = vsel %vm3885_vm8, %v3917_v9, %v3853_v10  ;;  %v3980_v35 = vadd.f32 1.0, %v3948_v36  ;;  %v2403_v54 = vmul.f32 %v5912_v23, %v7279_v20  ;;  %v2523_v0 = vrot.slane %v2401_v17, 2 }
 0x364   : > { %v3981_v47 = vadd.f32 1.0, %v3949_v57  ;;  %v2281_v3 = vsel %vm1656_vm4, %v2279_v32, %v2280_v51  ;;  %v2283_v55 = vsel %vm1656_vm4, %v2280_v51, %v2282_v13  ;;  %v2524_v60 = vrot.slane %v2402_v2, 2 }
 0x365   : > { %v4012_v5 = vmul.f32 %v3980_v35, %v7329_v14  ;;  %v2352_v48 = vadd.f32 %v2281_v3, %v2108_v58  ;;  %v2353_v22 = vadd.f32 %v2283_v55, %v2109_v43  ;;  %v2526_v45 = vrot.slane %v2403_v54, 2  ;;  %v4508_v58 = vpop.f32.mrf.mxu1 }
 0x366   : > { %v4013_v59 = vmul.f32 %v3981_v47, %v7342_v27  ;;  %v2525_v38 = vsel %vm1901_vm5, %v2523_v0, %v2524_v60  ;;  %v2632_v40 = vmul.f32 %v5952_v1, %v7386_v24  ;;  %v2633_v28 = vmul.f32 %v5952_v1, %v7388_v18  ;;  %4262 = vst.msk [vmem:[%s7405_s7 + $0x18] sm:$0xff] %vm268_vm0, %v4508_v58 }
 0x367   : > { %v2527_v14 = vsel %vm1901_vm5, %v2524_v60, %v2526_v45  ;;  %v2596_v56 = vadd.f32 %v2525_v38, %v2352_v48  ;;  %v2713_v27 = vmul.f32 %v5956_v30, %v7386_v24  ;;  %v2714_v52 = vmul.f32 %v5956_v30, %v7388_v18  ;;  %v4135_v13 = vpop.f32.mrf.mxu1 }
 0x368   : > { %v7414_v61 = vpop.eup %4812  ;;  %v4033_v12 = vpack.c.bf16 %v4013_v59, %v4012_v5  ;;  %v2597_v11 = vadd.f32 %v2527_v14, %v2353_v22  ;;  %v2715_v26 = vmul.f32 %v5956_v30, %v7395_v62  ;;  %v2957_v25 = vmul.f32 %v5959_v16, %v7386_v24  ;;  %4260 = vst.msk [vmem:[%s7405_s7 + $0x8] sm:$0xff] %vm268_vm0, %v4135_v13 }
 0x369   : > { %v7422_v10 = vpop.eup %4814  ;;  %v3406_v6 = vmul.f32 1.0614054, %v7414_v61  ;;  %v2664_v31 = vadd.f32 %v2632_v40, %v2596_v56  ;;  %v2835_v42 = vrot.slane %v2713_v27, 1  ;;  %v2836_v50 = vrot.slane %v2714_v52, 1  ;;  %v4511_v55 = vpop.f32.mrf.mxu1 }
 0x36a   : > { %4526 = vmatmul.mubr.msk.bf16.gmra.mxu1 %vm1342_vm1, %v4033_v12  ;;  %v3407_v8 = vmul.f32 1.0614054, %v7422_v10  ;;  %v2665_v63 = vadd.f32 %v2633_v28, %v2597_v11  ;;  %v2838_v9 = vrot.slane %v2715_v26, 1  ;;  %v2958_v43 = vmul.f32 %v5959_v16, %v7388_v18  ;;  %4265 = vst.msk [vmem:[%s7405_s7 + $0x30] sm:$0xff] %vm268_vm0, %v4511_v55 }
 0x36b   : > { %v3438_v32 = vadd.f32 -1.4531521, %v3406_v6  ;;  %v2837_v17 = vsel %vm1656_vm4, %v2835_v42, %v2836_v50  ;;  %v2959_v36 = vmul.f32 %v5959_v16, %v7395_v62  ;;  %v3079_v51 = vrot.slane %v2957_v25, 2  ;;  %v4148_v59 = vpop.f32.mrf.mxu1 }
 0x36c   : > { %v3439_v2 = vadd.f32 -1.4531521, %v3407_v8  ;;  %v2839_v57 = vsel %vm1656_vm4, %v2836_v50, %v2838_v9  ;;  %v2908_v35 = vadd.f32 %v2837_v17, %v2664_v31  ;;  %v3080_v54 = vrot.slane %v2958_v43, 2  ;;  %4263 = vst.msk [vmem:[%s7405_s7 + $0x20] sm:$0xff] %vm268_vm0, %v4148_v59 }
 0x36d   : > { %v3470_v0 = vmul.f32 %v7414_v61, %v3438_v32  ;;  %4816 = vpow2.f32 %v7362_v7  ;;  %v2909_v47 = vadd.f32 %v2839_v57, %v2665_v63  ;;  %v3082_v3 = vrot.slane %v2959_v36, 2  ;;  %v4512_v52 = vpop.f32.mrf.mxu1 }
 0x36e   : > { %v3471_v60 = vmul.f32 %v7422_v10, %v3439_v2  ;;  %4818 = vpow2.f32 %v7364_v53  ;;  %v3081_v5 = vsel %vm1901_vm5, %v3079_v51, %v3080_v54  ;;  %v1602_v48 = vmul.f32 %v5848_v21, %v7259_v4  ;;  %4266 = vst.msk [vmem:[%s7405_s7 + $0x38] sm:$0xff] %vm268_vm0, %v4512_v52 }
 0x36f   : > { %v3502_v22 = vadd.f32 1.4214138, %v3470_v0  ;;  %v3083_v45 = vsel %vm1901_vm5, %v3080_v54, %v3082_v3  ;;  %v7447_v39 = vadd.f32 %v3081_v5, %v2908_v35  ;;  %v1603_v7 = vmul.f32 %v5848_v21, %v7271_v44  ;;  %v4151_v50 = vpop.f32.mrf.mxu1 }
 0x370   : > { %v3503_v38 = vadd.f32 1.4214138, %v3471_v60  ;;  %v7451_v40 = vadd.f32 %v3083_v45, %v2909_v47  ;;  %v1604_v53 = vmul.f32 %v5848_v21, %v7279_v20  ;;  %v1727_v56 = vrot.slane %v1602_v48, 1  ;;  %4264 = vst.msk [vmem:[%s7405_s7 + $0x28] sm:$0xff] %vm268_vm0, %v4151_v50 }
 0x371   : > { %v3534_v28 = vmul.f32 %v7414_v61, %v3502_v22  ;;  %v7459_v14 = vmul.f32 0.70710677, %v7447_v39  ;;  %v1728_v27 = vrot.slane %v1603_v7, 1  ;;  %v7462_v29 = vmul.f32 0.5, %v7321_v19  ;;  %v4515_v17 = vpop.f32.mrf.mxu1 }
 0x372   : > { %v3535_v12 = vmul.f32 %v7422_v10, %v3503_v38  ;;  %v7466_v11 = vmul.f32 0.70710677, %v7451_v40  ;;  %v1730_v26 = vrot.slane %v1604_v53, 1  ;;  %v7471_v25 = vmul.f32 0.5, %v7323_v41  ;;  %4269 = vst.msk [vmem:[%s7405_s7 + $0x50] sm:$0xff] %vm268_vm0, %v4515_v17 }
 0x373   : > { %v3566_v6 = vadd.f32 -0.28449672, %v3534_v28  ;;  %v3248_v31 = vand.u32 2147483647, %v7459_v14  ;;  %v1729_v42 = vsel %vm1656_vm4, %v1727_v56, %v1728_v27  ;;  %v1520_v8 = vmul.f32 %v5845_v46, %v7259_v4  ;;  %v4164_v47 = vpop.f32.mrf.mxu1 }
 0x374   : > { %v3567_v19 = vadd.f32 -0.28449672, %v3535_v12  ;;  %v3249_v58 = vand.u32 2147483647, %v7466_v11  ;;  %v1521_v63 = vmul.f32 %v5845_v46, %v7271_v44  ;;  %v1731_v32 = vsel %vm1656_vm4, %v1728_v27, %v1730_v26  ;;  %4267 = vst.msk [vmem:[%s7405_s7 + $0x40] sm:$0xff] %vm268_vm0, %v4164_v47 }
 0x375   : > { %v3598_v41 = vmul.f32 %v7414_v61, %v3566_v6  ;;  %v3280_v9 = vmul.f32 0.3275911, %v3248_v31  ;;  %v3696_v43 = vsub.f32 0.0, %v3248_v31  ;;  %v1797_v2 = vadd.f32 %v1729_v42, %v1520_v8  ;;  %v4516_v45 = vpop.f32.mrf.mxu1 }
 0x376   : > { %v3599_v36 = vmul.f32 %v7422_v10, %v3567_v19  ;;  %v3281_v51 = vmul.f32 0.3275911, %v3249_v58  ;;  %v3697_v13 = vsub.f32 0.0, %v3249_v58  ;;  %v1847_v0 = vmul.f32 %v5880_v34, %v7259_v4  ;;  %4270 = vst.msk [vmem:[%s7405_s7 + $0x58] sm:$0xff] %vm268_vm0, %v4516_v45 }
 0x377   : > { %v3630_v57 = vadd.f32 0.2548296, %v3598_v41  ;;  %v3312_v35 = vadd.f32 1.0, %v3280_v9  ;;  %v3728_v54 = vmul.f32 %v3696_v43, %v3248_v31  ;;  %vm3886_vm9 = vcmp.lt.f32.partialorder %v7333_v37, 0.0  ;;  %v4167_v52 = vpop.f32.mrf.mxu1 }
 0x378   : > { %v3631_v3 = vadd.f32 0.2548296, %v3599_v36  ;;  %v3313_v55 = vadd.f32 1.0, %v3281_v51  ;;  %v3729_v60 = vmul.f32 %v3697_v13, %v3249_v58  ;;  %v1848_v5 = vmul.f32 %v5880_v34, %v7271_v44  ;;  %4268 = vst.msk [vmem:[%s7405_s7 + $0x48] sm:$0xff] %vm268_vm0, %v4167_v52 }
 0x379   : > { %v3662_v48 = vmul.f32 %v7414_v61, %v3630_v57  ;;  %vm3887_vm10 = vcmp.lt.f32.partialorder %v7338_v15, 0.0  ;;  %4820 = vrcp.f32 %v3312_v35  ;;  %v3786_v22 = vmul.f32 1.442695, %v3728_v54 }
 0x37a   : > { %v1849_v4 = vmul.f32 %v5880_v34, %v7279_v20  ;;  %v4817_v7 = vpop.eup %4816  ;;  %v3663_v59 = vmul.f32 %v7422_v10, %v3631_v3  ;;  %4822 = vrcp.f32 %v3313_v55  ;;  %v7499_v38 = vmul.f32 1.442695, %v3729_v60  ;;  %v7529_v3 = vld [vmem:[#allocation2 + $0x188] sm:$0xff] }
 0x37b   : > { %v1798_v44 = vadd.f32 %v1731_v32, %v1521_v63  ;;  %v4819_v53 = vpop.eup %4818  ;;  %v3822_v61 = vmul.f32 %v4817_v7, %v3662_v48  ;;  %v1972_v28 = vrot.slane %v1847_v0, 2  ;;  %v1973_v56 = vrot.slane %v1848_v5, 2  ;;  %v7532_v5 = vld [vmem:[#allocation2 + $0x190] sm:$0x3] }
 0x37c   : > { %v1975_v27 = vrot.slane %v1849_v4, 2  ;;  %v3823_v12 = vmul.f32 %v4819_v53, %v3663_v59  ;;  %4824 = vpow2.f32 %v3786_v22  ;;  %v2078_v20 = vmul.f32 %v5894_v49, %v7386_v24 }
 0x37d   : > { %v2079_v10 = vmul.f32 %v5894_v49, %v7388_v18  ;;  %v3854_v26 = vsub.f32 1.0, %v3822_v61  ;;  %v1974_v6 = vsel %vm1901_vm5, %v1972_v28, %v1973_v56  ;;  %v2160_v42 = vmul.f32 %v5909_v33, %v7386_v24 }
 0x37e   : > { %v1976_v31 = vsel %vm1901_vm5, %v1973_v56, %v1975_v27  ;;  %v3855_v50 = vsub.f32 1.0, %v3823_v12  ;;  %v2042_v19 = vadd.f32 %v1974_v6, %v1797_v2  ;;  %v2161_v8 = vmul.f32 %v5909_v33, %v7388_v18  ;;  %v7521_v2 = vld [vmem:[#allocation2 + $0x180] sm:$0xff] }
 0x37f   : > { %v2043_v58 = vadd.f32 %v1976_v31, %v1798_v44  ;;  %v3918_v63 = vsub.f32 0.0, %v3854_v26  ;;  %v2162_v41 = vmul.f32 %v5909_v33, %v7395_v62  ;;  %v2284_v9 = vrot.slane %v2160_v42, 1 }
 0x380   : > { %v2404_v43 = vmul.f32 %v5912_v23, %v7386_v24  ;;  %v3919_v32 = vsub.f32 0.0, %v3855_v50  ;;  %v2110_v17 = vadd.f32 %v2078_v20, %v2042_v19  ;;  %v2285_v51 = vrot.slane %v2161_v8, 1 }
 0x381   : > { %v2111_v36 = vadd.f32 %v2079_v10, %v2043_v58  ;;  %v3950_v13 = vsel %vm3886_vm9, %v3918_v63, %v3854_v26  ;;  %v2287_v57 = vrot.slane %v2162_v41, 1  ;;  %v2405_v35 = vmul.f32 %v5912_v23, %v7388_v18 }
 0x382   : > { %v2406_v54 = vmul.f32 %v5912_v23, %v7395_v62  ;;  %v3951_v0 = vsel %vm3887_vm10, %v3919_v32, %v3855_v50  ;;  %v3982_v47 = vadd.f32 1.0, %v3950_v13  ;;  %v2286_v55 = vsel %vm1656_vm4, %v2284_v9, %v2285_v51 }
 0x383   : > { %v2528_v60 = vrot.slane %v2404_v43, 2  ;;  %v3983_v37 = vadd.f32 1.0, %v3951_v0  ;;  %v2288_v48 = vsel %vm1656_vm4, %v2285_v51, %v2287_v57  ;;  %v2354_v22 = vadd.f32 %v2286_v55, %v2110_v17 }
 0x384   : > { %v2529_v4 = vrot.slane %v2405_v35, 2  ;;  %v4014_v45 = vmul.f32 %v3982_v47, %v7462_v29  ;;  %v2355_v7 = vadd.f32 %v2288_v48, %v2111_v36  ;;  %v2531_v59 = vrot.slane %v2406_v54, 2 }
 0x385   : > { %v2634_v15 = vmul.f32 %v5952_v1, %v7521_v2  ;;  %v4015_v44 = vmul.f32 %v3983_v37, %v7471_v25  ;;  %v2635_v61 = vmul.f32 %v5952_v1, %v7529_v3  ;;  %v2716_v28 = vmul.f32 %v5956_v30, %v7521_v2 }
 0x386   : > { %v2530_v53 = vsel %vm1901_vm5, %v2528_v60, %v2529_v4  ;;  %v7544_v56 = vpop.eup %4820  ;;  %v2532_v27 = vsel %vm1901_vm5, %v2529_v4, %v2531_v59  ;;  %v2717_v52 = vmul.f32 %v5956_v30, %v7529_v3  ;;  %v2718_v12 = vmul.f32 %v5956_v30, %v7532_v5 }
 0x387   : > { %v2598_v29 = vadd.f32 %v2530_v53, %v2354_v22  ;;  %v7551_v25 = vpop.eup %4822  ;;  %v4034_v20 = vpack.c.bf16 %v4015_v44, %v4014_v45  ;;  %v3408_v10 = vmul.f32 1.0614054, %v7544_v56  ;;  %v2599_v26 = vadd.f32 %v2532_v27, %v2355_v7 }
 0x388   : > { %v2840_v6 = vrot.slane %v2716_v28, 1  ;;  %v3409_v31 = vmul.f32 1.0614054, %v7551_v25  ;;  %v2841_v50 = vrot.slane %v2717_v52, 1  ;;  %v2843_v19 = vrot.slane %v2718_v12, 1 }
 0x389   : > { %v2666_v42 = vadd.f32 %v2634_v15, %v2598_v29  ;;  %v7555_v58 = vpop.eup %4824  ;;  %4529 = vmatprep.mubr.msk.bf16.mxu1 %vm1342_vm1, %v4034_v20  ;;  %v3440_v8 = vadd.f32 -1.4531521, %v3408_v10  ;;  %v2667_v63 = vadd.f32 %v2635_v61, %v2599_v26  ;;  %v2960_v41 = vmul.f32 %v5959_v16, %v7521_v2 }
 0x38a   : > { %v2961_v9 = vmul.f32 %v5959_v16, %v7529_v3  ;;  %v3441_v43 = vadd.f32 -1.4531521, %v3409_v31  ;;  %v2842_v32 = vsel %vm1656_vm4, %v2840_v6, %v2841_v50  ;;  %v2844_v17 = vsel %vm1656_vm4, %v2841_v50, %v2843_v19 }
 0x38b   : > { %v2962_v36 = vmul.f32 %v5959_v16, %v7532_v5  ;;  %v3472_v51 = vmul.f32 %v7544_v56, %v3440_v8  ;;  %4826 = vpow2.f32 %v7499_v38  ;;  %v2910_v13 = vadd.f32 %v2842_v32, %v2666_v42 }
 0x38c   : > { %v2911_v57 = vadd.f32 %v2844_v17, %v2667_v63  ;;  %v3473_v35 = vmul.f32 %v7551_v25, %v3441_v43  ;;  %v3084_v54 = vrot.slane %v2960_v41, 2  ;;  %v3085_v0 = vrot.slane %v2961_v9, 2 }
 0x38d   : > { %v3087_v47 = vrot.slane %v2962_v36, 2  ;;  %v3504_v55 = vadd.f32 1.4214138, %v3472_v51  ;;  %v1605_v60 = vmul.f32 %v5848_v21, %v7386_v24  ;;  %v1606_v37 = vmul.f32 %v5848_v21, %v7388_v18 }
 0x38e   : > { %v3505_v48 = vadd.f32 1.4214138, %v3473_v35  ;;  %v3086_v22 = vsel %vm1901_vm5, %v3084_v54, %v3085_v0  ;;  %v1607_v38 = vmul.f32 %v5848_v21, %v7395_v62  ;;  %v7578_v45 = vmul.f32 0.5, %v7447_v39 }
 0x38f   : > { %v3088_v4 = vsel %vm1901_vm5, %v3085_v0, %v3087_v47  ;;  %v3536_v7 = vmul.f32 %v7544_v56, %v3504_v55  ;;  %v7581_v59 = vadd.f32 %v3086_v22, %v2910_v13  ;;  %v1732_v53 = vrot.slane %v1605_v60, 1 }
 0x390   : > { %v7583_v15 = vadd.f32 %v3088_v4, %v2911_v57  ;;  %v3537_v44 = vmul.f32 %v7551_v25, %v3505_v48  ;;  %v1733_v61 = vrot.slane %v1606_v37, 1  ;;  %v1735_v28 = vrot.slane %v1607_v38, 1 }
 0x391   : > { %v3568_v27 = vadd.f32 -0.28449672, %v3536_v7  ;;  %v7587_v29 = vmul.f32 0.70710677, %v7581_v59  ;;  %v1522_v21 = vmul.f32 %v5845_v46, %v7386_v24  ;;  %v1523_v39 = vmul.f32 %v5845_v46, %v7388_v18 }
 0x392   : > { %v3569_v52 = vadd.f32 -0.28449672, %v3537_v44  ;;  %v7594_v12 = vmul.f32 0.70710677, %v7583_v15  ;;  %v1734_v20 = vsel %vm1656_vm4, %v1732_v53, %v1733_v61  ;;  %v1736_v10 = vsel %vm1656_vm4, %v1733_v61, %v1735_v28 }
 0x393   : > { %v7599_v26 = vmul.f32 0.5, %v7451_v40  ;;  %v3600_v6 = vmul.f32 %v7544_v56, %v3568_v27  ;;  %v3250_v31 = vand.u32 2147483647, %v7587_v29  ;;  %v1850_v42 = vmul.f32 %v5880_v34, %v7386_v24 }
 0x394   : > { %v3601_v46 = vmul.f32 %v7551_v25, %v3569_v52  ;;  %v3251_v50 = vand.u32 2147483647, %v7594_v12  ;;  %v1799_v19 = vadd.f32 %v1734_v20, %v1522_v21  ;;  %v1800_v8 = vadd.f32 %v1736_v10, %v1523_v39 }
 0x395   : > { %v3632_v63 = vadd.f32 0.2548296, %v3600_v6  ;;  %v3282_v41 = vmul.f32 0.3275911, %v3250_v31  ;;  %v3698_v9 = vsub.f32 0.0, %v3250_v31  ;;  %v1851_v40 = vmul.f32 %v5880_v34, %v7388_v18 }
 0x396   : > { %v3633_v43 = vadd.f32 0.2548296, %v3601_v46  ;;  %v3283_v32 = vmul.f32 0.3275911, %v3251_v50  ;;  %v3699_v17 = vsub.f32 0.0, %v3251_v50  ;;  %v1852_v36 = vmul.f32 %v5880_v34, %v7395_v62 }
 0x397   : > { %v3664_v24 = vmul.f32 %v7544_v56, %v3632_v63  ;;  %v3314_v51 = vadd.f32 1.0, %v3282_v41  ;;  %v3730_v13 = vmul.f32 %v3698_v9, %v3250_v31  ;;  %v1977_v57 = vrot.slane %v1850_v42, 2  ;;  %v1482_v42 = vld [vmem:[#allocation2 + $0x198] sm:$0xff]  ;;  %v1484_v41 = vld [vmem:[#allocation2 + $0x1a8] sm:$0x3] }
 0x398   : > { %v4827_v35 = vpop.eup %4826  ;;  %v3665_v54 = vmul.f32 %v7551_v25, %v3633_v43  ;;  %v3315_v0 = vadd.f32 1.0, %v3283_v32  ;;  %v3731_v47 = vmul.f32 %v3699_v17, %v3251_v50  ;;  %v1978_v55 = vrot.slane %v1851_v40, 2 }
 0x399   : > { %v3824_v60 = vmul.f32 %v7555_v58, %v3664_v24  ;;  %vm3888_vm11 = vcmp.lt.f32.partialorder %v7459_v14, 0.0  ;;  %4828 = vrcp.f32 %v3314_v51  ;;  %v1980_v18 = vrot.slane %v1852_v36, 2 }
 0x39a   : > { %v3825_v37 = vmul.f32 %v4827_v35, %v3665_v54  ;;  %vm3889_vm12 = vcmp.lt.f32.partialorder %v7466_v11, 0.0  ;;  %4830 = vrcp.f32 %v3315_v0  ;;  %v1979_v34 = vsel %vm1901_vm5, %v1977_v57, %v1978_v55 }
 0x39b   : > { %v3856_v62 = vsub.f32 1.0, %v3824_v60  ;;  %v7617_v56 = vmul.f32 1.442695, %v3730_v13  ;;  %v1981_v25 = vsel %vm1901_vm5, %v1978_v55, %v1980_v18  ;;  %v2044_v48 = vadd.f32 %v1979_v34, %v1799_v19 }
 0x39c   : > { %v3857_v22 = vsub.f32 1.0, %v3825_v37  ;;  %v7620_v4 = vmul.f32 1.442695, %v3731_v47  ;;  %v2045_v58 = vadd.f32 %v1981_v25, %v1800_v8  ;;  %v2080_v38 = vmul.f32 %v5894_v49, %v7521_v2 }
 0x39d   : > { %v3920_v7 = vsub.f32 0.0, %v3856_v62  ;;  %v2081_v44 = vmul.f32 %v5894_v49, %v7529_v3  ;;  %v2163_v53 = vmul.f32 %v5909_v33, %v7521_v2  ;;  %v2164_v61 = vmul.f32 %v5909_v33, %v7529_v3 }
 0x39e   : > { %v3921_v28 = vsub.f32 0.0, %v3857_v22  ;;  %v2112_v27 = vadd.f32 %v2080_v38, %v2044_v48  ;;  %v2165_v21 = vmul.f32 %v5909_v33, %v7532_v5  ;;  %v2407_v39 = vmul.f32 %v5912_v23, %v7521_v2  ;;  %v1483_v33 = vld [vmem:[#allocation2 + $0x1a0] sm:$0xff] }
 0x39f   : > { %v3952_v52 = vsel %vm3888_vm11, %v3920_v7, %v3856_v62  ;;  %v2113_v20 = vadd.f32 %v2081_v44, %v2045_v58  ;;  %v2289_v10 = vrot.slane %v2163_v53, 1  ;;  %v2290_v49 = vrot.slane %v2164_v61, 1 }
 0x3a0   : > { %v3953_v6 = vsel %vm3889_vm12, %v3921_v28, %v3857_v22  ;;  %v3984_v31 = vadd.f32 1.0, %v3952_v52  ;;  %v2292_v46 = vrot.slane %v2165_v21, 1  ;;  %v2408_v50 = vmul.f32 %v5912_v23, %v7529_v3 }
 0x3a1   : > { %v3985_v19 = vadd.f32 1.0, %v3953_v6  ;;  %v2291_v8 = vsel %vm1656_vm4, %v2289_v10, %v2290_v49  ;;  %v2409_v14 = vmul.f32 %v5912_v23, %v7532_v5  ;;  %v2533_v2 = vrot.slane %v2407_v39, 2 }
 0x3a2   : > { %v4016_v63 = vmul.f32 %v3984_v31, %v7578_v45  ;;  %v2293_v11 = vsel %vm1656_vm4, %v2290_v49, %v2292_v46  ;;  %v2356_v9 = vadd.f32 %v2291_v8, %v2112_v27  ;;  %v2534_v40 = vrot.slane %v2408_v50, 2 }
 0x3a3   : > { %v4017_v43 = vmul.f32 %v3985_v19, %v7599_v26  ;;  %v2357_v32 = vadd.f32 %v2293_v11, %v2113_v20  ;;  %v2536_v17 = vrot.slane %v2409_v14, 2  ;;  %v2636_v3 = vmul.f32 %v5952_v1, %v1482_v42 }
 0x3a4   : > { %v2535_v36 = vsel %vm1901_vm5, %v2533_v2, %v2534_v40  ;;  %v2637_v24 = vmul.f32 %v5952_v1, %v1483_v33  ;;  %v2719_v23 = vmul.f32 %v5956_v30, %v1482_v42  ;;  %v2720_v5 = vmul.f32 %v5956_v30, %v1483_v33 }
 0x3a5   : > { %v4035_v45 = vpack.c.bf16 %v4017_v43, %v4016_v63  ;;  %v2537_v51 = vsel %vm1901_vm5, %v2534_v40, %v2536_v17  ;;  %v2600_v13 = vadd.f32 %v2535_v36, %v2356_v9  ;;  %v2721_v57 = vmul.f32 %v5956_v30, %v1484_v41 }
 0x3a6   : > { %v4829_v35 = vpop.eup %4828  ;;  %v2601_v26 = vadd.f32 %v2537_v51, %v2357_v32  ;;  %v2845_v54 = vrot.slane %v2719_v23, 1  ;;  %v2846_v0 = vrot.slane %v2720_v5, 1  ;;  %v2963_v47 = vmul.f32 %v5959_v16, %v1482_v42 }
 0x3a7   : > { %v4831_v55 = vpop.eup %4830  ;;  %4530 = vmatmul.mubr.msk.bf16.gmra.mxu1 %vm1342_vm1, %v4035_v45  ;;  %v3410_v1 = vmul.f32 1.0614054, %v4829_v35  ;;  %v2668_v60 = vadd.f32 %v2636_v3, %v2600_v13  ;;  %v2848_v18 = vrot.slane %v2721_v57, 1  ;;  %v2964_v37 = vmul.f32 %v5959_v16, %v1483_v33 }
 0x3a8   : > { %v3411_v34 = vmul.f32 1.0614054, %v4831_v55  ;;  %v2669_v62 = vadd.f32 %v2637_v24, %v2601_v26  ;;  %v2847_v25 = vsel %vm1656_vm4, %v2845_v54, %v2846_v0  ;;  %v2965_v30 = vmul.f32 %v5959_v16, %v1484_v41 }
 0x3a9   : > { %v3442_v48 = vadd.f32 -1.4531521, %v3410_v1  ;;  %v2849_v22 = vsel %vm1656_vm4, %v2846_v0, %v2848_v18  ;;  %v2912_v58 = vadd.f32 %v2847_v25, %v2668_v60  ;;  %v3089_v38 = vrot.slane %v2963_v47, 2 }
 0x3aa   : > { %v3443_v7 = vadd.f32 -1.4531521, %v3411_v34  ;;  %v2913_v44 = vadd.f32 %v2849_v22, %v2669_v62  ;;  %v3090_v53 = vrot.slane %v2964_v37, 2  ;;  %v3092_v61 = vrot.slane %v2965_v30, 2 }
 0x3ab   : > { %v3474_v28 = vmul.f32 %v4829_v35, %v3442_v48  ;;  %4832 = vpow2.f32 %v7617_v56  ;;  %vm3890_vm4 = vcmp.lt.f32.partialorder %v7587_v29, 0.0 }
 0x3ac   : > { %v3475_v27 = vmul.f32 %v4831_v55, %v3443_v7  ;;  %4834 = vpow2.f32 %v7620_v4  ;;  %v3091_v21 = vsel %vm1901_vm5, %v3089_v38, %v3090_v53  ;;  %v3093_v16 = vsel %vm1901_vm5, %v3090_v53, %v3092_v61 }
 0x3ad   : > { %v3506_v39 = vadd.f32 1.4214138, %v3474_v28  ;;  %v7663_v52 = vadd.f32 %v3091_v21, %v2912_v58  ;;  %v7665_v20 = vadd.f32 %v3093_v16, %v2913_v44  ;;  %vm3891_vm5 = vcmp.lt.f32.partialorder %v7594_v12, 0.0 }
 0x3ae   : > { %v3507_v10 = vadd.f32 1.4214138, %v3475_v27 }
 0x3af   : > { %v3538_v49 = vmul.f32 %v4829_v35, %v3506_v39  ;;  %v7668_v6 = vmul.f32 0.70710677, %v7663_v52  ;;  %v4519_v56 = vpop.f32.mrf.mxu1  ;;  %v7671_v4 = vmul.f32 0.70710677, %v7665_v20 }
 0x3b0   : > { %v3539_v31 = vmul.f32 %v4831_v55, %v3507_v10  ;;  %4273 = vst.msk [vmem:[%s7405_s7 + $0x70] sm:$0xff] %vm268_vm0, %v4519_v56 }
 0x3b1   : > { %v3570_v42 = vadd.f32 -0.28449672, %v3538_v49  ;;  %v3252_v46 = vand.u32 2147483647, %v7668_v6  ;;  %v4180_v50 = vpop.f32.mrf.mxu1  ;;  %v3253_v33 = vand.u32 2147483647, %v7671_v4 }
 0x3b2   : > { %v3571_v19 = vadd.f32 -0.28449672, %v3539_v31  ;;  %4271 = vst.msk [vmem:[%s7405_s7 + $0x60] sm:$0xff] %vm268_vm0, %v4180_v50  ;;  %vm3892_vm13 = vcmp.lt.f32.partialorder %v7668_v6, 0.0  ;;  %vm3893_vm14 = vcmp.lt.f32.partialorder %v7671_v4, 0.0 }
 0x3b3   : > { %v3602_v8 = vmul.f32 %v4829_v35, %v3570_v42  ;;  %v3284_v14 = vmul.f32 0.3275911, %v3252_v46  ;;  %v4520_v2 = vpop.f32.mrf.mxu1  ;;  %v3285_v41 = vmul.f32 0.3275911, %v3253_v33  ;;  %v3700_v57 = vsub.f32 0.0, %v3252_v46 }
 0x3b4   : > { %v3603_v63 = vmul.f32 %v4831_v55, %v3571_v19  ;;  %4274 = vst.msk [vmem:[%s7405_s7 + $0x78] sm:$0xff] %vm268_vm0, %v4520_v2  ;;  %v3701_v54 = vsub.f32 0.0, %v3253_v33 }
 0x3b5   : > { %v3634_v11 = vadd.f32 0.2548296, %v3602_v8  ;;  %v3316_v9 = vadd.f32 1.0, %v3284_v14  ;;  %v4183_v40 = vpop.f32.mrf.mxu1  ;;  %v3317_v32 = vadd.f32 1.0, %v3285_v41  ;;  %v3732_v18 = vmul.f32 %v3700_v57, %v3252_v46 }
 0x3b6   : > { %v3635_v43 = vadd.f32 0.2548296, %v3603_v63  ;;  %4272 = vst.msk [vmem:[%s7405_s7 + $0x68] sm:$0xff] %vm268_vm0, %v4183_v40  ;;  %v3733_v34 = vmul.f32 %v3701_v54, %v3253_v33  ;;  %v3188_v41 = vmul.f32 0.5, %v7663_v52  ;;  %v3189_v40 = vmul.f32 0.5, %v7665_v20 }
 0x3b7   : > { %v3666_v17 = vmul.f32 %v4829_v35, %v3634_v11  ;;  %4836 = vrcp.f32 %v3316_v9  ;;  %v3186_v35 = vmul.f32 0.5, %v7581_v59  ;;  %v3794_v22 = vmul.f32 1.442695, %v3732_v18 }
 0x3b8   : > { %v4833_v3 = vpop.eup %4832  ;;  %v3667_v36 = vmul.f32 %v4831_v55, %v3635_v43  ;;  %4838 = vrcp.f32 %v3317_v32  ;;  %v3187_v55 = vmul.f32 0.5, %v7583_v15  ;;  %v3796_v38 = vmul.f32 1.442695, %v3733_v34 }
 0x3b9   : > { %v4835_v24 = vpop.eup %4834  ;;  %v3826_v23 = vmul.f32 %v4833_v3, %v3666_v17  ;;  %4840 = vpow2.f32 %v3794_v22 }
 0x3ba   : > { %v3827_v5 = vmul.f32 %v4835_v24, %v3667_v36  ;;  %4842 = vpow2.f32 %v3796_v38 }
 0x3bb   : > { %v3858_v45 = vsub.f32 1.0, %v3826_v23 }
 0x3bc   : > { %v3859_v51 = vsub.f32 1.0, %v3827_v5 }
 0x3bd   : > { %v3922_v13 = vsub.f32 0.0, %v3858_v45 }
 0x3be   : > { %v3923_v26 = vsub.f32 0.0, %v3859_v51 }
 0x3bf   : > { %v3954_v0 = vsel %vm3890_vm4, %v3922_v13, %v3858_v45 }
 0x3c0   : > { %v3955_v47 = vsel %vm3891_vm5, %v3923_v26, %v3859_v51  ;;  %v3986_v1 = vadd.f32 1.0, %v3954_v0 }
 0x3c1   : > { %v3987_v60 = vadd.f32 1.0, %v3955_v47 }
 0x3c2   : > { %v4018_v37 = vmul.f32 %v3986_v1, %v3186_v35 }
 0x3c3   : > { %v4019_v62 = vmul.f32 %v3987_v60, %v3187_v55 }
 0x3c4   : > { %v4837_v25 = vpop.eup %4836 }
 0x3c5   : > { %v4839_v30 = vpop.eup %4838  ;;  %v4036_v48 = vpack.c.bf16 %v4019_v62, %v4018_v37  ;;  %v3412_v29 = vmul.f32 1.0614054, %v4837_v25 }
 0x3c6   : > { %v3413_v58 = vmul.f32 1.0614054, %v4839_v30  ;;  %v4841_v31 = vpop.eup %4840 }
 0x3c7   : > { %4533 = vmatprep.mubr.msk.bf16.mxu1 %vm1342_vm1, %v4036_v48  ;;  %v3444_v12 = vadd.f32 -1.4531521, %v3412_v29  ;;  %v4843_v46 = vpop.eup %4842 }
 0x3c8   : > { %v3445_v59 = vadd.f32 -1.4531521, %v3413_v58 }
 0x3c9   : > { %v3476_v7 = vmul.f32 %v4837_v25, %v3444_v12 }
 0x3ca   : > { %v3477_v44 = vmul.f32 %v4839_v30, %v3445_v59 }
 0x3cb   : > { %v3508_v15 = vadd.f32 1.4214138, %v3476_v7 }
 0x3cc   : > { %v3509_v53 = vadd.f32 1.4214138, %v3477_v44 }
 0x3cd   : > { %v3540_v61 = vmul.f32 %v4837_v25, %v3508_v15 }
 0x3ce   : > { %v3541_v28 = vmul.f32 %v4839_v30, %v3509_v53 }
 0x3cf   : > { %v3572_v27 = vadd.f32 -0.28449672, %v3540_v61 }
 0x3d0   : > { %v3573_v21 = vadd.f32 -0.28449672, %v3541_v28 }
 0x3d1   : > { %v3604_v16 = vmul.f32 %v4837_v25, %v3572_v27 }
 0x3d2   : > { %v3605_v39 = vmul.f32 %v4839_v30, %v3573_v21 }
 0x3d3   : > { %v3636_v10 = vadd.f32 0.2548296, %v3604_v16 }
 0x3d4   : > { %v3637_v49 = vadd.f32 0.2548296, %v3605_v39 }
 0x3d5   : > { %v3668_v56 = vmul.f32 %v4837_v25, %v3636_v10 }
 0x3d6   : > { %v3669_v42 = vmul.f32 %v4839_v30, %v3637_v49 }
 0x3d7   : > { %v3828_v50 = vmul.f32 %v4841_v31, %v3668_v56 }
 0x3d8   : > { %v3829_v19 = vmul.f32 %v4843_v46, %v3669_v42 }
 0x3d9   : > { %v3860_v33 = vsub.f32 1.0, %v3828_v50 }
 0x3da   : > { %v3861_v8 = vsub.f32 1.0, %v3829_v19 }
 0x3db   : > { %v3924_v14 = vsub.f32 0.0, %v3860_v33 }
 0x3dc   : > { %v3925_v2 = vsub.f32 0.0, %v3861_v8 }
 0x3dd   : > { %v3956_v63 = vsel %vm3892_vm13, %v3924_v14, %v3860_v33 }
 0x3de   : > { %v3957_v11 = vsel %vm3893_vm14, %v3925_v2, %v3861_v8  ;;  %v3988_v9 = vadd.f32 1.0, %v3956_v63 }
 0x3df   : > { %v3989_v43 = vadd.f32 1.0, %v3957_v11 }
 0x3e0   : > { %v4020_v32 = vmul.f32 %v3988_v9, %v3188_v41 }
 0x3e1   : > { %v4021_v17 = vmul.f32 %v3989_v43, %v3189_v40 }
 0x3e3   : > { %v4037_v6 = vpack.c.bf16 %v4021_v17, %v4020_v32 }
 0x3e5   : > { %4534 = vmatmul.mubr.msk.bf16.gmra.mxu1 %vm1342_vm1, %v4037_v6 }
 0x3ec   : > { %v4523_v4 = vpop.f32.mrf.mxu1 }
 0x3ed   : > { %4277 = vst.msk [vmem:[%s7405_s7 + $0x90] sm:$0xff] %vm268_vm0, %v4523_v4 }
 0x3ee   : > { %v4196_v52 = vpop.f32.mrf.mxu1 }
 0x3ef   : > { %4275 = vst.msk [vmem:[%s7405_s7 + $0x80] sm:$0xff] %vm268_vm0, %v4196_v52 }
 0x3f0   : > { %v4524_v3 = vpop.f32.mrf.mxu1 }
 0x3f1   : > { %4278 = vst.msk [vmem:[%s7405_s7 + $0x98] sm:$0xff] %vm268_vm0, %v4524_v3 }
 0x3f2   : > { %v4199_v20 = vpop.f32.mrf.mxu1 }
 0x3f3   : > { %4276 = vst.msk [vmem:[%s7405_s7 + $0x88] sm:$0xff] %vm268_vm0, %v4199_v20 }
 0x42a   : > { %v4527_v36 = vpop.f32.mrf.mxu1 }
 0x42b   : > { %4281 = vst.msk [vmem:[%s7405_s7 + $0xb0] sm:$0xff] %vm268_vm0, %v4527_v36 }
 0x42c   : > { %v4212_v24 = vpop.f32.mrf.mxu1 }
 0x42d   : > { %4279 = vst.msk [vmem:[%s7405_s7 + $0xa0] sm:$0xff] %vm268_vm0, %v4212_v24 }
 0x42e   : > { %v4528_v23 = vpop.f32.mrf.mxu1 }
 0x42f   : > { %4282 = vst.msk [vmem:[%s7405_s7 + $0xb8] sm:$0xff] %vm268_vm0, %v4528_v23 }
 0x430   : > { %v4215_v5 = vpop.f32.mrf.mxu1 }
 0x431   : > { %4280 = vst.msk [vmem:[%s7405_s7 + $0xa8] sm:$0xff] %vm268_vm0, %v4215_v5 }
 0x467   : > { %v4531_v45 = vpop.f32.mrf.mxu1 }
 0x468   : > { %4285 = vst.msk [vmem:[%s7405_s7 + $0xd0] sm:$0xff] %vm268_vm0, %v4531_v45 }
 0x469   : > { %v4228_v51 = vpop.f32.mrf.mxu1 }
 0x46a   : > { %4283 = vst.msk [vmem:[%s7405_s7 + $0xc0] sm:$0xff] %vm268_vm0, %v4228_v51 }
 0x46b   : > { %v4532_v13 = vpop.f32.mrf.mxu1 }
 0x46c   : > { %4286 = vst.msk [vmem:[%s7405_s7 + $0xd8] sm:$0xff] %vm268_vm0, %v4532_v13 }
 0x46d   : > { %v4231_v57 = vpop.f32.mrf.mxu1 }
 0x46e   : > { %4284 = vst.msk [vmem:[%s7405_s7 + $0xc8] sm:$0xff] %vm268_vm0, %v4231_v57 }
 0x4a5   : > { %v4535_v26 = vpop.f32.mrf.mxu1 }
 0x4a6   : > { %4289 = vst.msk [vmem:[%s7405_s7 + $0xf0] sm:$0xff] %vm268_vm0, %v4535_v26 }
 0x4a7   : > { %v4244_v54 = vpop.f32.mrf.mxu1 }
 0x4a8   : > { %4287 = vst.msk [vmem:[%s7405_s7 + $0xe0] sm:$0xff] %vm268_vm0, %v4244_v54 }
 0x4a9   : > { %v4536_v0 = vpop.f32.mrf.mxu1 }
 0x4aa   : > { %4290 = vst.msk [vmem:[%s7405_s7 + $0xf8] sm:$0xff] %vm268_vm0, %v4536_v0 }
 0x4ab   : > { %v4247_v35 = vpop.f32.mrf.mxu1 }
 0x4ac   : > { %4288 = vst.msk [vmem:[%s7405_s7 + $0xe8] sm:$0xff] %vm268_vm0, %v4247_v35 }
 0x4ad   : > { %4885 = shalt.err (!%p4882_p10)
}
 0x4ae   : > { %s4886_s23 = scalar_lea.hbm %s7726_s8, 4096  ;;  %s4890_s30 = scalar_lea.hbm %s7779_s4, 8192 }
 0x4af   : > { %p4887_p0 = scmp.ne.s32.totalorder %s7726_s8, %s4886_s23  ;;  %p4891_p1 = scmp.lt.s32.totalorder %s7726_s8, %s7779_s4 }
 0x4b0   : > { %p4892_p3 = scmp.lt.s32.totalorder %s4890_s30, %s4886_s23 }
 0x4b1   : > { %p4888_p2 = pnand %p4887_p0, %p7788_p12 }
 0x4b2   : > { %p4893_p6 = por %p4892_p3, %p4891_p1 }
 0x4b3   : > { %p4889_p9 = pneg %p4888_p2 }
 0x4b5   : > { %p4894_p11 = pnand %p4893_p6, %p4889_p9 }
 0x4b7   : > { %4897 = shalt.err (!%p4894_p11)
}
 0x4b8   : > { %s4943_s7 = smov 128   ;;  %s4944_s14 = smov 8  }
 0x4b9   : > { %4539 = dma.vmem_to_hbm [thread:$0]  (%p7788_p12), %s7728_s9, 4096, %s7726_s8, %s4292_s19, %s4943_s7, %s4943_s7, %s4944_s14  }
 0x4ba PF: > { %s4320_s20 = sand.u32 1, %s4924_s15   ;;  %p7789_p13 = scmp.ne.s32.totalorder %s7785_s28, 0 }
 0x4bb   : > { %p7790_p4 = scmp.ge.s32.totalorder %s4936_s18, 2  ;;  %s4321_s22 = scalar_lea.sflag [#allocation5], %s4320_s20 }
 0x4bd   : > { %p4546_p5 = pnand %p7790_p4, %p7789_p13 }
 0x4bf   : > { %p4547_p7 = pneg %p4546_p5 }
 0x4c1   : > { %4919 = dma.done.wait (%p4547_p7), %s4321_s22, 4096  }
 0x4c2   : > { %4921 = vsyncadd (%p4547_p7), %s4321_s22, 4294963200  ;;  %p17_p8 = scmp.ge.s32.totalorder %s4995_s21, 4   ;;  %s7791_s15 = smov %s4928_s16 }
 0x4c3   : > { %s7792_s16 = smov %s4932_s17  ;;  %s7793_s17 = smov %s5007_s24 }
 0x4c4   : > { %s7794_s18 = smov %s4995_s21  ;;  %19 = sbr.rel (!%p17_p8) target bundleno = 5 (0x5), region = 82 }
 0x4c9   :  { %4326 = vsyncpa [#allocation4], 1 }
 0x4ca   :  { %4328 = vsyncpa [#allocation4 + $0x1], 1 }
 0x4cb   :  { %4329 = vsyncpa [#allocation5], 1 }
 0x4cc   :  { %4331 = vsyncpa [#allocation5 + $0x1], 1 }

</bundles_post_ra>
